<compile_context>
chip_gen: v7x
topology: tpu7x:2x2x1
jax: 0.10.0
libtpu: 0.0.40
codegen_flags: <defaults>
</compile_context>

<pallas_src>
import functools

import jax
import jax.numpy as jnp
from jax.experimental import pallas as pl
from jax.experimental.pallas import tpu as pltpu

EPS = 1e-6                      # torchvision ConvNeXt LayerNorm eps
LANE = 128
_INV_SQRT2 = 0.7071067811865476
_SQRT_2_OVER_PI = 0.7978845608028654


# ---------------------------------------------------------------- helpers ----
def _round_up(x, m):
    return (x + m - 1) // m * m


def _gelu_exact(x):
    # torch.nn.GELU() default = exact erf-based GELU
    return 0.5 * x * (1.0 + jax.lax.erf(x * _INV_SQRT2))


def _gelu_tanh(x):
    # optional tanh approximation (EUP slot, effectively free when VALU-bound)
    return 0.5 * x * (1.0 + jnp.tanh(_SQRT_2_OVER_PI * (x + 0.044715 * x * x * x)))


def _layernorm_padded(x, g, b, c_actual):
    # x has `c_actual` real channels followed by zero padding up to the lane width.
    # Padding lanes contribute 0 to both sums, so dividing by c_actual gives the
    # exact LayerNorm statistics over the real channels (biased var, eps in sqrt).
    inv_c = 1.0 / float(c_actual)
    mu = jnp.sum(x, axis=-1, keepdims=True) * inv_c
    ex2 = jnp.sum(x * x, axis=-1, keepdims=True) * inv_c
    var = ex2 - mu * mu
    return (x - mu) * jax.lax.rsqrt(var + EPS) * g + b


# ----------------------------------------------------------------- kernel ----
def fused_kernel(patch_ref, stem_w_ref, stem_b_ref, stem_g_ref, stem_beta_ref,
                 dww_ref, dwb_ref, lng_ref, lnb_ref,
                 w1_ref, b1_ref, w2_ref, b2_ref, gamma_ref,
                 pooled_ref, xpad_ref, *, hp, wp, c_actual, imgs, approx_gelu):
    # One grid step processes `imgs` images end-to-end:
    #   stem matmul + LN -> per-image dwconv7x7 -> LN -> MLP -> layer_scale
    #   -> residual -> per-image mean pool (head fusion).
    cp = stem_w_ref.shape[1]
    hpad, wpad = xpad_ref.shape[0], xpad_ref.shape[1]
    rows = hpad * wpad
    t = hp * wp
    span = (hp + 6) * wpad                       # multiple of 8 (wpad is)

    # ---- stem: patch-embed matmul (bf16 MXU operands, f32 acc) + channel LN -----
    y = jnp.dot(patch_ref[0], stem_w_ref[...],
                preferred_element_type=jnp.float32) + stem_b_ref[...]
    tok = _layernorm_padded(y, stem_g_ref[...], stem_beta_ref[...], c_actual)

    # ---- zero ONLY the halo bands; the interior is fully overwritten per image. --
    # Done every step (not program_id==0-gated) so it stays correct under v7x
    # megacore with a "parallel" grid axis (each core has its own scratch).
    xpad_ref[0:3, :, :] = jnp.zeros((3, wpad, cp), jnp.float32)
    xpad_ref[3 + hp:hpad, :, :] = jnp.zeros((hpad - 3 - hp, wpad, cp), jnp.float32)
    xpad_ref[3:3 + hp, 0:8, :] = jnp.zeros((hp, 8, cp), jnp.float32)
    xpad_ref[3:3 + hp, 8 + wp:wpad, :] = jnp.zeros((hp, wpad - 8 - wp, cp),
                                                   jnp.float32)

    # ---- depthwise 7x7 conv, one image at a time (unrolled), f32 VPU MAC --------
    # Interior lives at [3:3+hp, 8:8+wp]; output (oh, ow) needs
    # xpad[oh+ky, ow+kx+5].  On the flattened (rows, cp) frame the per-tap offset is
    # ky*wpad + kx + 5; the kx+5 sublane shift is done with pltpu.roll (XLU slot,
    # idle during the MAC) and the remaining slices are all 8-aligned.  Max flat
    # index used = (hp+6)*wpad + 10 < rows (wpad >= 16), so no wraparound reaches a
    # valid output position, and junk columns are discarded by the [:, :wp] slice.
    w49 = dww_ref[...]                                    # (49, cp) f32
    wrow = [w49[i, :] for i in range(49)]                 # hoisted row extracts
    bias_full = jnp.broadcast_to(dwb_ref[...], (hp * wpad, cp))   # hoisted
    conv_imgs = []
    for img in range(imgs):
        xi = tok[img * t:(img + 1) * t, :]                # (t, cp)
        xpad_ref[3:3 + hp, 8:8 + wp, :] = xi.reshape(hp, wp, cp)
        src = xpad_ref[...].reshape(rows, cp)             # aligned collapse (wpad%8==0)
        acc = bias_full
        for kx in range(7):
            shifted = pltpu.roll(src, shift=rows - (kx + 5), axis=0)[:span, :]
            for ky in range(7):
                # TODO(synk): PyTorch depthwise weights (C,1,7,7) must be permuted to
                # (ky*7+kx, channel) ordering when porting real checkpoints.
                win = shifted[ky * wpad:ky * wpad + hp * wpad, :]   # 8-aligned
                acc = acc + win * wrow[ky * 7 + kx]
        conv_imgs.append(acc.reshape(hp, wpad, cp)[:, :wp, :].reshape(t, cp))
    conv = conv_imgs[0] if imgs == 1 else jnp.concatenate(conv_imgs, axis=0)

    # ---- LN -> Linear(C,4C) -> GELU -> Linear(4C,C) -> layer_scale -> residual --
    # on the concatenated (imgs*t, cp) token matrix (bigger MXU M per matmul).
    xn = _layernorm_padded(conv, lng_ref[...], lnb_ref[...], c_actual)
    h = jnp.dot(xn.astype(jnp.bfloat16), w1_ref[...],
                preferred_element_type=jnp.float32) + b1_ref[...]
    h = _gelu_tanh(h) if approx_gelu else _gelu_exact(h)
    yv = jnp.dot(h.astype(jnp.bfloat16), w2_ref[...],
                 preferred_element_type=jnp.float32) + b2_ref[...]
    out_tok = tok + gamma_ref[...] * yv                   # (imgs*t, cp)

    # ---- fused head pooling: per-image global average over tokens ---------------
    # TODO(synk): Dropout(p=0.5) only affects training; inference is identity.
    pooled = jnp.sum(out_tok.reshape(imgs, t, cp), axis=1) * (1.0 / float(t))
    pooled_ref[...] = pooled.reshape(1, imgs, cp)


# ---------------------------------------------------------------- params ----
def init_params(key, in_chans=3, dim=32, expansion=4, output_shape=10, patch=4):
    cp = _round_up(dim, LANE)
    hid = _round_up(expansion * dim, LANE)
    outp = _round_up(output_shape, LANE)
    kdim = patch * patch * in_chans
    kdim_pad = _round_up(kdim, LANE)
    ks = jax.random.split(key, 5)

    def padc(a, shape):  # zero-pad a 2-D array up to `shape`
        return jnp.zeros(shape, a.dtype).at[:a.shape[0], :a.shape[1]].set(a)

    stem_w = jax.random.normal(ks[0], (kdim, dim), jnp.float32) * 0.02
    dw_w = jax.random.normal(ks[1], (49, dim), jnp.float32) * 0.02
    w1 = jax.random.normal(ks[2], (dim, expansion * dim), jnp.float32) * 0.02
    w2 = jax.random.normal(ks[3], (expansion * dim, dim), jnp.float32) * 0.02
    head_w = jax.random.normal(ks[4], (dim, output_shape), jnp.float32) * 0.02

    ones_c = padc(jnp.ones((1, dim), jnp.float32), (1, cp))

    # Channel dims zero-padded to 128 lanes (lane-dense vregs / stores); padded
    # lanes are exact zeros and stay identically zero through the whole network.
    return {
        "stem_w": padc(stem_w, (kdim_pad, cp)).astype(jnp.bfloat16),
        "stem_b": jnp.zeros((1, cp), jnp.float32),
        "stem_ln_g": ones_c,
        "stem_ln_b": jnp.zeros((1, cp), jnp.float32),
        # TODO(synk): PyTorch depthwise weights (C,1,7,7) -> reshape/permute to
        # (ky*7+kx, C) before use with real checkpoints.
        "dw_w": padc(dw_w, (49, cp)),                     # f32: VPU MAC stays f32
        "dw_b": jnp.zeros((1, cp), jnp.float32),
        "ln_g": ones_c,
        "ln_b": jnp.zeros((1, cp), jnp.float32),
        "w1": padc(w1, (cp, hid)).astype(jnp.bfloat16),
        "b1": jnp.zeros((1, hid), jnp.float32),
        "w2": padc(w2, (hid, cp)).astype(jnp.bfloat16),
        "b2": jnp.zeros((1, cp), jnp.float32),
        "layer_scale": padc(jnp.full((1, dim), 1e-6, jnp.float32), (1, cp)),
        "head_w": padc(head_w, (cp, outp)).astype(jnp.bfloat16),
        "head_b": jnp.zeros((1, outp), jnp.float32),
    }


# ---------------------------------------------------------------- wrapper ----
def convnext_custom_forward(x_nchw, params, *, dim=32, output_shape=10, patch=4,
                            approx_gelu=False):
    n, cin, himg, wimg = x_nchw.shape
    assert himg % patch == 0 and wimg % patch == 0
    hp, wp = himg // patch, wimg // patch
    t = hp * wp
    kdim = patch * patch * cin
    cp = params["w1"].shape[0]
    hid = params["w1"].shape[1]
    kdim_pad = params["stem_w"].shape[0]

    # Images per grid step: target >= 128 token rows per MXU matmul.
    # TODO(synk): on v7x prefer >= 2 "parallel" steps when n*t is large enough to
    # keep M >= 128 on both TensorCores; at n=2, t=16 we prioritize matmul M.
    ipt = max(1, min(n, -(-128 // t)))
    while n % ipt:
        ipt -= 1
    n_steps = n // ipt

    # ---- glue: NCHW -> NHWC -> 4x4 patch rows (n-major tokens); the patch dim is
    # zero-padded to a full lane width and cast to bf16 (MXU operand dtype).
    x = jnp.transpose(x_nchw, (0, 2, 3, 1)).astype(jnp.float32)
    patches = (x.reshape(n, hp, patch, wp, patch, cin)
                 .transpose(0, 1, 3, 2, 4, 5)
                 .reshape(n * t, kdim))
    patches = jnp.pad(patches, ((0, 0), (0, kdim_pad - kdim))).astype(jnp.bfloat16)
    patches = patches.reshape(n_steps, ipt * t, kdim_pad)

    hpad = hp + 7                            # 3 top + hp + 3 bottom + 1 slack row
    wpad = _round_up(wp + 11, 8)             # 8 left (aligned scatter) + wp + >=3 right

    def wspec(shape):                        # whole-array weight block
        return pl.BlockSpec(shape, lambda i: (0, 0))

    pooled = pl.pallas_call(
        functools.partial(fused_kernel, hp=hp, wp=wp, c_actual=dim, imgs=ipt,
                          approx_gelu=approx_gelu),
        out_shape=jax.ShapeDtypeStruct((n_steps, ipt, cp), jnp.float32),
        grid=(n_steps,),
        in_specs=[
            pl.BlockSpec((1, ipt * t, kdim_pad), lambda i: (i, 0, 0)),
            wspec((kdim_pad, cp)), wspec((1, cp)), wspec((1, cp)), wspec((1, cp)),
            wspec((49, cp)), wspec((1, cp)), wspec((1, cp)), wspec((1, cp)),
            wspec((cp, hid)), wspec((1, hid)), wspec((hid, cp)), wspec((1, cp)),
            wspec((1, cp)),
        ],
        out_specs=pl.BlockSpec((1, ipt, cp), lambda i: (i, 0, 0)),
        scratch_shapes=[pltpu.VMEM((hpad, wpad, cp), jnp.float32)],
        compiler_params=pltpu.CompilerParams(
            dimension_semantics=("parallel",)),
    )(patches, params["stem_w"], params["stem_b"],
      params["stem_ln_g"], params["stem_ln_b"],
      params["dw_w"], params["dw_b"], params["ln_g"], params["ln_b"],
      params["w1"], params["b1"], params["w2"], params["b2"],
      params["layer_scale"])

    pooled = pooled.reshape(n, cp)

    # ---- head: Dropout(p=0.5) is identity at eval; the tiny (N,C)@(C,out)
    # classifier matmul is left to plain XLA (review: delete the head kernel).
    logits = jnp.dot(pooled.astype(jnp.bfloat16), params["head_w"],
                     preferred_element_type=jnp.float32) + params["head_b"]
    return logits[:, :output_shape]


if __name__ == "__main__":
    key = jax.random.PRNGKey(0)
    k_x, k_p = jax.random.split(key)

    batch, in_chans, spatial = 2, 3, 16
    dim, output_shape = 32, 10

    x = jax.random.normal(k_x, (batch, in_chans, spatial, spatial), jnp.float32)  # NCHW
    params = init_params(k_p, in_chans=in_chans, dim=dim, expansion=4,
                         output_shape=output_shape, patch=4)

    logits = convnext_custom_forward(x, params, dim=dim,
                                     output_shape=output_shape, patch=4)
    jax.block_until_ready(logits)
    assert logits.shape == (batch, output_shape), logits.shape
    print("KERNEL_OK")
</pallas_src>

<mosaic_0001>
module attributes {stable_mosaic.version = 11 : i64} {
  func.func @fused_kernel(%arg0: i32, %arg1: memref<1x32x128xbf16, #tpu.memory_space<vmem>>, %arg2: memref<128x128xbf16, #tpu.memory_space<vmem>>, %arg3: memref<1x128xf32, #tpu.memory_space<vmem>>, %arg4: memref<1x128xf32, #tpu.memory_space<vmem>>, %arg5: memref<1x128xf32, #tpu.memory_space<vmem>>, %arg6: memref<49x128xf32, #tpu.memory_space<vmem>>, %arg7: memref<1x128xf32, #tpu.memory_space<vmem>>, %arg8: memref<1x128xf32, #tpu.memory_space<vmem>>, %arg9: memref<1x128xf32, #tpu.memory_space<vmem>>, %arg10: memref<128x128xbf16, #tpu.memory_space<vmem>>, %arg11: memref<1x128xf32, #tpu.memory_space<vmem>>, %arg12: memref<128x128xbf16, #tpu.memory_space<vmem>>, %arg13: memref<1x128xf32, #tpu.memory_space<vmem>>, %arg14: memref<1x128xf32, #tpu.memory_space<vmem>>, %arg15: memref<1x2x128xf32, #tpu.memory_space<vmem>>, %arg16: memref<11x16x128xf32, #tpu.memory_space<vmem>>) attributes {dimension_semantics = [#tpu.dimension_semantics<parallel>], iteration_bounds = array<i64: 1>, scalar_prefetch = 0 : i64, scratch_operands = 1 : i64, tpu.core_type = #tpu.core_type<tc>, window_params = [{transform_indices = @transform_0, window_bounds = array<i64: 1, 32, 128>}, {pipeline_mode = #tpu.pipeline_mode<synchronous>, transform_indices = @transform_1, window_bounds = array<i64: 128, 128>}, {pipeline_mode = #tpu.pipeline_mode<synchronous>, transform_indices = @transform_2, window_bounds = array<i64: 1, 128>}, {pipeline_mode = #tpu.pipeline_mode<synchronous>, transform_indices = @transform_3, window_bounds = array<i64: 1, 128>}, {pipeline_mode = #tpu.pipeline_mode<synchronous>, transform_indices = @transform_4, window_bounds = array<i64: 1, 128>}, {pipeline_mode = #tpu.pipeline_mode<synchronous>, transform_indices = @transform_5, window_bounds = array<i64: 49, 128>}, {pipeline_mode = #tpu.pipeline_mode<synchronous>, transform_indices = @transform_6, window_bounds = array<i64: 1, 128>}, {pipeline_mode = #tpu.pipeline_mode<synchronous>, transform_indices = @transform_7, window_bounds = array<i64: 1, 128>}, {pipeline_mode = #tpu.pipeline_mode<synchronous>, transform_indices = @transform_8, window_bounds = array<i64: 1, 128>}, {pipeline_mode = #tpu.pipeline_mode<synchronous>, transform_indices = @transform_9, window_bounds = array<i64: 128, 128>}, {pipeline_mode = #tpu.pipeline_mode<synchronous>, transform_indices = @transform_10, window_bounds = array<i64: 1, 128>}, {pipeline_mode = #tpu.pipeline_mode<synchronous>, transform_indices = @transform_11, window_bounds = array<i64: 128, 128>}, {pipeline_mode = #tpu.pipeline_mode<synchronous>, transform_indices = @transform_12, window_bounds = array<i64: 1, 128>}, {pipeline_mode = #tpu.pipeline_mode<synchronous>, transform_indices = @transform_13, window_bounds = array<i64: 1, 128>}, {transform_indices = @transform_14, window_bounds = array<i64: 1, 2, 128>}]} {
    %c0 = arith.constant 0 : index
    %c0_0 = arith.constant 0 : index
    %c0_1 = arith.constant 0 : index
    %0 = vector.load %arg1[%c0, %c0_0, %c0_1] : memref<1x32x128xbf16, #tpu.memory_space<vmem>>, vector<1x32x128xbf16>
    %1 = vector.shape_cast %0 : vector<1x32x128xbf16> to vector<32x128xbf16>
    %c0_2 = arith.constant 0 : index
    %c0_3 = arith.constant 0 : index
    %2 = vector.load %arg2[%c0_2, %c0_3] : memref<128x128xbf16, #tpu.memory_space<vmem>>, vector<128x128xbf16>
    %cst = arith.constant dense<0.000000e+00> : vector<32x128xf32>
    %3 = tpu.matmul %1, %2, %cst {dimension_numbers = #tpu.dot_dimension_numbers<[1], [0], [0], [1], [0, 0, 1, 1], [], []>} : vector<32x128xbf16>, vector<128x128xbf16>, vector<32x128xf32> -> vector<32x128xf32>
    %c0_4 = arith.constant 0 : index
    %c0_5 = arith.constant 0 : index
    %4 = vector.load %arg3[%c0_4, %c0_5] : memref<1x128xf32, #tpu.memory_space<vmem>>, vector<1x128xf32>
    %5 = vector.broadcast %4 : vector<1x128xf32> to vector<32x128xf32>
    %6 = arith.addf %3, %5 : vector<32x128xf32>
    %c0_6 = arith.constant 0 : index
    %c0_7 = arith.constant 0 : index
    %7 = vector.load %arg4[%c0_6, %c0_7] : memref<1x128xf32, #tpu.memory_space<vmem>>, vector<1x128xf32>
    %c0_8 = arith.constant 0 : index
    %c0_9 = arith.constant 0 : index
    %8 = vector.load %arg5[%c0_8, %c0_9] : memref<1x128xf32, #tpu.memory_space<vmem>>, vector<1x128xf32>
    %cst_10 = arith.constant dense<0.000000e+00> : vector<32xf32>
    %9 = vector.multi_reduction <add>, %6, %cst_10 [1] : vector<32x128xf32> to vector<32xf32>
    %10 = vector.shape_cast %9 : vector<32xf32> to vector<32x1xf32>
    %cst_11 = arith.constant 3.125000e-02 : f32
    %11 = vector.broadcast %cst_11 : f32 to vector<32x1xf32>
    %12 = arith.mulf %10, %11 : vector<32x1xf32>
    %13 = arith.mulf %6, %6 : vector<32x128xf32>
    %cst_12 = arith.constant dense<0.000000e+00> : vector<32xf32>
    %14 = vector.multi_reduction <add>, %13, %cst_12 [1] : vector<32x128xf32> to vector<32xf32>
    %15 = vector.shape_cast %14 : vector<32xf32> to vector<32x1xf32>
    %cst_13 = arith.constant 3.125000e-02 : f32
    %16 = vector.broadcast %cst_13 : f32 to vector<32x1xf32>
    %17 = arith.mulf %15, %16 : vector<32x1xf32>
    %18 = arith.mulf %12, %12 : vector<32x1xf32>
    %19 = arith.subf %17, %18 : vector<32x1xf32>
    %20 = vector.broadcast %12 : vector<32x1xf32> to vector<32x128xf32>
    %21 = arith.subf %6, %20 : vector<32x128xf32>
    %cst_14 = arith.constant 9.99999997E-7 : f32
    %22 = vector.broadcast %cst_14 : f32 to vector<32x1xf32>
    %23 = arith.addf %19, %22 : vector<32x1xf32>
    %24 = math.rsqrt %23 : vector<32x1xf32>
    %25 = vector.broadcast %24 : vector<32x1xf32> to vector<32x128xf32>
    %26 = arith.mulf %21, %25 : vector<32x128xf32>
    %27 = vector.broadcast %7 : vector<1x128xf32> to vector<32x128xf32>
    %28 = arith.mulf %26, %27 : vector<32x128xf32>
    %29 = vector.broadcast %8 : vector<1x128xf32> to vector<32x128xf32>
    %30 = arith.addf %28, %29 : vector<32x128xf32>
    %cst_15 = arith.constant 0.000000e+00 : f32
    %31 = vector.broadcast %cst_15 : f32 to vector<3x16x128xf32>
    %c0_16 = arith.constant 0 : index
    %c0_17 = arith.constant 0 : index
    %c0_18 = arith.constant 0 : index
    %32 = vector.load %arg16[%c0_16, %c0_17, %c0_18] : memref<11x16x128xf32, #tpu.memory_space<vmem>>, vector<3x16x128xf32>
    tpu.vector_store %arg16[%c0_16, %c0_17, %c0_18], %31 {strides = array<i32>} : memref<11x16x128xf32, #tpu.memory_space<vmem>>, vector<3x16x128xf32>,
    %cst_19 = arith.constant 0.000000e+00 : f32
    %33 = vector.broadcast %cst_19 : f32 to vector<4x16x128xf32>
    %c7 = arith.constant 7 : index
    %c0_20 = arith.constant 0 : index
    %c0_21 = arith.constant 0 : index
    %34 = vector.load %arg16[%c7, %c0_20, %c0_21] : memref<11x16x128xf32, #tpu.memory_space<vmem>>, vector<4x16x128xf32>
    tpu.vector_store %arg16[%c7, %c0_20, %c0_21], %33 {strides = array<i32>} : memref<11x16x128xf32, #tpu.memory_space<vmem>>, vector<4x16x128xf32>,
    %cst_22 = arith.constant 0.000000e+00 : f32
    %35 = vector.broadcast %cst_22 : f32 to vector<4x8x128xf32>
    %c3 = arith.constant 3 : index
    %c0_23 = arith.constant 0 : index
    %c0_24 = arith.constant 0 : index
    %36 = vector.load %arg16[%c3, %c0_23, %c0_24] : memref<11x16x128xf32, #tpu.memory_space<vmem>>, vector<4x8x128xf32>
    tpu.vector_store %arg16[%c3, %c0_23, %c0_24], %35 {strides = array<i32>} : memref<11x16x128xf32, #tpu.memory_space<vmem>>, vector<4x8x128xf32>,
    %cst_25 = arith.constant 0.000000e+00 : f32
    %37 = vector.broadcast %cst_25 : f32 to vector<4x4x128xf32>
    %c3_26 = arith.constant 3 : index
    %c12 = arith.constant 12 : index
    %c0_27 = arith.constant 0 : index
    %38 = vector.load %arg16[%c3_26, %c12, %c0_27] : memref<11x16x128xf32, #tpu.memory_space<vmem>>, vector<4x4x128xf32>
    tpu.vector_store %arg16[%c3_26, %c12, %c0_27], %37 {strides = array<i32>} : memref<11x16x128xf32, #tpu.memory_space<vmem>>, vector<4x4x128xf32>,
    %c0_28 = arith.constant 0 : index
    %c0_29 = arith.constant 0 : index
    %39 = vector.load %arg6[%c0_28, %c0_29] : memref<49x128xf32, #tpu.memory_space<vmem>>, vector<49x128xf32>
    %40 = vector.extract_strided_slice %39 {offsets = [0, 0], sizes = [1, 128], strides = [1, 1]} : vector<49x128xf32> to vector<1x128xf32>
    %41 = vector.shape_cast %40 : vector<1x128xf32> to vector<128xf32>
    %42 = vector.extract_strided_slice %39 {offsets = [1, 0], sizes = [1, 128], strides = [1, 1]} : vector<49x128xf32> to vector<1x128xf32>
    %43 = vector.shape_cast %42 : vector<1x128xf32> to vector<128xf32>
    %44 = vector.extract_strided_slice %39 {offsets = [2, 0], sizes = [1, 128], strides = [1, 1]} : vector<49x128xf32> to vector<1x128xf32>
    %45 = vector.shape_cast %44 : vector<1x128xf32> to vector<128xf32>
    %46 = vector.extract_strided_slice %39 {offsets = [3, 0], sizes = [1, 128], strides = [1, 1]} : vector<49x128xf32> to vector<1x128xf32>
    %47 = vector.shape_cast %46 : vector<1x128xf32> to vector<128xf32>
    %48 = vector.extract_strided_slice %39 {offsets = [4, 0], sizes = [1, 128], strides = [1, 1]} : vector<49x128xf32> to vector<1x128xf32>
    %49 = vector.shape_cast %48 : vector<1x128xf32> to vector<128xf32>
    %50 = vector.extract_strided_slice %39 {offsets = [5, 0], sizes = [1, 128], strides = [1, 1]} : vector<49x128xf32> to vector<1x128xf32>
    %51 = vector.shape_cast %50 : vector<1x128xf32> to vector<128xf32>
    %52 = vector.extract_strided_slice %39 {offsets = [6, 0], sizes = [1, 128], strides = [1, 1]} : vector<49x128xf32> to vector<1x128xf32>
    %53 = vector.shape_cast %52 : vector<1x128xf32> to vector<128xf32>
    %54 = vector.extract_strided_slice %39 {offsets = [7, 0], sizes = [1, 128], strides = [1, 1]} : vector<49x128xf32> to vector<1x128xf32>
    %55 = vector.shape_cast %54 : vector<1x128xf32> to vector<128xf32>
    %56 = vector.extract_strided_slice %39 {offsets = [8, 0], sizes = [1, 128], strides = [1, 1]} : vector<49x128xf32> to vector<1x128xf32>
    %57 = vector.shape_cast %56 : vector<1x128xf32> to vector<128xf32>
    %58 = vector.extract_strided_slice %39 {offsets = [9, 0], sizes = [1, 128], strides = [1, 1]} : vector<49x128xf32> to vector<1x128xf32>
    %59 = vector.shape_cast %58 : vector<1x128xf32> to vector<128xf32>
    %60 = vector.extract_strided_slice %39 {offsets = [10, 0], sizes = [1, 128], strides = [1, 1]} : vector<49x128xf32> to vector<1x128xf32>
    %61 = vector.shape_cast %60 : vector<1x128xf32> to vector<128xf32>
    %62 = vector.extract_strided_slice %39 {offsets = [11, 0], sizes = [1, 128], strides = [1, 1]} : vector<49x128xf32> to vector<1x128xf32>
    %63 = vector.shape_cast %62 : vector<1x128xf32> to vector<128xf32>
    %64 = vector.extract_strided_slice %39 {offsets = [12, 0], sizes = [1, 128], strides = [1, 1]} : vector<49x128xf32> to vector<1x128xf32>
    %65 = vector.shape_cast %64 : vector<1x128xf32> to vector<128xf32>
    %66 = vector.extract_strided_slice %39 {offsets = [13, 0], sizes = [1, 128], strides = [1, 1]} : vector<49x128xf32> to vector<1x128xf32>
    %67 = vector.shape_cast %66 : vector<1x128xf32> to vector<128xf32>
    %68 = vector.extract_strided_slice %39 {offsets = [14, 0], sizes = [1, 128], strides = [1, 1]} : vector<49x128xf32> to vector<1x128xf32>
    %69 = vector.shape_cast %68 : vector<1x128xf32> to vector<128xf32>
    %70 = vector.extract_strided_slice %39 {offsets = [15, 0], sizes = [1, 128], strides = [1, 1]} : vector<49x128xf32> to vector<1x128xf32>
    %71 = vector.shape_cast %70 : vector<1x128xf32> to vector<128xf32>
    %72 = vector.extract_strided_slice %39 {offsets = [16, 0], sizes = [1, 128], strides = [1, 1]} : vector<49x128xf32> to vector<1x128xf32>
    %73 = vector.shape_cast %72 : vector<1x128xf32> to vector<128xf32>
    %74 = vector.extract_strided_slice %39 {offsets = [17, 0], sizes = [1, 128], strides = [1, 1]} : vector<49x128xf32> to vector<1x128xf32>
    %75 = vector.shape_cast %74 : vector<1x128xf32> to vector<128xf32>
    %76 = vector.extract_strided_slice %39 {offsets = [18, 0], sizes = [1, 128], strides = [1, 1]} : vector<49x128xf32> to vector<1x128xf32>
    %77 = vector.shape_cast %76 : vector<1x128xf32> to vector<128xf32>
    %78 = vector.extract_strided_slice %39 {offsets = [19, 0], sizes = [1, 128], strides = [1, 1]} : vector<49x128xf32> to vector<1x128xf32>
    %79 = vector.shape_cast %78 : vector<1x128xf32> to vector<128xf32>
    %80 = vector.extract_strided_slice %39 {offsets = [20, 0], sizes = [1, 128], strides = [1, 1]} : vector<49x128xf32> to vector<1x128xf32>
    %81 = vector.shape_cast %80 : vector<1x128xf32> to vector<128xf32>
    %82 = vector.extract_strided_slice %39 {offsets = [21, 0], sizes = [1, 128], strides = [1, 1]} : vector<49x128xf32> to vector<1x128xf32>
    %83 = vector.shape_cast %82 : vector<1x128xf32> to vector<128xf32>
    %84 = vector.extract_strided_slice %39 {offsets = [22, 0], sizes = [1, 128], strides = [1, 1]} : vector<49x128xf32> to vector<1x128xf32>
    %85 = vector.shape_cast %84 : vector<1x128xf32> to vector<128xf32>
    %86 = vector.extract_strided_slice %39 {offsets = [23, 0], sizes = [1, 128], strides = [1, 1]} : vector<49x128xf32> to vector<1x128xf32>
    %87 = vector.shape_cast %86 : vector<1x128xf32> to vector<128xf32>
    %88 = vector.extract_strided_slice %39 {offsets = [24, 0], sizes = [1, 128], strides = [1, 1]} : vector<49x128xf32> to vector<1x128xf32>
    %89 = vector.shape_cast %88 : vector<1x128xf32> to vector<128xf32>
    %90 = vector.extract_strided_slice %39 {offsets = [25, 0], sizes = [1, 128], strides = [1, 1]} : vector<49x128xf32> to vector<1x128xf32>
    %91 = vector.shape_cast %90 : vector<1x128xf32> to vector<128xf32>
    %92 = vector.extract_strided_slice %39 {offsets = [26, 0], sizes = [1, 128], strides = [1, 1]} : vector<49x128xf32> to vector<1x128xf32>
    %93 = vector.shape_cast %92 : vector<1x128xf32> to vector<128xf32>
    %94 = vector.extract_strided_slice %39 {offsets = [27, 0], sizes = [1, 128], strides = [1, 1]} : vector<49x128xf32> to vector<1x128xf32>
    %95 = vector.shape_cast %94 : vector<1x128xf32> to vector<128xf32>
    %96 = vector.extract_strided_slice %39 {offsets = [28, 0], sizes = [1, 128], strides = [1, 1]} : vector<49x128xf32> to vector<1x128xf32>
    %97 = vector.shape_cast %96 : vector<1x128xf32> to vector<128xf32>
    %98 = vector.extract_strided_slice %39 {offsets = [29, 0], sizes = [1, 128], strides = [1, 1]} : vector<49x128xf32> to vector<1x128xf32>
    %99 = vector.shape_cast %98 : vector<1x128xf32> to vector<128xf32>
    %100 = vector.extract_strided_slice %39 {offsets = [30, 0], sizes = [1, 128], strides = [1, 1]} : vector<49x128xf32> to vector<1x128xf32>
    %101 = vector.shape_cast %100 : vector<1x128xf32> to vector<128xf32>
    %102 = vector.extract_strided_slice %39 {offsets = [31, 0], sizes = [1, 128], strides = [1, 1]} : vector<49x128xf32> to vector<1x128xf32>
    %103 = vector.shape_cast %102 : vector<1x128xf32> to vector<128xf32>
    %104 = vector.extract_strided_slice %39 {offsets = [32, 0], sizes = [1, 128], strides = [1, 1]} : vector<49x128xf32> to vector<1x128xf32>
    %105 = vector.shape_cast %104 : vector<1x128xf32> to vector<128xf32>
    %106 = vector.extract_strided_slice %39 {offsets = [33, 0], sizes = [1, 128], strides = [1, 1]} : vector<49x128xf32> to vector<1x128xf32>
    %107 = vector.shape_cast %106 : vector<1x128xf32> to vector<128xf32>
    %108 = vector.extract_strided_slice %39 {offsets = [34, 0], sizes = [1, 128], strides = [1, 1]} : vector<49x128xf32> to vector<1x128xf32>
    %109 = vector.shape_cast %108 : vector<1x128xf32> to vector<128xf32>
    %110 = vector.extract_strided_slice %39 {offsets = [35, 0], sizes = [1, 128], strides = [1, 1]} : vector<49x128xf32> to vector<1x128xf32>
    %111 = vector.shape_cast %110 : vector<1x128xf32> to vector<128xf32>
    %112 = vector.extract_strided_slice %39 {offsets = [36, 0], sizes = [1, 128], strides = [1, 1]} : vector<49x128xf32> to vector<1x128xf32>
    %113 = vector.shape_cast %112 : vector<1x128xf32> to vector<128xf32>
    %114 = vector.extract_strided_slice %39 {offsets = [37, 0], sizes = [1, 128], strides = [1, 1]} : vector<49x128xf32> to vector<1x128xf32>
    %115 = vector.shape_cast %114 : vector<1x128xf32> to vector<128xf32>
    %116 = vector.extract_strided_slice %39 {offsets = [38, 0], sizes = [1, 128], strides = [1, 1]} : vector<49x128xf32> to vector<1x128xf32>
    %117 = vector.shape_cast %116 : vector<1x128xf32> to vector<128xf32>
    %118 = vector.extract_strided_slice %39 {offsets = [39, 0], sizes = [1, 128], strides = [1, 1]} : vector<49x128xf32> to vector<1x128xf32>
    %119 = vector.shape_cast %118 : vector<1x128xf32> to vector<128xf32>
    %120 = vector.extract_strided_slice %39 {offsets = [40, 0], sizes = [1, 128], strides = [1, 1]} : vector<49x128xf32> to vector<1x128xf32>
    %121 = vector.shape_cast %120 : vector<1x128xf32> to vector<128xf32>
    %122 = vector.extract_strided_slice %39 {offsets = [41, 0], sizes = [1, 128], strides = [1, 1]} : vector<49x128xf32> to vector<1x128xf32>
    %123 = vector.shape_cast %122 : vector<1x128xf32> to vector<128xf32>
    %124 = vector.extract_strided_slice %39 {offsets = [42, 0], sizes = [1, 128], strides = [1, 1]} : vector<49x128xf32> to vector<1x128xf32>
    %125 = vector.shape_cast %124 : vector<1x128xf32> to vector<128xf32>
    %126 = vector.extract_strided_slice %39 {offsets = [43, 0], sizes = [1, 128], strides = [1, 1]} : vector<49x128xf32> to vector<1x128xf32>
    %127 = vector.shape_cast %126 : vector<1x128xf32> to vector<128xf32>
    %128 = vector.extract_strided_slice %39 {offsets = [44, 0], sizes = [1, 128], strides = [1, 1]} : vector<49x128xf32> to vector<1x128xf32>
    %129 = vector.shape_cast %128 : vector<1x128xf32> to vector<128xf32>
    %130 = vector.extract_strided_slice %39 {offsets = [45, 0], sizes = [1, 128], strides = [1, 1]} : vector<49x128xf32> to vector<1x128xf32>
    %131 = vector.shape_cast %130 : vector<1x128xf32> to vector<128xf32>
    %132 = vector.extract_strided_slice %39 {offsets = [46, 0], sizes = [1, 128], strides = [1, 1]} : vector<49x128xf32> to vector<1x128xf32>
    %133 = vector.shape_cast %132 : vector<1x128xf32> to vector<128xf32>
    %134 = vector.extract_strided_slice %39 {offsets = [47, 0], sizes = [1, 128], strides = [1, 1]} : vector<49x128xf32> to vector<1x128xf32>
    %135 = vector.shape_cast %134 : vector<1x128xf32> to vector<128xf32>
    %136 = vector.extract_strided_slice %39 {offsets = [48, 0], sizes = [1, 128], strides = [1, 1]} : vector<49x128xf32> to vector<1x128xf32>
    %137 = vector.shape_cast %136 : vector<1x128xf32> to vector<128xf32>
    %c0_30 = arith.constant 0 : index
    %c0_31 = arith.constant 0 : index
    %138 = vector.load %arg7[%c0_30, %c0_31] : memref<1x128xf32, #tpu.memory_space<vmem>>, vector<1x128xf32>
    %139 = vector.shape_cast %138 : vector<1x128xf32> to vector<1x128xf32>
    %140 = vector.broadcast %139 : vector<1x128xf32> to vector<64x128xf32>
    %141 = vector.extract_strided_slice %30 {offsets = [0, 0], sizes = [16, 128], strides = [1, 1]} : vector<32x128xf32> to vector<16x128xf32>
    %142 = vector.shape_cast %141 : vector<16x128xf32> to vector<4x4x128xf32>
    %c3_32 = arith.constant 3 : index
    %c8 = arith.constant 8 : index
    %c0_33 = arith.constant 0 : index
    %143 = vector.load %arg16[%c3_32, %c8, %c0_33] : memref<11x16x128xf32, #tpu.memory_space<vmem>>, vector<4x4x128xf32>
    tpu.vector_store %arg16[%c3_32, %c8, %c0_33], %142 {strides = array<i32>} : memref<11x16x128xf32, #tpu.memory_space<vmem>>, vector<4x4x128xf32>,
    %c0_34 = arith.constant 0 : index
    %c0_35 = arith.constant 0 : index
    %c0_36 = arith.constant 0 : index
    %144 = vector.load %arg16[%c0_34, %c0_35, %c0_36] : memref<11x16x128xf32, #tpu.memory_space<vmem>>, vector<11x16x128xf32>
    %145 = vector.shape_cast %144 : vector<11x16x128xf32> to vector<176x128xf32>
    %c171_i32 = arith.constant 171 : i32
    %146 = tpu.dynamic_rotate %145 by %c171_i32 dim 0 : vector<176x128xf32>, i32 -> vector<176x128xf32>
    %147 = vector.extract_strided_slice %146 {offsets = [0, 0], sizes = [160, 128], strides = [1, 1]} : vector<176x128xf32> to vector<160x128xf32>
    %148 = vector.extract_strided_slice %147 {offsets = [0, 0], sizes = [64, 128], strides = [1, 1]} : vector<160x128xf32> to vector<64x128xf32>
    %149 = vector.shape_cast %41 : vector<128xf32> to vector<1x128xf32>
    %150 = vector.broadcast %149 : vector<1x128xf32> to vector<64x128xf32>
    %151 = arith.mulf %148, %150 : vector<64x128xf32>
    %152 = arith.addf %140, %151 : vector<64x128xf32>
    %153 = vector.extract_strided_slice %147 {offsets = [16, 0], sizes = [64, 128], strides = [1, 1]} : vector<160x128xf32> to vector<64x128xf32>
    %154 = vector.shape_cast %55 : vector<128xf32> to vector<1x128xf32>
    %155 = vector.broadcast %154 : vector<1x128xf32> to vector<64x128xf32>
    %156 = arith.mulf %153, %155 : vector<64x128xf32>
    %157 = arith.addf %152, %156 : vector<64x128xf32>
    %158 = vector.extract_strided_slice %147 {offsets = [32, 0], sizes = [64, 128], strides = [1, 1]} : vector<160x128xf32> to vector<64x128xf32>
    %159 = vector.shape_cast %69 : vector<128xf32> to vector<1x128xf32>
    %160 = vector.broadcast %159 : vector<1x128xf32> to vector<64x128xf32>
    %161 = arith.mulf %158, %160 : vector<64x128xf32>
    %162 = arith.addf %157, %161 : vector<64x128xf32>
    %163 = vector.extract_strided_slice %147 {offsets = [48, 0], sizes = [64, 128], strides = [1, 1]} : vector<160x128xf32> to vector<64x128xf32>
    %164 = vector.shape_cast %83 : vector<128xf32> to vector<1x128xf32>
    %165 = vector.broadcast %164 : vector<1x128xf32> to vector<64x128xf32>
    %166 = arith.mulf %163, %165 : vector<64x128xf32>
    %167 = arith.addf %162, %166 : vector<64x128xf32>
    %168 = vector.extract_strided_slice %147 {offsets = [64, 0], sizes = [64, 128], strides = [1, 1]} : vector<160x128xf32> to vector<64x128xf32>
    %169 = vector.shape_cast %97 : vector<128xf32> to vector<1x128xf32>
    %170 = vector.broadcast %169 : vector<1x128xf32> to vector<64x128xf32>
    %171 = arith.mulf %168, %170 : vector<64x128xf32>
    %172 = arith.addf %167, %171 : vector<64x128xf32>
    %173 = vector.extract_strided_slice %147 {offsets = [80, 0], sizes = [64, 128], strides = [1, 1]} : vector<160x128xf32> to vector<64x128xf32>
    %174 = vector.shape_cast %111 : vector<128xf32> to vector<1x128xf32>
    %175 = vector.broadcast %174 : vector<1x128xf32> to vector<64x128xf32>
    %176 = arith.mulf %173, %175 : vector<64x128xf32>
    %177 = arith.addf %172, %176 : vector<64x128xf32>
    %178 = vector.extract_strided_slice %147 {offsets = [96, 0], sizes = [64, 128], strides = [1, 1]} : vector<160x128xf32> to vector<64x128xf32>
    %179 = vector.shape_cast %125 : vector<128xf32> to vector<1x128xf32>
    %180 = vector.broadcast %179 : vector<1x128xf32> to vector<64x128xf32>
    %181 = arith.mulf %178, %180 : vector<64x128xf32>
    %182 = arith.addf %177, %181 : vector<64x128xf32>
    %c170_i32 = arith.constant 170 : i32
    %183 = tpu.dynamic_rotate %145 by %c170_i32 dim 0 : vector<176x128xf32>, i32 -> vector<176x128xf32>
    %184 = vector.extract_strided_slice %183 {offsets = [0, 0], sizes = [160, 128], strides = [1, 1]} : vector<176x128xf32> to vector<160x128xf32>
    %185 = vector.extract_strided_slice %184 {offsets = [0, 0], sizes = [64, 128], strides = [1, 1]} : vector<160x128xf32> to vector<64x128xf32>
    %186 = vector.shape_cast %43 : vector<128xf32> to vector<1x128xf32>
    %187 = vector.broadcast %186 : vector<1x128xf32> to vector<64x128xf32>
    %188 = arith.mulf %185, %187 : vector<64x128xf32>
    %189 = arith.addf %182, %188 : vector<64x128xf32>
    %190 = vector.extract_strided_slice %184 {offsets = [16, 0], sizes = [64, 128], strides = [1, 1]} : vector<160x128xf32> to vector<64x128xf32>
    %191 = vector.shape_cast %57 : vector<128xf32> to vector<1x128xf32>
    %192 = vector.broadcast %191 : vector<1x128xf32> to vector<64x128xf32>
    %193 = arith.mulf %190, %192 : vector<64x128xf32>
    %194 = arith.addf %189, %193 : vector<64x128xf32>
    %195 = vector.extract_strided_slice %184 {offsets = [32, 0], sizes = [64, 128], strides = [1, 1]} : vector<160x128xf32> to vector<64x128xf32>
    %196 = vector.shape_cast %71 : vector<128xf32> to vector<1x128xf32>
    %197 = vector.broadcast %196 : vector<1x128xf32> to vector<64x128xf32>
    %198 = arith.mulf %195, %197 : vector<64x128xf32>
    %199 = arith.addf %194, %198 : vector<64x128xf32>
    %200 = vector.extract_strided_slice %184 {offsets = [48, 0], sizes = [64, 128], strides = [1, 1]} : vector<160x128xf32> to vector<64x128xf32>
    %201 = vector.shape_cast %85 : vector<128xf32> to vector<1x128xf32>
    %202 = vector.broadcast %201 : vector<1x128xf32> to vector<64x128xf32>
    %203 = arith.mulf %200, %202 : vector<64x128xf32>
    %204 = arith.addf %199, %203 : vector<64x128xf32>
    %205 = vector.extract_strided_slice %184 {offsets = [64, 0], sizes = [64, 128], strides = [1, 1]} : vector<160x128xf32> to vector<64x128xf32>
    %206 = vector.shape_cast %99 : vector<128xf32> to vector<1x128xf32>
    %207 = vector.broadcast %206 : vector<1x128xf32> to vector<64x128xf32>
    %208 = arith.mulf %205, %207 : vector<64x128xf32>
    %209 = arith.addf %204, %208 : vector<64x128xf32>
    %210 = vector.extract_strided_slice %184 {offsets = [80, 0], sizes = [64, 128], strides = [1, 1]} : vector<160x128xf32> to vector<64x128xf32>
    %211 = vector.shape_cast %113 : vector<128xf32> to vector<1x128xf32>
    %212 = vector.broadcast %211 : vector<1x128xf32> to vector<64x128xf32>
    %213 = arith.mulf %210, %212 : vector<64x128xf32>
    %214 = arith.addf %209, %213 : vector<64x128xf32>
    %215 = vector.extract_strided_slice %184 {offsets = [96, 0], sizes = [64, 128], strides = [1, 1]} : vector<160x128xf32> to vector<64x128xf32>
    %216 = vector.shape_cast %127 : vector<128xf32> to vector<1x128xf32>
    %217 = vector.broadcast %216 : vector<1x128xf32> to vector<64x128xf32>
    %218 = arith.mulf %215, %217 : vector<64x128xf32>
    %219 = arith.addf %214, %218 : vector<64x128xf32>
    %c169_i32 = arith.constant 169 : i32
    %220 = tpu.dynamic_rotate %145 by %c169_i32 dim 0 : vector<176x128xf32>, i32 -> vector<176x128xf32>
    %221 = vector.extract_strided_slice %220 {offsets = [0, 0], sizes = [160, 128], strides = [1, 1]} : vector<176x128xf32> to vector<160x128xf32>
    %222 = vector.extract_strided_slice %221 {offsets = [0, 0], sizes = [64, 128], strides = [1, 1]} : vector<160x128xf32> to vector<64x128xf32>
    %223 = vector.shape_cast %45 : vector<128xf32> to vector<1x128xf32>
    %224 = vector.broadcast %223 : vector<1x128xf32> to vector<64x128xf32>
    %225 = arith.mulf %222, %224 : vector<64x128xf32>
    %226 = arith.addf %219, %225 : vector<64x128xf32>
    %227 = vector.extract_strided_slice %221 {offsets = [16, 0], sizes = [64, 128], strides = [1, 1]} : vector<160x128xf32> to vector<64x128xf32>
    %228 = vector.shape_cast %59 : vector<128xf32> to vector<1x128xf32>
    %229 = vector.broadcast %228 : vector<1x128xf32> to vector<64x128xf32>
    %230 = arith.mulf %227, %229 : vector<64x128xf32>
    %231 = arith.addf %226, %230 : vector<64x128xf32>
    %232 = vector.extract_strided_slice %221 {offsets = [32, 0], sizes = [64, 128], strides = [1, 1]} : vector<160x128xf32> to vector<64x128xf32>
    %233 = vector.shape_cast %73 : vector<128xf32> to vector<1x128xf32>
    %234 = vector.broadcast %233 : vector<1x128xf32> to vector<64x128xf32>
    %235 = arith.mulf %232, %234 : vector<64x128xf32>
    %236 = arith.addf %231, %235 : vector<64x128xf32>
    %237 = vector.extract_strided_slice %221 {offsets = [48, 0], sizes = [64, 128], strides = [1, 1]} : vector<160x128xf32> to vector<64x128xf32>
    %238 = vector.shape_cast %87 : vector<128xf32> to vector<1x128xf32>
    %239 = vector.broadcast %238 : vector<1x128xf32> to vector<64x128xf32>
    %240 = arith.mulf %237, %239 : vector<64x128xf32>
    %241 = arith.addf %236, %240 : vector<64x128xf32>
    %242 = vector.extract_strided_slice %221 {offsets = [64, 0], sizes = [64, 128], strides = [1, 1]} : vector<160x128xf32> to vector<64x128xf32>
    %243 = vector.shape_cast %101 : vector<128xf32> to vector<1x128xf32>
    %244 = vector.broadcast %243 : vector<1x128xf32> to vector<64x128xf32>
    %245 = arith.mulf %242, %244 : vector<64x128xf32>
    %246 = arith.addf %241, %245 : vector<64x128xf32>
    %247 = vector.extract_strided_slice %221 {offsets = [80, 0], sizes = [64, 128], strides = [1, 1]} : vector<160x128xf32> to vector<64x128xf32>
    %248 = vector.shape_cast %115 : vector<128xf32> to vector<1x128xf32>
    %249 = vector.broadcast %248 : vector<1x128xf32> to vector<64x128xf32>
    %250 = arith.mulf %247, %249 : vector<64x128xf32>
    %251 = arith.addf %246, %250 : vector<64x128xf32>
    %252 = vector.extract_strided_slice %221 {offsets = [96, 0], sizes = [64, 128], strides = [1, 1]} : vector<160x128xf32> to vector<64x128xf32>
    %253 = vector.shape_cast %129 : vector<128xf32> to vector<1x128xf32>
    %254 = vector.broadcast %253 : vector<1x128xf32> to vector<64x128xf32>
    %255 = arith.mulf %252, %254 : vector<64x128xf32>
    %256 = arith.addf %251, %255 : vector<64x128xf32>
    %c168_i32 = arith.constant 168 : i32
    %257 = tpu.dynamic_rotate %145 by %c168_i32 dim 0 : vector<176x128xf32>, i32 -> vector<176x128xf32>
    %258 = vector.extract_strided_slice %257 {offsets = [0, 0], sizes = [160, 128], strides = [1, 1]} : vector<176x128xf32> to vector<160x128xf32>
    %259 = vector.extract_strided_slice %258 {offsets = [0, 0], sizes = [64, 128], strides = [1, 1]} : vector<160x128xf32> to vector<64x128xf32>
    %260 = vector.shape_cast %47 : vector<128xf32> to vector<1x128xf32>
    %261 = vector.broadcast %260 : vector<1x128xf32> to vector<64x128xf32>
    %262 = arith.mulf %259, %261 : vector<64x128xf32>
    %263 = arith.addf %256, %262 : vector<64x128xf32>
    %264 = vector.extract_strided_slice %258 {offsets = [16, 0], sizes = [64, 128], strides = [1, 1]} : vector<160x128xf32> to vector<64x128xf32>
    %265 = vector.shape_cast %61 : vector<128xf32> to vector<1x128xf32>
    %266 = vector.broadcast %265 : vector<1x128xf32> to vector<64x128xf32>
    %267 = arith.mulf %264, %266 : vector<64x128xf32>
    %268 = arith.addf %263, %267 : vector<64x128xf32>
    %269 = vector.extract_strided_slice %258 {offsets = [32, 0], sizes = [64, 128], strides = [1, 1]} : vector<160x128xf32> to vector<64x128xf32>
    %270 = vector.shape_cast %75 : vector<128xf32> to vector<1x128xf32>
    %271 = vector.broadcast %270 : vector<1x128xf32> to vector<64x128xf32>
    %272 = arith.mulf %269, %271 : vector<64x128xf32>
    %273 = arith.addf %268, %272 : vector<64x128xf32>
    %274 = vector.extract_strided_slice %258 {offsets = [48, 0], sizes = [64, 128], strides = [1, 1]} : vector<160x128xf32> to vector<64x128xf32>
    %275 = vector.shape_cast %89 : vector<128xf32> to vector<1x128xf32>
    %276 = vector.broadcast %275 : vector<1x128xf32> to vector<64x128xf32>
    %277 = arith.mulf %274, %276 : vector<64x128xf32>
    %278 = arith.addf %273, %277 : vector<64x128xf32>
    %279 = vector.extract_strided_slice %258 {offsets = [64, 0], sizes = [64, 128], strides = [1, 1]} : vector<160x128xf32> to vector<64x128xf32>
    %280 = vector.shape_cast %103 : vector<128xf32> to vector<1x128xf32>
    %281 = vector.broadcast %280 : vector<1x128xf32> to vector<64x128xf32>
    %282 = arith.mulf %279, %281 : vector<64x128xf32>
    %283 = arith.addf %278, %282 : vector<64x128xf32>
    %284 = vector.extract_strided_slice %258 {offsets = [80, 0], sizes = [64, 128], strides = [1, 1]} : vector<160x128xf32> to vector<64x128xf32>
    %285 = vector.shape_cast %117 : vector<128xf32> to vector<1x128xf32>
    %286 = vector.broadcast %285 : vector<1x128xf32> to vector<64x128xf32>
    %287 = arith.mulf %284, %286 : vector<64x128xf32>
    %288 = arith.addf %283, %287 : vector<64x128xf32>
    %289 = vector.extract_strided_slice %258 {offsets = [96, 0], sizes = [64, 128], strides = [1, 1]} : vector<160x128xf32> to vector<64x128xf32>
    %290 = vector.shape_cast %131 : vector<128xf32> to vector<1x128xf32>
    %291 = vector.broadcast %290 : vector<1x128xf32> to vector<64x128xf32>
    %292 = arith.mulf %289, %291 : vector<64x128xf32>
    %293 = arith.addf %288, %292 : vector<64x128xf32>
    %c167_i32 = arith.constant 167 : i32
    %294 = tpu.dynamic_rotate %145 by %c167_i32 dim 0 : vector<176x128xf32>, i32 -> vector<176x128xf32>
    %295 = vector.extract_strided_slice %294 {offsets = [0, 0], sizes = [160, 128], strides = [1, 1]} : vector<176x128xf32> to vector<160x128xf32>
    %296 = vector.extract_strided_slice %295 {offsets = [0, 0], sizes = [64, 128], strides = [1, 1]} : vector<160x128xf32> to vector<64x128xf32>
    %297 = vector.shape_cast %49 : vector<128xf32> to vector<1x128xf32>
    %298 = vector.broadcast %297 : vector<1x128xf32> to vector<64x128xf32>
    %299 = arith.mulf %296, %298 : vector<64x128xf32>
    %300 = arith.addf %293, %299 : vector<64x128xf32>
    %301 = vector.extract_strided_slice %295 {offsets = [16, 0], sizes = [64, 128], strides = [1, 1]} : vector<160x128xf32> to vector<64x128xf32>
    %302 = vector.shape_cast %63 : vector<128xf32> to vector<1x128xf32>
    %303 = vector.broadcast %302 : vector<1x128xf32> to vector<64x128xf32>
    %304 = arith.mulf %301, %303 : vector<64x128xf32>
    %305 = arith.addf %300, %304 : vector<64x128xf32>
    %306 = vector.extract_strided_slice %295 {offsets = [32, 0], sizes = [64, 128], strides = [1, 1]} : vector<160x128xf32> to vector<64x128xf32>
    %307 = vector.shape_cast %77 : vector<128xf32> to vector<1x128xf32>
    %308 = vector.broadcast %307 : vector<1x128xf32> to vector<64x128xf32>
    %309 = arith.mulf %306, %308 : vector<64x128xf32>
    %310 = arith.addf %305, %309 : vector<64x128xf32>
    %311 = vector.extract_strided_slice %295 {offsets = [48, 0], sizes = [64, 128], strides = [1, 1]} : vector<160x128xf32> to vector<64x128xf32>
    %312 = vector.shape_cast %91 : vector<128xf32> to vector<1x128xf32>
    %313 = vector.broadcast %312 : vector<1x128xf32> to vector<64x128xf32>
    %314 = arith.mulf %311, %313 : vector<64x128xf32>
    %315 = arith.addf %310, %314 : vector<64x128xf32>
    %316 = vector.extract_strided_slice %295 {offsets = [64, 0], sizes = [64, 128], strides = [1, 1]} : vector<160x128xf32> to vector<64x128xf32>
    %317 = vector.shape_cast %105 : vector<128xf32> to vector<1x128xf32>
    %318 = vector.broadcast %317 : vector<1x128xf32> to vector<64x128xf32>
    %319 = arith.mulf %316, %318 : vector<64x128xf32>
    %320 = arith.addf %315, %319 : vector<64x128xf32>
    %321 = vector.extract_strided_slice %295 {offsets = [80, 0], sizes = [64, 128], strides = [1, 1]} : vector<160x128xf32> to vector<64x128xf32>
    %322 = vector.shape_cast %119 : vector<128xf32> to vector<1x128xf32>
    %323 = vector.broadcast %322 : vector<1x128xf32> to vector<64x128xf32>
    %324 = arith.mulf %321, %323 : vector<64x128xf32>
    %325 = arith.addf %320, %324 : vector<64x128xf32>
    %326 = vector.extract_strided_slice %295 {offsets = [96, 0], sizes = [64, 128], strides = [1, 1]} : vector<160x128xf32> to vector<64x128xf32>
    %327 = vector.shape_cast %133 : vector<128xf32> to vector<1x128xf32>
    %328 = vector.broadcast %327 : vector<1x128xf32> to vector<64x128xf32>
    %329 = arith.mulf %326, %328 : vector<64x128xf32>
    %330 = arith.addf %325, %329 : vector<64x128xf32>
    %c166_i32 = arith.constant 166 : i32
    %331 = tpu.dynamic_rotate %145 by %c166_i32 dim 0 : vector<176x128xf32>, i32 -> vector<176x128xf32>
    %332 = vector.extract_strided_slice %331 {offsets = [0, 0], sizes = [160, 128], strides = [1, 1]} : vector<176x128xf32> to vector<160x128xf32>
    %333 = vector.extract_strided_slice %332 {offsets = [0, 0], sizes = [64, 128], strides = [1, 1]} : vector<160x128xf32> to vector<64x128xf32>
    %334 = vector.shape_cast %51 : vector<128xf32> to vector<1x128xf32>
    %335 = vector.broadcast %334 : vector<1x128xf32> to vector<64x128xf32>
    %336 = arith.mulf %333, %335 : vector<64x128xf32>
    %337 = arith.addf %330, %336 : vector<64x128xf32>
    %338 = vector.extract_strided_slice %332 {offsets = [16, 0], sizes = [64, 128], strides = [1, 1]} : vector<160x128xf32> to vector<64x128xf32>
    %339 = vector.shape_cast %65 : vector<128xf32> to vector<1x128xf32>
    %340 = vector.broadcast %339 : vector<1x128xf32> to vector<64x128xf32>
    %341 = arith.mulf %338, %340 : vector<64x128xf32>
    %342 = arith.addf %337, %341 : vector<64x128xf32>
    %343 = vector.extract_strided_slice %332 {offsets = [32, 0], sizes = [64, 128], strides = [1, 1]} : vector<160x128xf32> to vector<64x128xf32>
    %344 = vector.shape_cast %79 : vector<128xf32> to vector<1x128xf32>
    %345 = vector.broadcast %344 : vector<1x128xf32> to vector<64x128xf32>
    %346 = arith.mulf %343, %345 : vector<64x128xf32>
    %347 = arith.addf %342, %346 : vector<64x128xf32>
    %348 = vector.extract_strided_slice %332 {offsets = [48, 0], sizes = [64, 128], strides = [1, 1]} : vector<160x128xf32> to vector<64x128xf32>
    %349 = vector.shape_cast %93 : vector<128xf32> to vector<1x128xf32>
    %350 = vector.broadcast %349 : vector<1x128xf32> to vector<64x128xf32>
    %351 = arith.mulf %348, %350 : vector<64x128xf32>
    %352 = arith.addf %347, %351 : vector<64x128xf32>
    %353 = vector.extract_strided_slice %332 {offsets = [64, 0], sizes = [64, 128], strides = [1, 1]} : vector<160x128xf32> to vector<64x128xf32>
    %354 = vector.shape_cast %107 : vector<128xf32> to vector<1x128xf32>
    %355 = vector.broadcast %354 : vector<1x128xf32> to vector<64x128xf32>
    %356 = arith.mulf %353, %355 : vector<64x128xf32>
    %357 = arith.addf %352, %356 : vector<64x128xf32>
    %358 = vector.extract_strided_slice %332 {offsets = [80, 0], sizes = [64, 128], strides = [1, 1]} : vector<160x128xf32> to vector<64x128xf32>
    %359 = vector.shape_cast %121 : vector<128xf32> to vector<1x128xf32>
    %360 = vector.broadcast %359 : vector<1x128xf32> to vector<64x128xf32>
    %361 = arith.mulf %358, %360 : vector<64x128xf32>
    %362 = arith.addf %357, %361 : vector<64x128xf32>
    %363 = vector.extract_strided_slice %332 {offsets = [96, 0], sizes = [64, 128], strides = [1, 1]} : vector<160x128xf32> to vector<64x128xf32>
    %364 = vector.shape_cast %135 : vector<128xf32> to vector<1x128xf32>
    %365 = vector.broadcast %364 : vector<1x128xf32> to vector<64x128xf32>
    %366 = arith.mulf %363, %365 : vector<64x128xf32>
    %367 = arith.addf %362, %366 : vector<64x128xf32>
    %c165_i32 = arith.constant 165 : i32
    %368 = tpu.dynamic_rotate %145 by %c165_i32 dim 0 : vector<176x128xf32>, i32 -> vector<176x128xf32>
    %369 = vector.extract_strided_slice %368 {offsets = [0, 0], sizes = [160, 128], strides = [1, 1]} : vector<176x128xf32> to vector<160x128xf32>
    %370 = vector.extract_strided_slice %369 {offsets = [0, 0], sizes = [64, 128], strides = [1, 1]} : vector<160x128xf32> to vector<64x128xf32>
    %371 = vector.shape_cast %53 : vector<128xf32> to vector<1x128xf32>
    %372 = vector.broadcast %371 : vector<1x128xf32> to vector<64x128xf32>
    %373 = arith.mulf %370, %372 : vector<64x128xf32>
    %374 = arith.addf %367, %373 : vector<64x128xf32>
    %375 = vector.extract_strided_slice %369 {offsets = [16, 0], sizes = [64, 128], strides = [1, 1]} : vector<160x128xf32> to vector<64x128xf32>
    %376 = vector.shape_cast %67 : vector<128xf32> to vector<1x128xf32>
    %377 = vector.broadcast %376 : vector<1x128xf32> to vector<64x128xf32>
    %378 = arith.mulf %375, %377 : vector<64x128xf32>
    %379 = arith.addf %374, %378 : vector<64x128xf32>
    %380 = vector.extract_strided_slice %369 {offsets = [32, 0], sizes = [64, 128], strides = [1, 1]} : vector<160x128xf32> to vector<64x128xf32>
    %381 = vector.shape_cast %81 : vector<128xf32> to vector<1x128xf32>
    %382 = vector.broadcast %381 : vector<1x128xf32> to vector<64x128xf32>
    %383 = arith.mulf %380, %382 : vector<64x128xf32>
    %384 = arith.addf %379, %383 : vector<64x128xf32>
    %385 = vector.extract_strided_slice %369 {offsets = [48, 0], sizes = [64, 128], strides = [1, 1]} : vector<160x128xf32> to vector<64x128xf32>
    %386 = vector.shape_cast %95 : vector<128xf32> to vector<1x128xf32>
    %387 = vector.broadcast %386 : vector<1x128xf32> to vector<64x128xf32>
    %388 = arith.mulf %385, %387 : vector<64x128xf32>
    %389 = arith.addf %384, %388 : vector<64x128xf32>
    %390 = vector.extract_strided_slice %369 {offsets = [64, 0], sizes = [64, 128], strides = [1, 1]} : vector<160x128xf32> to vector<64x128xf32>
    %391 = vector.shape_cast %109 : vector<128xf32> to vector<1x128xf32>
    %392 = vector.broadcast %391 : vector<1x128xf32> to vector<64x128xf32>
    %393 = arith.mulf %390, %392 : vector<64x128xf32>
    %394 = arith.addf %389, %393 : vector<64x128xf32>
    %395 = vector.extract_strided_slice %369 {offsets = [80, 0], sizes = [64, 128], strides = [1, 1]} : vector<160x128xf32> to vector<64x128xf32>
    %396 = vector.shape_cast %123 : vector<128xf32> to vector<1x128xf32>
    %397 = vector.broadcast %396 : vector<1x128xf32> to vector<64x128xf32>
    %398 = arith.mulf %395, %397 : vector<64x128xf32>
    %399 = arith.addf %394, %398 : vector<64x128xf32>
    %400 = vector.extract_strided_slice %369 {offsets = [96, 0], sizes = [64, 128], strides = [1, 1]} : vector<160x128xf32> to vector<64x128xf32>
    %401 = vector.shape_cast %137 : vector<128xf32> to vector<1x128xf32>
    %402 = vector.broadcast %401 : vector<1x128xf32> to vector<64x128xf32>
    %403 = arith.mulf %400, %402 : vector<64x128xf32>
    %404 = arith.addf %399, %403 : vector<64x128xf32>
    %405 = vector.shape_cast %404 : vector<64x128xf32> to vector<4x16x128xf32>
    %406 = vector.extract_strided_slice %405 {offsets = [0, 0, 0], sizes = [4, 4, 128], strides = [1, 1, 1]} : vector<4x16x128xf32> to vector<4x4x128xf32>
    %407 = vector.shape_cast %406 : vector<4x4x128xf32> to vector<16x128xf32>
    %408 = vector.extract_strided_slice %30 {offsets = [16, 0], sizes = [16, 128], strides = [1, 1]} : vector<32x128xf32> to vector<16x128xf32>
    %409 = vector.shape_cast %408 : vector<16x128xf32> to vector<4x4x128xf32>
    %c3_37 = arith.constant 3 : index
    %c8_38 = arith.constant 8 : index
    %c0_39 = arith.constant 0 : index
    %410 = vector.load %arg16[%c3_37, %c8_38, %c0_39] : memref<11x16x128xf32, #tpu.memory_space<vmem>>, vector<4x4x128xf32>
    tpu.vector_store %arg16[%c3_37, %c8_38, %c0_39], %409 {strides = array<i32>} : memref<11x16x128xf32, #tpu.memory_space<vmem>>, vector<4x4x128xf32>,
    %c0_40 = arith.constant 0 : index
    %c0_41 = arith.constant 0 : index
    %c0_42 = arith.constant 0 : index
    %411 = vector.load %arg16[%c0_40, %c0_41, %c0_42] : memref<11x16x128xf32, #tpu.memory_space<vmem>>, vector<11x16x128xf32>
    %412 = vector.shape_cast %411 : vector<11x16x128xf32> to vector<176x128xf32>
    %c171_i32_43 = arith.constant 171 : i32
    %413 = tpu.dynamic_rotate %412 by %c171_i32_43 dim 0 : vector<176x128xf32>, i32 -> vector<176x128xf32>
    %414 = vector.extract_strided_slice %413 {offsets = [0, 0], sizes = [160, 128], strides = [1, 1]} : vector<176x128xf32> to vector<160x128xf32>
    %415 = vector.extract_strided_slice %414 {offsets = [0, 0], sizes = [64, 128], strides = [1, 1]} : vector<160x128xf32> to vector<64x128xf32>
    %416 = vector.shape_cast %41 : vector<128xf32> to vector<1x128xf32>
    %417 = vector.broadcast %416 : vector<1x128xf32> to vector<64x128xf32>
    %418 = arith.mulf %415, %417 : vector<64x128xf32>
    %419 = arith.addf %140, %418 : vector<64x128xf32>
    %420 = vector.extract_strided_slice %414 {offsets = [16, 0], sizes = [64, 128], strides = [1, 1]} : vector<160x128xf32> to vector<64x128xf32>
    %421 = vector.shape_cast %55 : vector<128xf32> to vector<1x128xf32>
    %422 = vector.broadcast %421 : vector<1x128xf32> to vector<64x128xf32>
    %423 = arith.mulf %420, %422 : vector<64x128xf32>
    %424 = arith.addf %419, %423 : vector<64x128xf32>
    %425 = vector.extract_strided_slice %414 {offsets = [32, 0], sizes = [64, 128], strides = [1, 1]} : vector<160x128xf32> to vector<64x128xf32>
    %426 = vector.shape_cast %69 : vector<128xf32> to vector<1x128xf32>
    %427 = vector.broadcast %426 : vector<1x128xf32> to vector<64x128xf32>
    %428 = arith.mulf %425, %427 : vector<64x128xf32>
    %429 = arith.addf %424, %428 : vector<64x128xf32>
    %430 = vector.extract_strided_slice %414 {offsets = [48, 0], sizes = [64, 128], strides = [1, 1]} : vector<160x128xf32> to vector<64x128xf32>
    %431 = vector.shape_cast %83 : vector<128xf32> to vector<1x128xf32>
    %432 = vector.broadcast %431 : vector<1x128xf32> to vector<64x128xf32>
    %433 = arith.mulf %430, %432 : vector<64x128xf32>
    %434 = arith.addf %429, %433 : vector<64x128xf32>
    %435 = vector.extract_strided_slice %414 {offsets = [64, 0], sizes = [64, 128], strides = [1, 1]} : vector<160x128xf32> to vector<64x128xf32>
    %436 = vector.shape_cast %97 : vector<128xf32> to vector<1x128xf32>
    %437 = vector.broadcast %436 : vector<1x128xf32> to vector<64x128xf32>
    %438 = arith.mulf %435, %437 : vector<64x128xf32>
    %439 = arith.addf %434, %438 : vector<64x128xf32>
    %440 = vector.extract_strided_slice %414 {offsets = [80, 0], sizes = [64, 128], strides = [1, 1]} : vector<160x128xf32> to vector<64x128xf32>
    %441 = vector.shape_cast %111 : vector<128xf32> to vector<1x128xf32>
    %442 = vector.broadcast %441 : vector<1x128xf32> to vector<64x128xf32>
    %443 = arith.mulf %440, %442 : vector<64x128xf32>
    %444 = arith.addf %439, %443 : vector<64x128xf32>
    %445 = vector.extract_strided_slice %414 {offsets = [96, 0], sizes = [64, 128], strides = [1, 1]} : vector<160x128xf32> to vector<64x128xf32>
    %446 = vector.shape_cast %125 : vector<128xf32> to vector<1x128xf32>
    %447 = vector.broadcast %446 : vector<1x128xf32> to vector<64x128xf32>
    %448 = arith.mulf %445, %447 : vector<64x128xf32>
    %449 = arith.addf %444, %448 : vector<64x128xf32>
    %c170_i32_44 = arith.constant 170 : i32
    %450 = tpu.dynamic_rotate %412 by %c170_i32_44 dim 0 : vector<176x128xf32>, i32 -> vector<176x128xf32>
    %451 = vector.extract_strided_slice %450 {offsets = [0, 0], sizes = [160, 128], strides = [1, 1]} : vector<176x128xf32> to vector<160x128xf32>
    %452 = vector.extract_strided_slice %451 {offsets = [0, 0], sizes = [64, 128], strides = [1, 1]} : vector<160x128xf32> to vector<64x128xf32>
    %453 = vector.shape_cast %43 : vector<128xf32> to vector<1x128xf32>
    %454 = vector.broadcast %453 : vector<1x128xf32> to vector<64x128xf32>
    %455 = arith.mulf %452, %454 : vector<64x128xf32>
    %456 = arith.addf %449, %455 : vector<64x128xf32>
    %457 = vector.extract_strided_slice %451 {offsets = [16, 0], sizes = [64, 128], strides = [1, 1]} : vector<160x128xf32> to vector<64x128xf32>
    %458 = vector.shape_cast %57 : vector<128xf32> to vector<1x128xf32>
    %459 = vector.broadcast %458 : vector<1x128xf32> to vector<64x128xf32>
    %460 = arith.mulf %457, %459 : vector<64x128xf32>
    %461 = arith.addf %456, %460 : vector<64x128xf32>
    %462 = vector.extract_strided_slice %451 {offsets = [32, 0], sizes = [64, 128], strides = [1, 1]} : vector<160x128xf32> to vector<64x128xf32>
    %463 = vector.shape_cast %71 : vector<128xf32> to vector<1x128xf32>
    %464 = vector.broadcast %463 : vector<1x128xf32> to vector<64x128xf32>
    %465 = arith.mulf %462, %464 : vector<64x128xf32>
    %466 = arith.addf %461, %465 : vector<64x128xf32>
    %467 = vector.extract_strided_slice %451 {offsets = [48, 0], sizes = [64, 128], strides = [1, 1]} : vector<160x128xf32> to vector<64x128xf32>
    %468 = vector.shape_cast %85 : vector<128xf32> to vector<1x128xf32>
    %469 = vector.broadcast %468 : vector<1x128xf32> to vector<64x128xf32>
    %470 = arith.mulf %467, %469 : vector<64x128xf32>
    %471 = arith.addf %466, %470 : vector<64x128xf32>
    %472 = vector.extract_strided_slice %451 {offsets = [64, 0], sizes = [64, 128], strides = [1, 1]} : vector<160x128xf32> to vector<64x128xf32>
    %473 = vector.shape_cast %99 : vector<128xf32> to vector<1x128xf32>
    %474 = vector.broadcast %473 : vector<1x128xf32> to vector<64x128xf32>
    %475 = arith.mulf %472, %474 : vector<64x128xf32>
    %476 = arith.addf %471, %475 : vector<64x128xf32>
    %477 = vector.extract_strided_slice %451 {offsets = [80, 0], sizes = [64, 128], strides = [1, 1]} : vector<160x128xf32> to vector<64x128xf32>
    %478 = vector.shape_cast %113 : vector<128xf32> to vector<1x128xf32>
    %479 = vector.broadcast %478 : vector<1x128xf32> to vector<64x128xf32>
    %480 = arith.mulf %477, %479 : vector<64x128xf32>
    %481 = arith.addf %476, %480 : vector<64x128xf32>
    %482 = vector.extract_strided_slice %451 {offsets = [96, 0], sizes = [64, 128], strides = [1, 1]} : vector<160x128xf32> to vector<64x128xf32>
    %483 = vector.shape_cast %127 : vector<128xf32> to vector<1x128xf32>
    %484 = vector.broadcast %483 : vector<1x128xf32> to vector<64x128xf32>
    %485 = arith.mulf %482, %484 : vector<64x128xf32>
    %486 = arith.addf %481, %485 : vector<64x128xf32>
    %c169_i32_45 = arith.constant 169 : i32
    %487 = tpu.dynamic_rotate %412 by %c169_i32_45 dim 0 : vector<176x128xf32>, i32 -> vector<176x128xf32>
    %488 = vector.extract_strided_slice %487 {offsets = [0, 0], sizes = [160, 128], strides = [1, 1]} : vector<176x128xf32> to vector<160x128xf32>
    %489 = vector.extract_strided_slice %488 {offsets = [0, 0], sizes = [64, 128], strides = [1, 1]} : vector<160x128xf32> to vector<64x128xf32>
    %490 = vector.shape_cast %45 : vector<128xf32> to vector<1x128xf32>
    %491 = vector.broadcast %490 : vector<1x128xf32> to vector<64x128xf32>
    %492 = arith.mulf %489, %491 : vector<64x128xf32>
    %493 = arith.addf %486, %492 : vector<64x128xf32>
    %494 = vector.extract_strided_slice %488 {offsets = [16, 0], sizes = [64, 128], strides = [1, 1]} : vector<160x128xf32> to vector<64x128xf32>
    %495 = vector.shape_cast %59 : vector<128xf32> to vector<1x128xf32>
    %496 = vector.broadcast %495 : vector<1x128xf32> to vector<64x128xf32>
    %497 = arith.mulf %494, %496 : vector<64x128xf32>
    %498 = arith.addf %493, %497 : vector<64x128xf32>
    %499 = vector.extract_strided_slice %488 {offsets = [32, 0], sizes = [64, 128], strides = [1, 1]} : vector<160x128xf32> to vector<64x128xf32>
    %500 = vector.shape_cast %73 : vector<128xf32> to vector<1x128xf32>
    %501 = vector.broadcast %500 : vector<1x128xf32> to vector<64x128xf32>
    %502 = arith.mulf %499, %501 : vector<64x128xf32>
    %503 = arith.addf %498, %502 : vector<64x128xf32>
    %504 = vector.extract_strided_slice %488 {offsets = [48, 0], sizes = [64, 128], strides = [1, 1]} : vector<160x128xf32> to vector<64x128xf32>
    %505 = vector.shape_cast %87 : vector<128xf32> to vector<1x128xf32>
    %506 = vector.broadcast %505 : vector<1x128xf32> to vector<64x128xf32>
    %507 = arith.mulf %504, %506 : vector<64x128xf32>
    %508 = arith.addf %503, %507 : vector<64x128xf32>
    %509 = vector.extract_strided_slice %488 {offsets = [64, 0], sizes = [64, 128], strides = [1, 1]} : vector<160x128xf32> to vector<64x128xf32>
    %510 = vector.shape_cast %101 : vector<128xf32> to vector<1x128xf32>
    %511 = vector.broadcast %510 : vector<1x128xf32> to vector<64x128xf32>
    %512 = arith.mulf %509, %511 : vector<64x128xf32>
    %513 = arith.addf %508, %512 : vector<64x128xf32>
    %514 = vector.extract_strided_slice %488 {offsets = [80, 0], sizes = [64, 128], strides = [1, 1]} : vector<160x128xf32> to vector<64x128xf32>
    %515 = vector.shape_cast %115 : vector<128xf32> to vector<1x128xf32>
    %516 = vector.broadcast %515 : vector<1x128xf32> to vector<64x128xf32>
    %517 = arith.mulf %514, %516 : vector<64x128xf32>
    %518 = arith.addf %513, %517 : vector<64x128xf32>
    %519 = vector.extract_strided_slice %488 {offsets = [96, 0], sizes = [64, 128], strides = [1, 1]} : vector<160x128xf32> to vector<64x128xf32>
    %520 = vector.shape_cast %129 : vector<128xf32> to vector<1x128xf32>
    %521 = vector.broadcast %520 : vector<1x128xf32> to vector<64x128xf32>
    %522 = arith.mulf %519, %521 : vector<64x128xf32>
    %523 = arith.addf %518, %522 : vector<64x128xf32>
    %c168_i32_46 = arith.constant 168 : i32
    %524 = tpu.dynamic_rotate %412 by %c168_i32_46 dim 0 : vector<176x128xf32>, i32 -> vector<176x128xf32>
    %525 = vector.extract_strided_slice %524 {offsets = [0, 0], sizes = [160, 128], strides = [1, 1]} : vector<176x128xf32> to vector<160x128xf32>
    %526 = vector.extract_strided_slice %525 {offsets = [0, 0], sizes = [64, 128], strides = [1, 1]} : vector<160x128xf32> to vector<64x128xf32>
    %527 = vector.shape_cast %47 : vector<128xf32> to vector<1x128xf32>
    %528 = vector.broadcast %527 : vector<1x128xf32> to vector<64x128xf32>
    %529 = arith.mulf %526, %528 : vector<64x128xf32>
    %530 = arith.addf %523, %529 : vector<64x128xf32>
    %531 = vector.extract_strided_slice %525 {offsets = [16, 0], sizes = [64, 128], strides = [1, 1]} : vector<160x128xf32> to vector<64x128xf32>
    %532 = vector.shape_cast %61 : vector<128xf32> to vector<1x128xf32>
    %533 = vector.broadcast %532 : vector<1x128xf32> to vector<64x128xf32>
    %534 = arith.mulf %531, %533 : vector<64x128xf32>
    %535 = arith.addf %530, %534 : vector<64x128xf32>
    %536 = vector.extract_strided_slice %525 {offsets = [32, 0], sizes = [64, 128], strides = [1, 1]} : vector<160x128xf32> to vector<64x128xf32>
    %537 = vector.shape_cast %75 : vector<128xf32> to vector<1x128xf32>
    %538 = vector.broadcast %537 : vector<1x128xf32> to vector<64x128xf32>
    %539 = arith.mulf %536, %538 : vector<64x128xf32>
    %540 = arith.addf %535, %539 : vector<64x128xf32>
    %541 = vector.extract_strided_slice %525 {offsets = [48, 0], sizes = [64, 128], strides = [1, 1]} : vector<160x128xf32> to vector<64x128xf32>
    %542 = vector.shape_cast %89 : vector<128xf32> to vector<1x128xf32>
    %543 = vector.broadcast %542 : vector<1x128xf32> to vector<64x128xf32>
    %544 = arith.mulf %541, %543 : vector<64x128xf32>
    %545 = arith.addf %540, %544 : vector<64x128xf32>
    %546 = vector.extract_strided_slice %525 {offsets = [64, 0], sizes = [64, 128], strides = [1, 1]} : vector<160x128xf32> to vector<64x128xf32>
    %547 = vector.shape_cast %103 : vector<128xf32> to vector<1x128xf32>
    %548 = vector.broadcast %547 : vector<1x128xf32> to vector<64x128xf32>
    %549 = arith.mulf %546, %548 : vector<64x128xf32>
    %550 = arith.addf %545, %549 : vector<64x128xf32>
    %551 = vector.extract_strided_slice %525 {offsets = [80, 0], sizes = [64, 128], strides = [1, 1]} : vector<160x128xf32> to vector<64x128xf32>
    %552 = vector.shape_cast %117 : vector<128xf32> to vector<1x128xf32>
    %553 = vector.broadcast %552 : vector<1x128xf32> to vector<64x128xf32>
    %554 = arith.mulf %551, %553 : vector<64x128xf32>
    %555 = arith.addf %550, %554 : vector<64x128xf32>
    %556 = vector.extract_strided_slice %525 {offsets = [96, 0], sizes = [64, 128], strides = [1, 1]} : vector<160x128xf32> to vector<64x128xf32>
    %557 = vector.shape_cast %131 : vector<128xf32> to vector<1x128xf32>
    %558 = vector.broadcast %557 : vector<1x128xf32> to vector<64x128xf32>
    %559 = arith.mulf %556, %558 : vector<64x128xf32>
    %560 = arith.addf %555, %559 : vector<64x128xf32>
    %c167_i32_47 = arith.constant 167 : i32
    %561 = tpu.dynamic_rotate %412 by %c167_i32_47 dim 0 : vector<176x128xf32>, i32 -> vector<176x128xf32>
    %562 = vector.extract_strided_slice %561 {offsets = [0, 0], sizes = [160, 128], strides = [1, 1]} : vector<176x128xf32> to vector<160x128xf32>
    %563 = vector.extract_strided_slice %562 {offsets = [0, 0], sizes = [64, 128], strides = [1, 1]} : vector<160x128xf32> to vector<64x128xf32>
    %564 = vector.shape_cast %49 : vector<128xf32> to vector<1x128xf32>
    %565 = vector.broadcast %564 : vector<1x128xf32> to vector<64x128xf32>
    %566 = arith.mulf %563, %565 : vector<64x128xf32>
    %567 = arith.addf %560, %566 : vector<64x128xf32>
    %568 = vector.extract_strided_slice %562 {offsets = [16, 0], sizes = [64, 128], strides = [1, 1]} : vector<160x128xf32> to vector<64x128xf32>
    %569 = vector.shape_cast %63 : vector<128xf32> to vector<1x128xf32>
    %570 = vector.broadcast %569 : vector<1x128xf32> to vector<64x128xf32>
    %571 = arith.mulf %568, %570 : vector<64x128xf32>
    %572 = arith.addf %567, %571 : vector<64x128xf32>
    %573 = vector.extract_strided_slice %562 {offsets = [32, 0], sizes = [64, 128], strides = [1, 1]} : vector<160x128xf32> to vector<64x128xf32>
    %574 = vector.shape_cast %77 : vector<128xf32> to vector<1x128xf32>
    %575 = vector.broadcast %574 : vector<1x128xf32> to vector<64x128xf32>
    %576 = arith.mulf %573, %575 : vector<64x128xf32>
    %577 = arith.addf %572, %576 : vector<64x128xf32>
    %578 = vector.extract_strided_slice %562 {offsets = [48, 0], sizes = [64, 128], strides = [1, 1]} : vector<160x128xf32> to vector<64x128xf32>
    %579 = vector.shape_cast %91 : vector<128xf32> to vector<1x128xf32>
    %580 = vector.broadcast %579 : vector<1x128xf32> to vector<64x128xf32>
    %581 = arith.mulf %578, %580 : vector<64x128xf32>
    %582 = arith.addf %577, %581 : vector<64x128xf32>
    %583 = vector.extract_strided_slice %562 {offsets = [64, 0], sizes = [64, 128], strides = [1, 1]} : vector<160x128xf32> to vector<64x128xf32>
    %584 = vector.shape_cast %105 : vector<128xf32> to vector<1x128xf32>
    %585 = vector.broadcast %584 : vector<1x128xf32> to vector<64x128xf32>
    %586 = arith.mulf %583, %585 : vector<64x128xf32>
    %587 = arith.addf %582, %586 : vector<64x128xf32>
    %588 = vector.extract_strided_slice %562 {offsets = [80, 0], sizes = [64, 128], strides = [1, 1]} : vector<160x128xf32> to vector<64x128xf32>
    %589 = vector.shape_cast %119 : vector<128xf32> to vector<1x128xf32>
    %590 = vector.broadcast %589 : vector<1x128xf32> to vector<64x128xf32>
    %591 = arith.mulf %588, %590 : vector<64x128xf32>
    %592 = arith.addf %587, %591 : vector<64x128xf32>
    %593 = vector.extract_strided_slice %562 {offsets = [96, 0], sizes = [64, 128], strides = [1, 1]} : vector<160x128xf32> to vector<64x128xf32>
    %594 = vector.shape_cast %133 : vector<128xf32> to vector<1x128xf32>
    %595 = vector.broadcast %594 : vector<1x128xf32> to vector<64x128xf32>
    %596 = arith.mulf %593, %595 : vector<64x128xf32>
    %597 = arith.addf %592, %596 : vector<64x128xf32>
    %c166_i32_48 = arith.constant 166 : i32
    %598 = tpu.dynamic_rotate %412 by %c166_i32_48 dim 0 : vector<176x128xf32>, i32 -> vector<176x128xf32>
    %599 = vector.extract_strided_slice %598 {offsets = [0, 0], sizes = [160, 128], strides = [1, 1]} : vector<176x128xf32> to vector<160x128xf32>
    %600 = vector.extract_strided_slice %599 {offsets = [0, 0], sizes = [64, 128], strides = [1, 1]} : vector<160x128xf32> to vector<64x128xf32>
    %601 = vector.shape_cast %51 : vector<128xf32> to vector<1x128xf32>
    %602 = vector.broadcast %601 : vector<1x128xf32> to vector<64x128xf32>
    %603 = arith.mulf %600, %602 : vector<64x128xf32>
    %604 = arith.addf %597, %603 : vector<64x128xf32>
    %605 = vector.extract_strided_slice %599 {offsets = [16, 0], sizes = [64, 128], strides = [1, 1]} : vector<160x128xf32> to vector<64x128xf32>
    %606 = vector.shape_cast %65 : vector<128xf32> to vector<1x128xf32>
    %607 = vector.broadcast %606 : vector<1x128xf32> to vector<64x128xf32>
    %608 = arith.mulf %605, %607 : vector<64x128xf32>
    %609 = arith.addf %604, %608 : vector<64x128xf32>
    %610 = vector.extract_strided_slice %599 {offsets = [32, 0], sizes = [64, 128], strides = [1, 1]} : vector<160x128xf32> to vector<64x128xf32>
    %611 = vector.shape_cast %79 : vector<128xf32> to vector<1x128xf32>
    %612 = vector.broadcast %611 : vector<1x128xf32> to vector<64x128xf32>
    %613 = arith.mulf %610, %612 : vector<64x128xf32>
    %614 = arith.addf %609, %613 : vector<64x128xf32>
    %615 = vector.extract_strided_slice %599 {offsets = [48, 0], sizes = [64, 128], strides = [1, 1]} : vector<160x128xf32> to vector<64x128xf32>
    %616 = vector.shape_cast %93 : vector<128xf32> to vector<1x128xf32>
    %617 = vector.broadcast %616 : vector<1x128xf32> to vector<64x128xf32>
    %618 = arith.mulf %615, %617 : vector<64x128xf32>
    %619 = arith.addf %614, %618 : vector<64x128xf32>
    %620 = vector.extract_strided_slice %599 {offsets = [64, 0], sizes = [64, 128], strides = [1, 1]} : vector<160x128xf32> to vector<64x128xf32>
    %621 = vector.shape_cast %107 : vector<128xf32> to vector<1x128xf32>
    %622 = vector.broadcast %621 : vector<1x128xf32> to vector<64x128xf32>
    %623 = arith.mulf %620, %622 : vector<64x128xf32>
    %624 = arith.addf %619, %623 : vector<64x128xf32>
    %625 = vector.extract_strided_slice %599 {offsets = [80, 0], sizes = [64, 128], strides = [1, 1]} : vector<160x128xf32> to vector<64x128xf32>
    %626 = vector.shape_cast %121 : vector<128xf32> to vector<1x128xf32>
    %627 = vector.broadcast %626 : vector<1x128xf32> to vector<64x128xf32>
    %628 = arith.mulf %625, %627 : vector<64x128xf32>
    %629 = arith.addf %624, %628 : vector<64x128xf32>
    %630 = vector.extract_strided_slice %599 {offsets = [96, 0], sizes = [64, 128], strides = [1, 1]} : vector<160x128xf32> to vector<64x128xf32>
    %631 = vector.shape_cast %135 : vector<128xf32> to vector<1x128xf32>
    %632 = vector.broadcast %631 : vector<1x128xf32> to vector<64x128xf32>
    %633 = arith.mulf %630, %632 : vector<64x128xf32>
    %634 = arith.addf %629, %633 : vector<64x128xf32>
    %c165_i32_49 = arith.constant 165 : i32
    %635 = tpu.dynamic_rotate %412 by %c165_i32_49 dim 0 : vector<176x128xf32>, i32 -> vector<176x128xf32>
    %636 = vector.extract_strided_slice %635 {offsets = [0, 0], sizes = [160, 128], strides = [1, 1]} : vector<176x128xf32> to vector<160x128xf32>
    %637 = vector.extract_strided_slice %636 {offsets = [0, 0], sizes = [64, 128], strides = [1, 1]} : vector<160x128xf32> to vector<64x128xf32>
    %638 = vector.shape_cast %53 : vector<128xf32> to vector<1x128xf32>
    %639 = vector.broadcast %638 : vector<1x128xf32> to vector<64x128xf32>
    %640 = arith.mulf %637, %639 : vector<64x128xf32>
    %641 = arith.addf %634, %640 : vector<64x128xf32>
    %642 = vector.extract_strided_slice %636 {offsets = [16, 0], sizes = [64, 128], strides = [1, 1]} : vector<160x128xf32> to vector<64x128xf32>
    %643 = vector.shape_cast %67 : vector<128xf32> to vector<1x128xf32>
    %644 = vector.broadcast %643 : vector<1x128xf32> to vector<64x128xf32>
    %645 = arith.mulf %642, %644 : vector<64x128xf32>
    %646 = arith.addf %641, %645 : vector<64x128xf32>
    %647 = vector.extract_strided_slice %636 {offsets = [32, 0], sizes = [64, 128], strides = [1, 1]} : vector<160x128xf32> to vector<64x128xf32>
    %648 = vector.shape_cast %81 : vector<128xf32> to vector<1x128xf32>
    %649 = vector.broadcast %648 : vector<1x128xf32> to vector<64x128xf32>
    %650 = arith.mulf %647, %649 : vector<64x128xf32>
    %651 = arith.addf %646, %650 : vector<64x128xf32>
    %652 = vector.extract_strided_slice %636 {offsets = [48, 0], sizes = [64, 128], strides = [1, 1]} : vector<160x128xf32> to vector<64x128xf32>
    %653 = vector.shape_cast %95 : vector<128xf32> to vector<1x128xf32>
    %654 = vector.broadcast %653 : vector<1x128xf32> to vector<64x128xf32>
    %655 = arith.mulf %652, %654 : vector<64x128xf32>
    %656 = arith.addf %651, %655 : vector<64x128xf32>
    %657 = vector.extract_strided_slice %636 {offsets = [64, 0], sizes = [64, 128], strides = [1, 1]} : vector<160x128xf32> to vector<64x128xf32>
    %658 = vector.shape_cast %109 : vector<128xf32> to vector<1x128xf32>
    %659 = vector.broadcast %658 : vector<1x128xf32> to vector<64x128xf32>
    %660 = arith.mulf %657, %659 : vector<64x128xf32>
    %661 = arith.addf %656, %660 : vector<64x128xf32>
    %662 = vector.extract_strided_slice %636 {offsets = [80, 0], sizes = [64, 128], strides = [1, 1]} : vector<160x128xf32> to vector<64x128xf32>
    %663 = vector.shape_cast %123 : vector<128xf32> to vector<1x128xf32>
    %664 = vector.broadcast %663 : vector<1x128xf32> to vector<64x128xf32>
    %665 = arith.mulf %662, %664 : vector<64x128xf32>
    %666 = arith.addf %661, %665 : vector<64x128xf32>
    %667 = vector.extract_strided_slice %636 {offsets = [96, 0], sizes = [64, 128], strides = [1, 1]} : vector<160x128xf32> to vector<64x128xf32>
    %668 = vector.shape_cast %137 : vector<128xf32> to vector<1x128xf32>
    %669 = vector.broadcast %668 : vector<1x128xf32> to vector<64x128xf32>
    %670 = arith.mulf %667, %669 : vector<64x128xf32>
    %671 = arith.addf %666, %670 : vector<64x128xf32>
    %672 = vector.shape_cast %671 : vector<64x128xf32> to vector<4x16x128xf32>
    %673 = vector.extract_strided_slice %672 {offsets = [0, 0, 0], sizes = [4, 4, 128], strides = [1, 1, 1]} : vector<4x16x128xf32> to vector<4x4x128xf32>
    %674 = vector.shape_cast %673 : vector<4x4x128xf32> to vector<16x128xf32>
    %675 = tpu.concatenate %407, %674 in 0 : vector<16x128xf32>, vector<16x128xf32> -> vector<32x128xf32>
    %c0_50 = arith.constant 0 : index
    %c0_51 = arith.constant 0 : index
    %676 = vector.load %arg8[%c0_50, %c0_51] : memref<1x128xf32, #tpu.memory_space<vmem>>, vector<1x128xf32>
    %c0_52 = arith.constant 0 : index
    %c0_53 = arith.constant 0 : index
    %677 = vector.load %arg9[%c0_52, %c0_53] : memref<1x128xf32, #tpu.memory_space<vmem>>, vector<1x128xf32>
    %cst_54 = arith.constant dense<0.000000e+00> : vector<32xf32>
    %678 = vector.multi_reduction <add>, %675, %cst_54 [1] : vector<32x128xf32> to vector<32xf32>
    %679 = vector.shape_cast %678 : vector<32xf32> to vector<32x1xf32>
    %cst_55 = arith.constant 3.125000e-02 : f32
    %680 = vector.broadcast %cst_55 : f32 to vector<32x1xf32>
    %681 = arith.mulf %679, %680 : vector<32x1xf32>
    %682 = arith.mulf %675, %675 : vector<32x128xf32>
    %cst_56 = arith.constant dense<0.000000e+00> : vector<32xf32>
    %683 = vector.multi_reduction <add>, %682, %cst_56 [1] : vector<32x128xf32> to vector<32xf32>
    %684 = vector.shape_cast %683 : vector<32xf32> to vector<32x1xf32>
    %cst_57 = arith.constant 3.125000e-02 : f32
    %685 = vector.broadcast %cst_57 : f32 to vector<32x1xf32>
    %686 = arith.mulf %684, %685 : vector<32x1xf32>
    %687 = arith.mulf %681, %681 : vector<32x1xf32>
    %688 = arith.subf %686, %687 : vector<32x1xf32>
    %689 = vector.broadcast %681 : vector<32x1xf32> to vector<32x128xf32>
    %690 = arith.subf %675, %689 : vector<32x128xf32>
    %cst_58 = arith.constant 9.99999997E-7 : f32
    %691 = vector.broadcast %cst_58 : f32 to vector<32x1xf32>
    %692 = arith.addf %688, %691 : vector<32x1xf32>
    %693 = math.rsqrt %692 : vector<32x1xf32>
    %694 = vector.broadcast %693 : vector<32x1xf32> to vector<32x128xf32>
    %695 = arith.mulf %690, %694 : vector<32x128xf32>
    %696 = vector.broadcast %676 : vector<1x128xf32> to vector<32x128xf32>
    %697 = arith.mulf %695, %696 : vector<32x128xf32>
    %698 = vector.broadcast %677 : vector<1x128xf32> to vector<32x128xf32>
    %699 = arith.addf %697, %698 : vector<32x128xf32>
    %700 = arith.truncf %699 : vector<32x128xf32> to vector<32x128xbf16>
    %c0_59 = arith.constant 0 : index
    %c0_60 = arith.constant 0 : index
    %701 = vector.load %arg10[%c0_59, %c0_60] : memref<128x128xbf16, #tpu.memory_space<vmem>>, vector<128x128xbf16>
    %cst_61 = arith.constant dense<0.000000e+00> : vector<32x128xf32>
    %702 = tpu.matmul %700, %701, %cst_61 {dimension_numbers = #tpu.dot_dimension_numbers<[1], [0], [0], [1], [0, 0, 1, 1], [], []>} : vector<32x128xbf16>, vector<128x128xbf16>, vector<32x128xf32> -> vector<32x128xf32>
    %c0_62 = arith.constant 0 : index
    %c0_63 = arith.constant 0 : index
    %703 = vector.load %arg11[%c0_62, %c0_63] : memref<1x128xf32, #tpu.memory_space<vmem>>, vector<1x128xf32>
    %704 = vector.broadcast %703 : vector<1x128xf32> to vector<32x128xf32>
    %705 = arith.addf %702, %704 : vector<32x128xf32>
    %cst_64 = arith.constant 5.000000e-01 : f32
    %706 = vector.broadcast %cst_64 : f32 to vector<32x128xf32>
    %707 = arith.mulf %706, %705 : vector<32x128xf32>
    %cst_65 = arith.constant 0.707106769 : f32
    %708 = vector.broadcast %cst_65 : f32 to vector<32x128xf32>
    %709 = arith.mulf %705, %708 : vector<32x128xf32>
    %710 = math.erf %709 : vector<32x128xf32>
    %cst_66 = arith.constant 1.000000e+00 : f32
    %711 = vector.broadcast %cst_66 : f32 to vector<32x128xf32>
    %712 = arith.addf %711, %710 : vector<32x128xf32>
    %713 = arith.mulf %707, %712 : vector<32x128xf32>
    %714 = arith.truncf %713 : vector<32x128xf32> to vector<32x128xbf16>
    %c0_67 = arith.constant 0 : index
    %c0_68 = arith.constant 0 : index
    %715 = vector.load %arg12[%c0_67, %c0_68] : memref<128x128xbf16, #tpu.memory_space<vmem>>, vector<128x128xbf16>
    %cst_69 = arith.constant dense<0.000000e+00> : vector<32x128xf32>
    %716 = tpu.matmul %714, %715, %cst_69 {dimension_numbers = #tpu.dot_dimension_numbers<[1], [0], [0], [1], [0, 0, 1, 1], [], []>} : vector<32x128xbf16>, vector<128x128xbf16>, vector<32x128xf32> -> vector<32x128xf32>
    %c0_70 = arith.constant 0 : index
    %c0_71 = arith.constant 0 : index
    %717 = vector.load %arg13[%c0_70, %c0_71] : memref<1x128xf32, #tpu.memory_space<vmem>>, vector<1x128xf32>
    %718 = vector.broadcast %717 : vector<1x128xf32> to vector<32x128xf32>
    %719 = arith.addf %716, %718 : vector<32x128xf32>
    %c0_72 = arith.constant 0 : index
    %c0_73 = arith.constant 0 : index
    %720 = vector.load %arg14[%c0_72, %c0_73] : memref<1x128xf32, #tpu.memory_space<vmem>>, vector<1x128xf32>
    %721 = vector.broadcast %720 : vector<1x128xf32> to vector<32x128xf32>
    %722 = arith.mulf %721, %719 : vector<32x128xf32>
    %723 = arith.addf %30, %722 : vector<32x128xf32>
    %724 = vector.shape_cast %723 : vector<32x128xf32> to vector<2x16x128xf32>
    %cst_74 = arith.constant dense<0.000000e+00> : vector<2x128xf32>
    %725 = vector.multi_reduction <add>, %724, %cst_74 [1] : vector<2x16x128xf32> to vector<2x128xf32>
    %cst_75 = arith.constant 6.250000e-02 : f32
    %726 = vector.broadcast %cst_75 : f32 to vector<2x128xf32>
    %727 = arith.mulf %725, %726 : vector<2x128xf32>
    %728 = vector.shape_cast %727 : vector<2x128xf32> to vector<1x2x128xf32>
    %c0_76 = arith.constant 0 : index
    %c0_77 = arith.constant 0 : index
    %c0_78 = arith.constant 0 : index
    %729 = vector.load %arg15[%c0_76, %c0_77, %c0_78] : memref<1x2x128xf32, #tpu.memory_space<vmem>>, vector<1x2x128xf32>
    tpu.vector_store %arg15[%c0_76, %c0_77, %c0_78], %728 {strides = array<i32>} : memref<1x2x128xf32, #tpu.memory_space<vmem>>, vector<1x2x128xf32>,
    return
  }
  func.func @transform_0(%arg0: i32) -> (i32, i32, i32) {
    %c0_i32 = arith.constant 0 : i32
    %c0_i32_0 = arith.constant 0 : i32
    %c0_i32_1 = arith.constant 0 : i32
    return %arg0, %c0_i32, %c0_i32_0 : i32, i32, i32
  }
  func.func @transform_1(%arg0: i32) -> (i32, i32) {
    %c0_i32 = arith.constant 0 : i32
    %c0_i32_0 = arith.constant 0 : i32
    %c0_i32_1 = arith.constant 0 : i32
    return %c0_i32, %c0_i32_0 : i32, i32
  }
  func.func @transform_2(%arg0: i32) -> (i32, i32) {
    %c0_i32 = arith.constant 0 : i32
    %c0_i32_0 = arith.constant 0 : i32
    %c0_i32_1 = arith.constant 0 : i32
    return %c0_i32, %c0_i32_0 : i32, i32
  }
  func.func @transform_3(%arg0: i32) -> (i32, i32) {
    %c0_i32 = arith.constant 0 : i32
    %c0_i32_0 = arith.constant 0 : i32
    %c0_i32_1 = arith.constant 0 : i32
    return %c0_i32, %c0_i32_0 : i32, i32
  }
  func.func @transform_4(%arg0: i32) -> (i32, i32) {
    %c0_i32 = arith.constant 0 : i32
    %c0_i32_0 = arith.constant 0 : i32
    %c0_i32_1 = arith.constant 0 : i32
    return %c0_i32, %c0_i32_0 : i32, i32
  }
  func.func @transform_5(%arg0: i32) -> (i32, i32) {
    %c0_i32 = arith.constant 0 : i32
    %c0_i32_0 = arith.constant 0 : i32
    %c0_i32_1 = arith.constant 0 : i32
    return %c0_i32, %c0_i32_0 : i32, i32
  }
  func.func @transform_6(%arg0: i32) -> (i32, i32) {
    %c0_i32 = arith.constant 0 : i32
    %c0_i32_0 = arith.constant 0 : i32
    %c0_i32_1 = arith.constant 0 : i32
    return %c0_i32, %c0_i32_0 : i32, i32
  }
  func.func @transform_7(%arg0: i32) -> (i32, i32) {
    %c0_i32 = arith.constant 0 : i32
    %c0_i32_0 = arith.constant 0 : i32
    %c0_i32_1 = arith.constant 0 : i32
    return %c0_i32, %c0_i32_0 : i32, i32
  }
  func.func @transform_8(%arg0: i32) -> (i32, i32) {
    %c0_i32 = arith.constant 0 : i32
    %c0_i32_0 = arith.constant 0 : i32
    %c0_i32_1 = arith.constant 0 : i32
    return %c0_i32, %c0_i32_0 : i32, i32
  }
  func.func @transform_9(%arg0: i32) -> (i32, i32) {
    %c0_i32 = arith.constant 0 : i32
    %c0_i32_0 = arith.constant 0 : i32
    %c0_i32_1 = arith.constant 0 : i32
    return %c0_i32, %c0_i32_0 : i32, i32
  }
  func.func @transform_10(%arg0: i32) -> (i32, i32) {
    %c0_i32 = arith.constant 0 : i32
    %c0_i32_0 = arith.constant 0 : i32
    %c0_i32_1 = arith.constant 0 : i32
    return %c0_i32, %c0_i32_0 : i32, i32
  }
  func.func @transform_11(%arg0: i32) -> (i32, i32) {
    %c0_i32 = arith.constant 0 : i32
    %c0_i32_0 = arith.constant 0 : i32
    %c0_i32_1 = arith.constant 0 : i32
    return %c0_i32, %c0_i32_0 : i32, i32
  }
  func.func @transform_12(%arg0: i32) -> (i32, i32) {
    %c0_i32 = arith.constant 0 : i32
    %c0_i32_0 = arith.constant 0 : i32
    %c0_i32_1 = arith.constant 0 : i32
    return %c0_i32, %c0_i32_0 : i32, i32
  }
  func.func @transform_13(%arg0: i32) -> (i32, i32) {
    %c0_i32 = arith.constant 0 : i32
    %c0_i32_0 = arith.constant 0 : i32
    %c0_i32_1 = arith.constant 0 : i32
    return %c0_i32, %c0_i32_0 : i32, i32
  }
  func.func @transform_14(%arg0: i32) -> (i32, i32, i32) {
    %c0_i32 = arith.constant 0 : i32
    %c0_i32_0 = arith.constant 0 : i32
    %c0_i32_1 = arith.constant 0 : i32
    return %arg0, %c0_i32, %c0_i32_0 : i32, i32, i32
  }
}

</mosaic_0001>

<bundles_post_ra>
// kernel: tpu_custom_call.1
= control target key start
LH: loop header
LB: loop body
LE: loop exit
PB: predicated region body
PF: predicated region fallthrough
CT: control target
= control target key end

     0   :  { %19 = vsyncpa [#allocation4], 0  ;;  %s4330_s0 = inlined_call_operand.hbm [shape: bf16[1,32,128], index: 0, kind: input, shape index: {}]   ;;  %s4331_s1 = inlined_call_operand.hbm [shape: bf16[128,128], index: 1, kind: input, shape index: {}]   ;;  %s4332_s2 = inlined_call_operand.vmem [shape: f32[1,128], index: 2, kind: input, shape index: {}]   ;;  %s4333_s3 = inlined_call_operand.vmem [shape: f32[1,128], index: 3, kind: input, shape index: {}]   ;;  %s4334_s4 = inlined_call_operand.vmem [shape: f32[1,128], index: 4, kind: input, shape index: {}]   ;;  %s4335_s5 = inlined_call_operand.hbm [shape: f32[49,128], index: 5, kind: input, shape index: {}]   ;;  %s4336_s6 = inlined_call_operand.vmem [shape: f32[1,128], index: 6, kind: input, shape index: {}]   ;;  %s4337_s7 = inlined_call_operand.vmem [shape: f32[1,128], index: 7, kind: input, shape index: {}]   ;;  %s4338_s8 = inlined_call_operand.vmem [shape: f32[1,128], index: 8, kind: input, shape index: {}]   ;;  %s4339_s9 = inlined_call_operand.hbm [shape: bf16[128,128], index: 9, kind: input, shape index: {}]   ;;  %s4340_s10 = inlined_call_operand.vmem [shape: f32[1,128], index: 10, kind: input, shape index: {}]   ;;  %s4341_s11 = inlined_call_operand.hbm [shape: bf16[128,128], index: 11, kind: input, shape index: {}]   ;;  %s4342_s12 = inlined_call_operand.vmem [shape: f32[1,128], index: 12, kind: input, shape index: {}]   ;;  %s4343_s13 = inlined_call_operand.vmem [shape: f32[1,128], index: 13, kind: input, shape index: {}]   ;;  %s4344_s14 = inlined_call_operand.hbm [shape: f32[1,2,128], index: 14, kind: output, shape index: {}]  }
   0x1   :  { %20 = vsyncpa [#allocation7], 0 }
   0x2   :  { %21 = vsyncpa [#allocation10], 0 }
   0x3   :  { %22 = vsyncpa [#allocation5], 0  ;;  %s2513_s29 = smov [#allocation6]   ;;  %s2514_s15 = smov [#allocation9]  }
   0x4   :  { %s40_s30 = sshll.u32 %s2513_s29, 4  ;;  %s76_s16 = sshll.u32 %s2514_s15, 4  ;;  %s41_s30 = int_to_ptr.vmem [resolvable:$true] %s40_s30  ;;  %s2599_s16 = int_to_ptr.vmem [resolvable:$true] %s76_s16 }
   0x5   :  { %s2373_s19 = scalar_lea.hbm %s4331_s1, 1024 }
   0x6   :  { %p2374_p0 = scmp.ne.s32.totalorder %s4331_s1, %s2373_s19  ;;  %p2377_p1 = scmp.lt.u32.totalorder %s2373_s19, %s4331_s1 }
   0x8   :  { %p2379_p2 = pnand %p2377_p1, %p2374_p0 }
   0xa   :  { %2382 = shalt.err (!%p2379_p2)
}
   0xb   :  { %s2383_s24 = scalar_lea.vmem %s41_s30, 1024  ;;  %p2388_p4 = scmp.lt.s32.totalorder %s41_s30, %s41_s30 }
   0xc   :  { %p2384_p3 = scmp.ne.s32.totalorder %s41_s30, %s2383_s24  ;;  %p2389_p5 = scmp.lt.s32.totalorder %s2383_s24, %s2383_s24 }
   0xe   :  { %p2390_p6 = por %p2389_p5, %p2388_p4 }
  0x10   :  { %p2391_p7 = pnand %p2390_p6, %p2384_p3 }
  0x12   :  { %2394 = shalt.err (!%p2391_p7)
}
  0x13   :  { %s2515_s25 = smov 64   ;;  %s2516_s26 = smov 4  }
  0x14   :  { %46 = dma.hbm_to_vmem [thread:$0]  %s4331_s1, 1024, %s41_s30, [#allocation7], %s2515_s25, %s2515_s25, %s2516_s26  }
  0x15   :  { %s2395_s17 = scalar_lea.hbm %s4339_s9, 1024 }
  0x16   :  { %p2396_p8 = scmp.ne.s32.totalorder %s4339_s9, %s2395_s17  ;;  %p2399_p9 = scmp.lt.u32.totalorder %s2395_s17, %s4339_s9 }
  0x18   :  { %p2401_p10 = pnand %p2399_p9, %p2396_p8 }
  0x1a   :  { %2404 = shalt.err (!%p2401_p10)
}
  0x1b   :  { %s2405_s22 = scalar_lea.vmem %s2599_s16, 1024  ;;  %p2410_p12 = scmp.lt.s32.totalorder %s2599_s16, %s2599_s16 }
  0x1c   :  { %p2406_p11 = scmp.ne.s32.totalorder %s2599_s16, %s2405_s22  ;;  %p2411_p13 = scmp.lt.s32.totalorder %s2405_s22, %s2405_s22 }
  0x1e   :  { %p2412_p0 = por %p2411_p13, %p2410_p12 }
  0x20   :  { %p2413_p1 = pnand %p2412_p0, %p2406_p11 }
  0x22   :  { %2416 = shalt.err (!%p2413_p1)
}
  0x23   :  { %82 = dma.hbm_to_vmem [thread:$0]  %s4339_s9, 1024, %s2599_s16, [#allocation10], %s2515_s25, %s2515_s25, %s2516_s26  }
  0x24   :  { %s2517_s23 = smov [#allocation3]   ;;  %s2518_s27 = smov [#allocation8]  }
  0x25   :  { %s28_s24 = sshll.u32 %s2517_s23, 4  ;;  %s58_s28 = sshll.u32 %s2518_s27, 4  ;;  %s29_s24 = int_to_ptr.vmem [resolvable:$true] %s28_s24  ;;  %s2636_s28 = int_to_ptr.vmem [resolvable:$true] %s58_s28 }
  0x26   :  { %s2417_s17 = scalar_lea.hbm %s4330_s0, 256 }
  0x27   :  { %p2418_p2 = scmp.ne.s32.totalorder %s4330_s0, %s2417_s17  ;;  %p2421_p3 = scmp.lt.u32.totalorder %s2417_s17, %s4330_s0 }
  0x29   :  { %p2423_p4 = pnand %p2421_p3, %p2418_p2 }
  0x2b   :  { %2426 = shalt.err (!%p2423_p4)
}
  0x2c   :  { %s2427_s9 = scalar_lea.vmem %s29_s24, 256  ;;  %p2432_p6 = scmp.lt.s32.totalorder %s29_s24, %s29_s24 }
  0x2d   :  { %p2428_p5 = scmp.ne.s32.totalorder %s29_s24, %s2427_s9  ;;  %p2433_p7 = scmp.lt.s32.totalorder %s2427_s9, %s2427_s9 }
  0x2f   :  { %p2434_p8 = por %p2433_p7, %p2432_p6 }
  0x31   :  { %p2435_p9 = pnand %p2434_p8, %p2428_p5 }
  0x33   :  { %2438 = shalt.err (!%p2435_p9)
}
  0x34   :  { %34 = dma.hbm_to_vmem [thread:$0]  %s4330_s0, 256, %s29_s24, [#allocation4], %s2515_s25, %s2515_s25, %s2516_s26  }
  0x35   :  { %s2439_s23 = scalar_lea.hbm %s4335_s5, 896 }
  0x36   :  { %p2440_p10 = scmp.ne.s32.totalorder %s4335_s5, %s2439_s23  ;;  %p2443_p11 = scmp.lt.u32.totalorder %s2439_s23, %s4335_s5 }
  0x38   :  { %p2445_p12 = pnand %p2443_p11, %p2440_p10 }
  0x3a   :  { %2448 = shalt.err (!%p2445_p12)
}
  0x3b   :  { %s2449_s18 = scalar_lea.vmem %s2636_s28, 896  ;;  %p2454_p0 = scmp.lt.s32.totalorder %s2636_s28, %s2636_s28 }
  0x3c   :  { %p2450_p13 = scmp.ne.s32.totalorder %s2636_s28, %s2449_s18  ;;  %p2455_p1 = scmp.lt.s32.totalorder %s2449_s18, %s2449_s18 }
  0x3e   :  { %p2456_p2 = por %p2455_p1, %p2454_p0 }
  0x40   :  { %p2457_p3 = pnand %p2456_p2, %p2450_p13 }
  0x42   :  { %2460 = shalt.err (!%p2457_p3)
}
  0x43   :  { %s2519_s0 = smov 128   ;;  %s2520_s24 = smov 8  }
  0x44   :  { %64 = dma.hbm_to_vmem [thread:$0]  %s4335_s5, 896, %s2636_s28, [#allocation7], %s2519_s0, %s2519_s0, %s2520_s24  }
  0x45   :  { %s2521_s21 = smov [#allocation11]   ;;  %s2461_s1 = scalar_lea.hbm %s4341_s11, 1024 }
  0x46   :  { %s90_s9 = sshll.u32 %s2521_s21, 4  ;;  %p2462_p4 = scmp.ne.s32.totalorder %s4341_s11, %s2461_s1  ;;  %s91_s9 = int_to_ptr.vmem [resolvable:$true] %s90_s9 }
  0x47   :  { %p2465_p5 = scmp.lt.u32.totalorder %s2461_s1, %s4341_s11 }
  0x49   :  { %p2467_p6 = pnand %p2465_p5, %p2462_p4 }
  0x4b   :  { %2470 = shalt.err (!%p2467_p6)
}
  0x4c   :  { %s2471_s15 = scalar_lea.vmem %s91_s9, 1024  ;;  %p2476_p8 = scmp.lt.s32.totalorder %s91_s9, %s91_s9 }
  0x4d   :  { %p2472_p7 = scmp.ne.s32.totalorder %s91_s9, %s2471_s15  ;;  %p2477_p9 = scmp.lt.s32.totalorder %s2471_s15, %s2471_s15 }
  0x4f   :  { %p2478_p10 = por %p2477_p9, %p2476_p8 }
  0x51   :  { %p2479_p11 = pnand %p2478_p10, %p2472_p7 }
  0x53   :  { %2482 = shalt.err (!%p2479_p11)
}
  0x54   :  { %96 = dma.hbm_to_vmem [thread:$0]  %s4341_s11, 1024, %s91_s9, [#allocation10], %s2515_s25, %s2515_s25, %s2516_s26  }
  0x55   :  { %2505 = dma.done.wait [#allocation4], 256  }
  0x56   :  { %2506 = vsyncadd [#allocation4], 4294967040 }
  0x57   :  { %2507 = dma.done.wait [#allocation7], 1920  }
  0x58   :  { %2508 = vsyncadd [#allocation7], 4294965376 }
  0x59   :  { %2509 = dma.done.wait [#allocation10], 2048  }
  0x5a   :  { %2510 = vsyncadd [#allocation10], 4294965248  ;;  %v4345_v0 = vmov 0.0   ;;  %v2320_v1 = vld [vmem:[#allocation6] sm:$0xff]   ;;  %v2321_v2 = vld [vmem:[#allocation6 + $0x8] sm:$0xff]   ;;  %v416_v24 = vlaneseq  ;;  %vm2162_vm6 = vcmask 1041409  }
  0x5b   :  { %341 = vst [vmem:[#allocation2 + $0xa8] sm:$0xff] %v4345_v0  ;;  %347 = vst [vmem:[#allocation2 + $0x3c] sm:$0xf] %v4345_v0  ;;  %2249 = vmatprep.subr.bf16.mxu0 %v2320_v1  ;;  %v2322_v3 = vld [vmem:[#allocation6 + $0x10] sm:$0xff]   ;;  %v2323_v4 = vld [vmem:[#allocation6 + $0x18] sm:$0xff]   ;;  %v2804_v53 = vrot.slane %v4345_v0, 5 }
  0x5c   :  { %348 = vst [vmem:[#allocation2 + $0x4c] sm:$0xf] %v4345_v0  ;;  %349 = vst [vmem:[#allocation2 + $0x5c] sm:$0xf] %v4345_v0  ;;  %2250 = vmatpush3.bf16.msra.mxu0 %v2320_v1  ;;  %v2328_v5 = vld [vmem:[#allocation3] sm:$0xff]   ;;  %v2324_v6 = vld [vmem:[#allocation6 + $0x20] sm:$0xff]  }
  0x5d   :  { %350 = vst [vmem:[#allocation2 + $0x6c] sm:$0xf] %v4345_v0  ;;  %2251 = vmatprep.subr.bf16.mxu0 %v2321_v2  ;;  %2265 = vmatprep.mubr.bf16.mxu0 %v2328_v5  ;;  %v2325_v7 = vld [vmem:[#allocation6 + $0x28] sm:$0xff]   ;;  %v2326_v8 = vld [vmem:[#allocation6 + $0x30] sm:$0xff]   ;;  %v2327_v9 = vld [vmem:[#allocation6 + $0x38] sm:$0xff]   ;;  %v2713_v25 = vshrl.u32 %v416_v24, 7 }
  0x5e   :  { %v2329_v10 = vld [vmem:[#allocation3 + $0x8] sm:$0xff]   ;;  %v2183_v11 = vld [vmem:[%s4332_s2] ss:$0 sm:$0xff]  ;;  %v2723_v29 = vld [vmem:[#allocation8 + $0x28] sm:$0xff]  ;;  %4587 = vst [vmem:[#allocation30_spill] sm:$0xff] %v2804_v53 }
  0x5f   :  { %v2716_v26 = vsub.s32 5, %v2713_v25  ;;  %v2719_v27 = vsub.s32 4, %v2713_v25  ;;  %v2721_v28 = vld [vmem:[#allocation8] sm:$0xff]  ;;  %v2726_v30 = vsub.s32 3, %v2713_v25  ;;  %v2729_v31 = vsub.s32 2, %v2713_v25  ;;  %v2731_v32 = vld [vmem:[#allocation8 + $0x8] sm:$0xff] }
  0x60   :  { %2252 = vmatpush3.bf16.msra.mxu0 %v2321_v2  ;;  %v2733_v33 = vld [vmem:[#allocation8 + $0x10] sm:$0xff]  ;;  %v2735_v34 = vld [vmem:[#allocation8 + $0x18] sm:$0xff]  ;;  %v2738_v35 = vsub.s32 0, %v2713_v25  ;;  %v2741_v36 = vsub.s32 1, %v2713_v25  ;;  %v2743_v37 = vld [vmem:[#allocation8 + $0x20] sm:$0xff]  ;;  %v2762_v42 = vsub.s32 7, %v2713_v25 }
  0x61   :  { %2253 = vmatprep.subr.bf16.mxu0 %v2322_v3  ;;  %v2747_v38 = vrot.slane %v2721_v28, %v2716_v26  ;;  %v2751_v39 = vrot.slane %v2731_v32, %v2719_v27  ;;  %v2755_v40 = vrot.slane %v2733_v33, %v2726_v30  ;;  %v2759_v41 = vrot.slane %v2735_v34, %v2729_v31  ;;  %v2820_v57 = vld [vmem:[%s4336_s6] ss:$0 sm:$0xff] }
  0x62   :  { %v2766_v43 = vrot.slane %v2743_v37, %v2741_v36  ;;  %v2770_v44 = vrot.slane %v2723_v29, %v2738_v35  ;;  %v2773_v45 = vsub.s32 6, %v2713_v25  ;;  %v2777_v46 = vrot.slane %v2723_v29, %v2762_v42  ;;  %4590 = vst [vmem:[#allocation33_spill] sm:$0xff] %v2820_v57 }
  0x63   :  { %4574 = vst [vmem:[#allocation17_spill] sm:$0xff] %v2747_v38  ;;  %4575 = vst [vmem:[#allocation18_spill] sm:$0xff] %v2751_v39  ;;  %v2785_v48 = vrot.slane %v2731_v32, %v2716_v26  ;;  %v2789_v49 = vrot.slane %v2733_v33, %v2719_v27  ;;  %v2793_v50 = vrot.slane %v2735_v34, %v2726_v30  ;;  %vm418_vm0 = vcmp.lt.s32.totalorder %v2713_v25, 3 }
  0x64   :  { %2254 = vmatpush3.bf16.msra.mxu0 %v2322_v3  ;;  %4576 = vst [vmem:[#allocation19_spill] sm:$0xff] %v2755_v40  ;;  %4577 = vst [vmem:[#allocation20_spill] sm:$0xff] %v2759_v41  ;;  %v2781_v47 = vrot.slane %v2721_v28, %v2773_v45  ;;  %v2797_v51 = vrot.slane %v2743_v37, %v2729_v31  ;;  %v2801_v52 = vrot.slane %v2723_v29, %v2741_v36 }
  0x65   :  { %2255 = vmatprep.subr.bf16.mxu0 %v2323_v4  ;;  %4578 = vst [vmem:[#allocation21_spill] sm:$0xff] %v2766_v43  ;;  %4579 = vst [vmem:[#allocation22_spill] sm:$0xff] %v2770_v44  ;;  %v2809_v54 = vrot.slane %v2721_v28, %v2738_v35  ;;  %v2815_v56 = vrot.slane %v2721_v28, %v2762_v42  ;;  %v2829_v60 = vrot.slane %v2731_v32, %v2773_v45 }
  0x66   :  { %4580 = vst [vmem:[#allocation23_spill] sm:$0xff] %v2777_v46  ;;  %4581 = vst [vmem:[#allocation24_spill] sm:$0xff] %v2781_v47  ;;  %v2838_v63 = vrot.slane %v2733_v33, %v2716_v26  ;;  %v2842_v1 = vrot.slane %v2735_v34, %v2719_v27  ;;  %v2846_v2 = vrot.slane %v2743_v37, %v2726_v30  ;;  %v2849_v3 = vrot.slane %v4345_v0, 6 }
  0x67   :  { %4582 = vst [vmem:[#allocation25_spill] sm:$0xff] %v2785_v48  ;;  %4583 = vst [vmem:[#allocation26_spill] sm:$0xff] %v2789_v49  ;;  %v433_v55 = vmul.f32 %v2809_v54, %v2804_v53  ;;  %v445_v59 = vmul.f32 %v2815_v56, %v2804_v53  ;;  %v457_v62 = vmul.f32 %v2829_v60, %v2804_v53  ;;  %vm533_vm1 = vcmp.lt.s32.totalorder %v2713_v25, 2 }
  0x68   :  { %2256 = vmatpush3.bf16.msra.mxu0 %v2323_v4  ;;  %4584 = vst [vmem:[#allocation27_spill] sm:$0xff] %v2793_v50  ;;  %4585 = vst [vmem:[#allocation28_spill] sm:$0xff] %v2797_v51  ;;  %v2857_v5 = vmul.f32 %v2842_v1, %v2804_v53  ;;  %vm648_vm2 = vcmp.lt.s32.totalorder %v2713_v25, 1  ;;  %v2917_v24 = vrot.slane %v2731_v32, %v2741_v36  ;;  %vm847_vm3 = vcmp.lt.s32.totalorder %v2713_v25, 7 }
  0x69   :  { %2257 = vmatprep.subr.bf16.mxu0 %v2324_v6  ;;  %4586 = vst [vmem:[#allocation29_spill] sm:$0xff] %v2801_v52  ;;  %4588 = vst [vmem:[#allocation31_spill] sm:$0xff] %v2809_v54  ;;  %v2823_v58 = vadd.f32 %v2820_v57, %v433_v55  ;;  %v2937_v51 = vrot.slane %v2731_v32, %v2729_v31  ;;  %v2941_v50 = vrot.slane %v2733_v33, %v2741_v36 }
  0x6a   :  { %4589 = vst [vmem:[#allocation32_spill] sm:$0xff] %v2815_v56  ;;  %4592 = vst [vmem:[#allocation35_spill] sm:$0xff] %v2829_v60  ;;  %v2955_v41 = vrot.slane %v2735_v34, %v2773_v45  ;;  %v2959_v57 = vrot.slane %v2743_v37, %v2716_v26  ;;  %v2975_v54 = vrot.slane %v2723_v29, %v2719_v27  ;;  %vm962_vm4 = vcmp.lt.s32.totalorder %v2713_v25, 6 }
  0x6b   :  { %4591 = vst [vmem:[#allocation34_spill] sm:$0xff] %v2823_v58  ;;  %v2832_v61 = vadd.f32 %v445_v59, %v2823_v58  ;;  %4594 = vst [vmem:[#allocation37_spill] sm:$0xff] %v2838_v63  ;;  %v2925_v59 = vrot.slane %v2733_v33, %v2738_v35  ;;  %vm1077_vm5 = vcmp.lt.s32.totalorder %v2713_v25, 5 }
  0x6c   :  { %2258 = vmatpush3.bf16.msra.mxu0 %v2324_v6  ;;  %4595 = vst [vmem:[#allocation38_spill] sm:$0xff] %v2842_v1  ;;  %4596 = vst [vmem:[#allocation39_spill] sm:$0xff] %v2846_v2  ;;  %v2861_v6 = vmul.f32 %v2846_v2, %v2804_v53 }
  0x6d   :  { %2259 = vmatprep.subr.bf16.mxu0 %v2325_v7  ;;  %4593 = vst [vmem:[#allocation36_spill] sm:$0xff] %v2832_v61  ;;  %4597 = vst [vmem:[#allocation40_spill] sm:$0xff] %v2849_v3  ;;  %v2852_v4 = vadd.f32 %v457_v62, %v2832_v61  ;;  %v2929_v62 = vrot.slane %v2733_v33, %v2762_v42 }
  0x6e   :  { %4599 = vst [vmem:[#allocation42_spill] sm:$0xff] %v2857_v5  ;;  %4600 = vst [vmem:[#allocation43_spill] sm:$0xff] %v2861_v6  ;;  %v2949_v5 = vrot.slane %v2735_v34, %v2762_v42 }
  0x6f   :  { %4598 = vst [vmem:[#allocation41_spill] sm:$0xff] %v2852_v4  ;;  %4614 = vst [vmem:[#allocation57_spill] sm:$0xff] %v2917_v24 }
  0x70   :  { %2260 = vmatpush3.bf16.msra.mxu0 %v2325_v7  ;;  %v2865_v7 = vrot.slane %v2723_v29, %v2729_v31  ;;  %4616 = vst [vmem:[#allocation59_spill] sm:$0xff] %v2925_v59  ;;  %4617 = vst [vmem:[#allocation60_spill] sm:$0xff] %v2929_v62  ;;  %v2963_v62 = vrot.slane %v2743_v37, %v2773_v45 }
  0x71   :  { %2261 = vmatprep.subr.bf16.mxu0 %v2326_v8  ;;  %4619 = vst [vmem:[#allocation62_spill] sm:$0xff] %v2937_v51  ;;  %4620 = vst [vmem:[#allocation63_spill] sm:$0xff] %v2941_v50 }
  0x72   :  { %4601 = vst [vmem:[#allocation44_spill] sm:$0xff] %v2865_v7  ;;  %4622 = vst [vmem:[#allocation65_spill] sm:$0xff] %v2949_v5 }
  0x73   :  { %4623 = vst [vmem:[#allocation66_spill] sm:$0xff] %v2955_v41  ;;  %4624 = vst [vmem:[#allocation67_spill] sm:$0xff] %v2959_v57 }
  0x74   :  { %2262 = vmatpush3.bf16.msra.mxu0 %v2326_v8  ;;  %v2869_v8 = vrot.slane %v2721_v28, %v2741_v36  ;;  %4625 = vst [vmem:[#allocation68_spill] sm:$0xff] %v2963_v62  ;;  %4628 = vst [vmem:[#allocation71_spill] sm:$0xff] %v2975_v54 }
  0x75   :  { %2263 = vmatprep.subr.bf16.mxu0 %v2327_v9 }
  0x76   :  { %4602 = vst [vmem:[#allocation45_spill] sm:$0xff] %v2869_v8 }
  0x78   :  { %2264 = vmatpush3.bf16.msra.mxu0 %v2327_v9  ;;  %v2873_v9 = vrot.slane %v2731_v32, %v2738_v35 }
  0x7a   :  { %4603 = vst [vmem:[#allocation46_spill] sm:$0xff] %v2873_v9 }
  0x7b   :  { %2266 = vmatmul.mubr.bf16.vlgmr.msra.gmra.mrb[0].mxu0 %v2329_v10  ;;  %v2877_v10 = vmul.f32 %v2865_v7, %v2804_v53 }
  0x7d   :  { %4604 = vst [vmem:[#allocation47_spill] sm:$0xff] %v2877_v10 }
 0x14e   :  { %v2267_v12 = vpop.f32.mrb[0].mxu0 }
 0x14f   :  { %v238_v13 = vpop.f32.mrb[1].mxu0  ;;  %v2701_v19 = vadd.f32 %v2267_v12, %v2183_v11  ;;  %v2885_v12 = vrot.slane %v2733_v33, %v2773_v45 }
 0x150   :  { %v2693_v14 = vadd.f32 %v2183_v11, %v238_v13  ;;  %v2268_v15 = vpop.f32.mrb[2].mxu0  ;;  %v2888_v13 = vrot.slane %v4345_v0, 7  ;;  %v2933_v0 = vrot.slane %v2721_v28, %v2726_v30 }
 0x151   :  { %v241_v16 = vpop.f32.mrb[3].mxu0  ;;  %v2705_v21 = vadd.f32 %v2268_v15, %v2183_v11  ;;  %v269_v22 = vmul.f32 %v2701_v19, %v2701_v19  ;;  %4606 = vst [vmem:[#allocation49_spill] sm:$0xff] %v2885_v12  ;;  %v2892_v15 = vmul.f32 %v2869_v8, %v2849_v3  ;;  %v2945_v8 = vrot.slane %v2735_v34, %v2738_v35 }
 0x152   :  { %v2695_v17 = vadd.f32 %v2183_v11, %v241_v16  ;;  %255 = vadd.xlane.f32.xlu0 %v2693_v14  ;;  %v267_v18 = vmul.f32 %v2693_v14, %v2693_v14  ;;  %v2881_v11 = vrot.slane %v2731_v32, %v2762_v42  ;;  %4607 = vst [vmem:[#allocation50_spill] sm:$0xff] %v2888_v13  ;;  %4618 = vst [vmem:[#allocation61_spill] sm:$0xff] %v2933_v0 }
 0x153   :  { %v270_v23 = vmul.f32 %v2705_v21, %v2705_v21  ;;  %4608 = vst [vmem:[#allocation51_spill] sm:$0xff] %v2892_v15  ;;  %v2896_v16 = vrot.slane %v2735_v34, %v2716_v26  ;;  %4621 = vst [vmem:[#allocation64_spill] sm:$0xff] %v2945_v8  ;;  %v4629_v8 = vmov 0.0  }
 0x154   :  { %257 = vadd.xlane.f32.xlu1 %v2695_v17  ;;  %v268_v20 = vmul.f32 %v2695_v17, %v2695_v17  ;;  %4605 = vst [vmem:[#allocation48_spill] sm:$0xff] %v2881_v11  ;;  %v2921_v55 = vmul.f32 %v2881_v11, %v2849_v3  ;;  %v2978_v12 = vrot.slane %v4629_v8, 1  ;;  %v2984_v11 = vrot.slane %v2723_v29, %v2716_v26 }
 0x155   :  { %4609 = vst [vmem:[#allocation52_spill] sm:$0xff] %v2896_v16  ;;  %v2967_v58 = vmul.f32 %v2896_v16, %v2849_v3 }
 0x156   :  { %271 = vadd.xlane.f32.xlu0 %v267_v18  ;;  %v2900_v18 = vrot.slane %v2743_v37, %v2719_v27  ;;  %4615 = vst [vmem:[#allocation58_spill] sm:$0xff] %v2921_v55  ;;  %4630 = vst [vmem:[#allocation72_spill] sm:$0xff] %v2978_v12 }
 0x157   :  { %4626 = vst [vmem:[#allocation69_spill] sm:$0xff] %v2967_v58  ;;  %4631 = vst [vmem:[#allocation73_spill] sm:$0xff] %v2984_v11  ;;  %v2988_v58 = vrot.slane %v2721_v28, %v2719_v27 }
 0x158   :  { %273 = vadd.xlane.f32.xlu1 %v268_v20  ;;  %4610 = vst [vmem:[#allocation53_spill] sm:$0xff] %v2900_v18  ;;  %v2904_v20 = vmul.f32 %v2873_v9, %v2849_v3 }
 0x159   :  { %4632 = vst [vmem:[#allocation74_spill] sm:$0xff] %v2988_v58 }
 0x15a   :  { %259 = vadd.xlane.f32.xlu0 %v2701_v19  ;;  %4611 = vst [vmem:[#allocation54_spill] sm:$0xff] %v2904_v20 }
 0x15c   :  { %275 = vadd.xlane.f32.xlu1 %v269_v22  ;;  %v2908_v22 = vrot.slane %v2723_v29, %v2726_v30 }
 0x15e   :  { %261 = vadd.xlane.f32.xlu0 %v2705_v21  ;;  %4612 = vst [vmem:[#allocation55_spill] sm:$0xff] %v2908_v22  ;;  %v3005_v27 = vmul.f32 %v2908_v22, %v2849_v3 }
 0x160   :  { %277 = vadd.xlane.f32.xlu1 %v270_v23  ;;  %v2913_v23 = vrot.slane %v2721_v28, %v2729_v31  ;;  %4636 = vst [vmem:[#allocation78_spill] sm:$0xff] %v3005_v27  ;;  %v3020_v27 = vmul.f32 %v2917_v24, %v2888_v13 }
 0x162   :  { %4613 = vst [vmem:[#allocation56_spill] sm:$0xff] %v2913_v23  ;;  %4639 = vst [vmem:[#allocation81_spill] sm:$0xff] %v3020_v27 }
 0x1df   :  { %v256_v52 = vpop.xlane.xlu0 %255 }
 0x1e0   :  { %v2951_v6 = vmul.f32 0.03125, %v256_v52  ;;  %v2971_v52 = vmul.f32 %v2900_v18, %v2849_v3  ;;  %v2996_v18 = vrot.slane %v2733_v33, %v2729_v31  ;;  %v3014_v31 = vrot.slane %v2735_v34, %v2741_v36 }
 0x1e1   :  { %v258_v9 = vpop.xlane.xlu1 %257  ;;  %v3028_v34 = vrot.slane %v2743_v37, %v2762_v42 }
 0x1e2   :  { %4627 = vst [vmem:[#allocation70_spill] sm:$0xff] %v2971_v52  ;;  %v2980_v55 = vmul.f32 0.03125, %v258_v9  ;;  %v2992_v52 = vrot.slane %v2731_v32, %v2726_v30  ;;  %4634 = vst [vmem:[#allocation76_spill] sm:$0xff] %v2996_v18  ;;  %v2999_v9 = vrot.slane %v4629_v8, 2  ;;  %v283_v26 = vmul.f32 %v2951_v6, %v2951_v6 }
 0x1e3   :  { %v272_v16 = vpop.xlane.xlu0 %271  ;;  %v3009_v30 = vmul.f32 %v2913_v23, %v2888_v13  ;;  %4638 = vst [vmem:[#allocation80_spill] sm:$0xff] %v3014_v31  ;;  %v3024_v23 = vrot.slane %v2743_v37, %v2738_v35  ;;  %4641 = vst [vmem:[#allocation83_spill] sm:$0xff] %v3028_v34 }
 0x1e4   :  { %4633 = vst [vmem:[#allocation75_spill] sm:$0xff] %v2992_v52  ;;  %4635 = vst [vmem:[#allocation77_spill] sm:$0xff] %v2999_v9  ;;  %v279_v56 = vmul.f32 0.03125, %v272_v16  ;;  %v284_v32 = vmul.f32 %v2980_v55, %v2980_v55 }
 0x1e5   :  { %v274_v28 = vpop.xlane.xlu1 %273  ;;  %4637 = vst [vmem:[#allocation79_spill] sm:$0xff] %v3009_v30  ;;  %4640 = vst [vmem:[#allocation82_spill] sm:$0xff] %v3024_v23 }
 0x1e6   :  { %v287_v33 = vsub.f32 %v279_v56, %v283_v26  ;;  %v280_v16 = vmul.f32 0.03125, %v274_v28  ;;  %v3032_v56 = vmul.f32 %v2925_v59, %v2888_v13  ;;  %v3036_v26 = vrot.slane %v2723_v29, %v2773_v45 }
 0x1e7   :  { %v260_v20 = vpop.xlane.xlu0 %259  ;;  %v3039_v28 = vrot.slane %v4629_v8, 3  ;;  %v3051_v29 = vmul.f32 %v2975_v54, %v2888_v13  ;;  %v3054_v45 = vmul.f32 0.0, %v2933_v0  ;;  %v3064_v0 = vmul.f32 0.0, %v2984_v11 }
 0x1e8   :  { %v295_v30 = vadd.f32 1e-06, %v287_v33  ;;  %v288_v22 = vsub.f32 %v280_v16, %v284_v32  ;;  %v265_v15 = vmul.f32 0.03125, %v260_v20  ;;  %4642 = vst [vmem:[#allocation84_spill] sm:$0xff] %v3032_v56  ;;  %4643 = vst [vmem:[#allocation85_spill] sm:$0xff] %v3036_v26  ;;  %v3043_v20 = vmul.f32 %v2955_v41, %v2888_v13 }
 0x1e9   :  { %v276_v36 = vpop.xlane.xlu1 %275  ;;  %4644 = vst [vmem:[#allocation86_spill] sm:$0xff] %v3039_v28  ;;  %v3047_v33 = vmul.f32 %v2959_v57, %v2888_v13  ;;  %4647 = vst [vmem:[#allocation89_spill] sm:$0xff] %v3051_v29  ;;  %v3057_v16 = vmul.f32 0.0, %v2937_v51 }
 0x1ea   :  { %2346 = vrsqrt.f32 %v295_v30  ;;  %v296_v35 = vadd.f32 1e-06, %v288_v22  ;;  %v285_v32 = vmul.f32 %v265_v15, %v265_v15  ;;  %4645 = vst [vmem:[#allocation87_spill] sm:$0xff] %v3043_v20  ;;  %v281_v37 = vmul.f32 0.03125, %v276_v36  ;;  %4648 = vst [vmem:[#allocation90_spill] sm:$0xff] %v3064_v0 }
 0x1eb   :  { %v262_v42 = vpop.xlane.xlu0 %261  ;;  %4646 = vst [vmem:[#allocation88_spill] sm:$0xff] %v3047_v33  ;;  %v3060_v36 = vmul.f32 0.0, %v2941_v50 }
 0x1ec   :  { %2348 = vrsqrt.f32 %v296_v35  ;;  %v266_v8 = vmul.f32 0.03125, %v262_v42  ;;  %v289_v22 = vsub.f32 %v281_v37, %v285_v32  ;;  %v3068_v32 = vmul.f32 %v2988_v58, %v2978_v12 }
 0x1ed   :  { %v278_v30 = vpop.xlane.xlu1 %277  ;;  %v291_v37 = vsub.f32 %v2693_v14, %v2951_v6  ;;  %v3074_v42 = vmul.f32 %v2992_v52, %v2978_v12  ;;  %v2195_v6 = vld [vmem:[%s4334_s4] ss:$0 sm:$0xff] }
 0x1ee   :  { %v286_v20 = vmul.f32 %v266_v8, %v266_v8  ;;  %v282_v33 = vmul.f32 0.03125, %v278_v30  ;;  %v297_v31 = vadd.f32 1e-06, %v289_v22  ;;  %4649 = vst [vmem:[#allocation91_spill] sm:$0xff] %v3068_v32 }
 0x1ef   :  { %4650 = vst [vmem:[#allocation92_spill] sm:$0xff] %v3074_v42 }
 0x1f0   :  { %v290_v54 = vsub.f32 %v282_v33, %v286_v20  ;;  %2350 = vrsqrt.f32 %v297_v31  ;;  %v2194_v31 = vld [vmem:[%s4333_s3] ss:$0 sm:$0xff]  ;;  %v3084_v33 = vmul.f32 %v2996_v18, %v2978_v12 }
 0x1f2   :  { %v298_v35 = vadd.f32 1e-06, %v290_v54  ;;  %v292_v54 = vsub.f32 %v2695_v17, %v2980_v55  ;;  %4651 = vst [vmem:[#allocation93_spill] sm:$0xff] %v3084_v33  ;;  %v3097_v17 = vmul.f32 %v2747_v38, %v2999_v9  ;;  %v3102_v55 = vmul.f32 %v2751_v39, %v2999_v9  ;;  %v4678_v33 = vld [vmem:[#allocation49_spill] sm:$0xff] }
 0x1f4   :  { %v2347_v51 = vpop.eup %2346  ;;  %2352 = vrsqrt.f32 %v298_v35  ;;  %v3091_v35 = vmul.f32 %v3036_v26, %v2978_v12  ;;  %4654 = vst [vmem:[#allocation96_spill] sm:$0xff] %v3097_v17  ;;  %4655 = vst [vmem:[#allocation97_spill] sm:$0xff] %v3102_v55 }
 0x1f5   :  { %v303_v20 = vmul.f32 %v2347_v51, %v291_v37  ;;  %v293_v51 = vsub.f32 %v2701_v19, %v265_v15  ;;  %v3115_v19 = vmul.f32 %v2777_v46, %v2999_v9 }
 0x1f6   :  { %v2349_v14 = vpop.eup %2348  ;;  %4652 = vst [vmem:[#allocation94_spill] sm:$0xff] %v3091_v35  ;;  %v4675_v35 = vld [vmem:[#allocation48_spill] sm:$0xff] }
 0x1f7   :  { %v313_v22 = vmul.f32 %v2194_v31, %v303_v20  ;;  %v304_v30 = vmul.f32 %v2349_v14, %v292_v54  ;;  %v3111_v14 = vmul.f32 %v2755_v40, %v2999_v9  ;;  %4658 = vst [vmem:[#allocation100_spill] sm:$0xff] %v3115_v19 }
 0x1f9   :  { %v3093_v52 = vadd.f32 %v2195_v6, %v313_v22  ;;  %v314_v58 = vmul.f32 %v2194_v31, %v304_v30  ;;  %4657 = vst [vmem:[#allocation99_spill] sm:$0xff] %v3111_v14  ;;  %v294_v30 = vsub.f32 %v2705_v21, %v266_v8  ;;  %v3135_v21 = vmul.f32 %v2789_v49, %v3039_v28  ;;  %v4681_v49 = vld [vmem:[#allocation31_spill] sm:$0xff] }
 0x1fa   :  { %v2351_v37 = vpop.eup %2350 }
 0x1fb   :  { %4653 = vst [vmem:[#allocation95_spill] sm:$0xff] %v3093_v52  ;;  %v367_v54 = vcombine.high %v3093_v52, %v3093_v52  ;;  %371 = vst [vmem:[#allocation2 + $0x38] sm:$0xf] %v3093_v52  ;;  %v3107_v20 = vadd.f32 %v2195_v6, %v314_v58  ;;  %v305_v22 = vmul.f32 %v2351_v37, %v293_v51 }
 0x1fc   :  { %v3125_v51 = vmul.f32 %v2781_v47, %v3039_v28  ;;  %4662 = vst [vmem:[#allocation104_spill] sm:$0xff] %v3135_v21 }
 0x1fd   :  { %4656 = vst [vmem:[#allocation98_spill] sm:$0xff] %v3107_v20  ;;  %372 = vst [vmem:[#allocation2 + $0x48] sm:$0xf] %v367_v54  ;;  %v368_v15 = vcombine.high %v3107_v20, %v3107_v20  ;;  %v315_v58 = vmul.f32 %v2194_v31, %v305_v22  ;;  %v3129_v54 = vmul.f32 %v2785_v48, %v3039_v28  ;;  %v3142_v22 = vld [vmem:[#allocation8 + $0x30] ss:$0 sm:$0xff] }
 0x1fe   :  { %373 = vst [vmem:[#allocation2 + $0x58] sm:$0xf] %v3107_v20  ;;  %v2353_v52 = vpop.eup %2352  ;;  %4660 = vst [vmem:[#allocation102_spill] sm:$0xff] %v3125_v51  ;;  %v3157_v20 = vmul.f32 0.0, %v2963_v62 }
 0x1ff   :  { %374 = vst [vmem:[#allocation2 + $0x68] sm:$0xf] %v368_v15  ;;  %v306_v39 = vmul.f32 %v2353_v52, %v294_v30  ;;  %v3121_v38 = vadd.f32 %v2195_v6, %v315_v58  ;;  %4661 = vst [vmem:[#allocation103_spill] sm:$0xff] %v3129_v54  ;;  %v3151_v30 = vmul.f32 %v3142_v22, %v3039_v28  ;;  %v3154_v58 = vmul.f32 0.0, %v2949_v5 }
 0x200   :  { %4664 = vst [vmem:[#allocation106_spill] sm:$0xff] %v3142_v22  ;;  %4667 = vst [vmem:[#allocation109_spill] sm:$0xff] %v3157_v20  ;;  %v3189_v54 = vmul.f32 %v3028_v34, %v2978_v12  ;;  %v4679_v22 = vld [vmem:[#allocation64_spill] sm:$0xff] }
 0x201   :  { %4659 = vst [vmem:[#allocation101_spill] sm:$0xff] %v3121_v38  ;;  %v316_v37 = vmul.f32 %v2194_v31, %v306_v39  ;;  %v1174_v52 = vcombine.high %v3121_v38, %v3121_v38  ;;  %4665 = vst [vmem:[#allocation107_spill] sm:$0xff] %v3151_v30 }
 0x202   :  { %v3131_v19 = vld [vmem:[#allocation2 + $0x38] sm:$0xff]  ;;  %4666 = vst [vmem:[#allocation108_spill] sm:$0xff] %v3154_v58  ;;  %4669 = vst [vmem:[#allocation111_spill] sm:$0xff] %v3189_v54  ;;  %v3202_v54 = vmul.f32 %v2766_v43, %v2999_v9 }
 0x203   :  { %1178 = vst [vmem:[#allocation2 + $0x38] sm:$0xf] %v3121_v38  ;;  %v3140_v8 = vadd.f32 %v2195_v6, %v316_v37  ;;  %v403_v39 = vrot.slane %v3131_v19, 5 }
 0x204   :  { %v3145_v31 = vld [vmem:[#allocation2 + $0x48] sm:$0xff]  ;;  %4670 = vst [vmem:[#allocation112_spill] sm:$0xff] %v3202_v54 }
 0x205   :  { %4663 = vst [vmem:[#allocation105_spill] sm:$0xff] %v3140_v8  ;;  %v3147_v15 = vld [vmem:[#allocation2 + $0x58] sm:$0xff]  ;;  %1179 = vst [vmem:[#allocation2 + $0x48] sm:$0xf] %v1174_v52  ;;  %v1175_v6 = vcombine.high %v3140_v8, %v3140_v8  ;;  %v405_v37 = vrot.slane %v3145_v31, 5  ;;  %v425_v48 = vsel %vm418_vm0, %v2804_v53, %v403_v39  ;;  %v3182_v39 = vmul.f32 %v3024_v23, %v2978_v12 }
 0x206   :  { %1180 = vst [vmem:[#allocation2 + $0x58] sm:$0xf] %v3140_v8  ;;  %v407_v38 = vrot.slane %v3147_v15, 5  ;;  %v3167_v47 = vld [vmem:[#allocation2 + $0x68] sm:$0xff]  ;;  %v458_v30 = vmul.f32 %v2829_v60, %v425_v48  ;;  %v469_v58 = vmul.f32 %v2838_v63, %v425_v48 }
 0x207   :  { %1181 = vst [vmem:[#allocation2 + $0x68] sm:$0xf] %v1175_v6  ;;  %v409_v52 = vrot.slane %v3167_v47, 5  ;;  %v3178_v20 = vsel %vm418_vm0, %v2804_v53, %v405_v37  ;;  %4668 = vst [vmem:[#allocation110_spill] sm:$0xff] %v3182_v39  ;;  %v641_v28 = vrot.slane %v3167_v47, 7 }
 0x208   :  { %v423_v8 = vsel %vm418_vm0, %v2804_v53, %v407_v38  ;;  %v462_v21 = vadd.f32 %v458_v30, %v2832_v61  ;;  %v470_v6 = vmul.f32 %v2838_v63, %v3178_v20  ;;  %v473_v37 = vadd.f32 %v469_v58, %v2852_v4 }
 0x209   :  { %v422_v38 = vsel %vm418_vm0, %v2804_v53, %v409_v52  ;;  %v481_v51 = vmul.f32 %v2842_v1, %v3178_v20  ;;  %v482_v39 = vmul.f32 %v2842_v1, %v423_v8  ;;  %v493_v55 = vmul.f32 %v2846_v2, %v423_v8  ;;  %v4677_v53 = vld [vmem:[#allocation58_spill] sm:$0xff] }
 0x20a   :  { %v474_v14 = vadd.f32 %v470_v6, %v462_v21  ;;  %v494_v61 = vmul.f32 %v2846_v2, %v422_v38  ;;  %v3206_v52 = vmul.f32 %v2770_v44, %v2999_v9  ;;  %v505_v4 = vmul.f32 %v2865_v7, %v422_v38  ;;  %v4672_v2 = vld [vmem:[#allocation51_spill] sm:$0xff]  ;;  %v4683_v44 = vld [vmem:[#allocation34_spill] sm:$0xff] }
 0x20b   :  { %v485_v30 = vadd.f32 %v481_v51, %v473_v37  ;;  %v520_v21 = vrot.slane %v3131_v19, 6  ;;  %v522_v37 = vrot.slane %v3145_v31, 6 }
 0x20c   :  { %v486_v17 = vadd.f32 %v482_v39, %v474_v14  ;;  %4671 = vst [vmem:[#allocation113_spill] sm:$0xff] %v3206_v52  ;;  %v524_v39 = vrot.slane %v3147_v15, 6 }
 0x20d   :  { %v497_v58 = vadd.f32 %v493_v55, %v485_v30  ;;  %v3216_v54 = vsel %vm533_vm1, %v2849_v3, %v520_v21  ;;  %v526_v30 = vrot.slane %v3167_v47, 6 }
 0x20e   :  { %v498_v6 = vadd.f32 %v494_v61, %v486_v17  ;;  %v3224_v61 = vsel %vm533_vm1, %v2849_v3, %v522_v37  ;;  %v3239_v37 = vsel %vm533_vm1, %v2849_v3, %v524_v39  ;;  %v584_v42 = vmul.f32 %v4678_v33, %v3216_v54 }
 0x20f   :  { %v509_v51 = vadd.f32 %v505_v4, %v497_v58  ;;  %v4673_v4 = vld [vmem:[#allocation54_spill] sm:$0xff]  ;;  %v635_v58 = vrot.slane %v3131_v19, 7  ;;  %v585_v32 = vmul.f32 %v4678_v33, %v3224_v61  ;;  %v3253_v39 = vmul.f32 %v4681_v49, %v425_v48 }
 0x210   :  { %v510_v14 = vadd.f32 %v2877_v10, %v498_v6  ;;  %v4674_v6 = vld [vmem:[#allocation32_spill] sm:$0xff] }
 0x211   :  { %v552_v52 = vadd.f32 %v4672_v2, %v509_v51  ;;  %v447_v7 = vmul.f32 %v4674_v6, %v425_v48  ;;  %v573_v51 = vmul.f32 %v4675_v35, %v3216_v54  ;;  %v3269_v48 = vmul.f32 %v2838_v63, %v423_v8 }
 0x212   :  { %v553_v55 = vadd.f32 %v4672_v2, %v510_v14  ;;  %v3234_v14 = vmul.f32 %v2941_v50, %v3131_v19  ;;  %v833_v50 = vrot.slane %v3131_v19, 1  ;;  %v4682_v2 = vld [vmem:[#allocation52_spill] sm:$0xff] }
 0x213   :  { %v564_v17 = vadd.f32 %v4673_v4, %v552_v52  ;;  %v596_v46 = vmul.f32 %v4682_v2, %v3224_v61  ;;  %v597_v0 = vmul.f32 %v4682_v2, %v3239_v37 }
 0x214   :  { %v565_v21 = vadd.f32 %v4673_v4, %v553_v55  ;;  %4676 = vst [vmem:[#allocation48_spill] sm:$0xff] %v3234_v14  ;;  %v3246_v55 = vmul.f32 %v4679_v22, %v3131_v19 }
 0x215   :  { %v576_v52 = vadd.f32 %v4677_v53, %v564_v17  ;;  %v537_v17 = vsel %vm533_vm1, %v2849_v3, %v526_v30  ;;  %v4684_v30 = vld [vmem:[#allocation53_spill] sm:$0xff] }
 0x216   :  { %4680 = vst [vmem:[#allocation114_spill] sm:$0xff] %v3246_v55  ;;  %v577_v4 = vadd.f32 %v573_v51, %v565_v21  ;;  %v3261_v21 = vadd.f32 %v447_v7, %v4683_v44  ;;  %v3264_v51 = vmul.f32 %v2829_v60, %v423_v8  ;;  %v609_v7 = vmul.f32 %v4684_v30, %v537_v17  ;;  %v4686_v55 = vld [vmem:[#allocation46_spill] sm:$0xff] }
 0x217   :  { %v588_v53 = vadd.f32 %v584_v42, %v576_v52  ;;  %v608_v42 = vmul.f32 %v4684_v30, %v3239_v37  ;;  %v637_v52 = vrot.slane %v3145_v31, 7  ;;  %v639_v44 = vrot.slane %v3147_v15, 7 }
 0x218   :  { %v589_v10 = vadd.f32 %v585_v32, %v577_v4  ;;  %v3278_v32 = vmul.f32 %v2838_v63, %v422_v38  ;;  %v3281_v4 = vmul.f32 %v2842_v1, %v422_v38  ;;  %v3286_v14 = vmul.f32 %v4686_v55, %v3216_v54 }
 0x219   :  { %v600_v49 = vadd.f32 %v596_v46, %v588_v53  ;;  %v4685_v46 = vld [vmem:[#allocation55_spill] sm:$0xff]  ;;  %v3295_v30 = vsel %vm648_vm2, %v2888_v13, %v635_v58  ;;  %v3299_v38 = vmul.f32 %v4678_v33, %v3239_v37  ;;  %v652_v58 = vsel %vm648_vm2, %v2888_v13, %v641_v28 }
 0x21a   :  { %v601_v3 = vadd.f32 %v597_v0, %v589_v10  ;;  %v620_v53 = vmul.f32 %v4685_v46, %v537_v17  ;;  %v3290_v0 = vmul.f32 %v4675_v35, %v3224_v61  ;;  %v3307_v46 = vsel %vm648_vm2, %v2888_v13, %v637_v52 }
 0x21b   :  { %v612_v8 = vadd.f32 %v608_v42, %v600_v49  ;;  %v3302_v49 = vmul.f32 %v4678_v33, %v537_v17  ;;  %v3319_v33 = vsel %vm648_vm2, %v2888_v13, %v639_v44  ;;  %v3324_v52 = vmul.f32 %v2917_v24, %v3295_v30  ;;  %v4693_v44 = vld [vmem:[#allocation60_spill] sm:$0xff] }
 0x21c   :  { %v613_v10 = vadd.f32 %v609_v7, %v601_v3  ;;  %v3310_v3 = vmul.f32 %v4682_v2, %v537_v17  ;;  %v4689_v7 = vld [vmem:[#allocation78_spill] sm:$0xff]  ;;  %v688_v17 = vmul.f32 %v2925_v59, %v3295_v30  ;;  %v3335_v2 = vmul.f32 %v2925_v59, %v3307_v46 }
 0x21d   :  { %4687 = vst [vmem:[#allocation115_spill] sm:$0xff] %v3302_v49  ;;  %v624_v42 = vadd.f32 %v620_v53, %v612_v8  ;;  %v4690_v8 = vld [vmem:[#allocation79_spill] sm:$0xff]  ;;  %4691 = vst [vmem:[#allocation117_spill] sm:$0xff] %v3324_v52  ;;  %v700_v13 = vmul.f32 %v4693_v44, %v3307_v46  ;;  %v3344_v52 = vmul.f32 %v4693_v44, %v3319_v33 }
 0x21e   :  { %4688 = vst [vmem:[#allocation116_spill] sm:$0xff] %v3310_v3  ;;  %v625_v1 = vadd.f32 %v4689_v7, %v613_v10  ;;  %v3330_v10 = vmul.f32 %v4679_v22, %v3145_v31  ;;  %4692 = vst [vmem:[#allocation118_spill] sm:$0xff] %v3335_v2  ;;  %v3347_v7 = vmul.f32 %v4693_v44, %v652_v58  ;;  %v4697_v3 = vld [vmem:[#allocation71_spill] sm:$0xff] }
 0x21f   :  { %v667_v53 = vadd.f32 %v4690_v8, %v624_v42  ;;  %v699_v42 = vmul.f32 %v4693_v44, %v3295_v30  ;;  %4694 = vst [vmem:[#allocation119_spill] sm:$0xff] %v3344_v52  ;;  %v3355_v22 = vmul.f32 %v2955_v41, %v652_v58  ;;  %v723_v52 = vmul.f32 %v2959_v57, %v3319_v33 }
 0x220   :  { %v668_v28 = vadd.f32 %v4690_v8, %v625_v1  ;;  %4695 = vst [vmem:[#allocation120_spill] sm:$0xff] %v3347_v7  ;;  %v711_v1 = vmul.f32 %v2955_v41, %v3307_v46  ;;  %v712_v8 = vmul.f32 %v2955_v41, %v3319_v33  ;;  %v724_v44 = vmul.f32 %v2959_v57, %v652_v58 }
 0x221   :  { %v679_v63 = vadd.f32 %v3020_v27, %v667_v53  ;;  %4696 = vst [vmem:[#allocation121_spill] sm:$0xff] %v3355_v22  ;;  %v835_v53 = vrot.slane %v3145_v31, 1  ;;  %v837_v7 = vrot.slane %v3147_v15, 1  ;;  %v839_v41 = vrot.slane %v3167_v47, 1 }
 0x222   :  { %v680_v2 = vadd.f32 %v3020_v27, %v668_v28  ;;  %v735_v28 = vmul.f32 %v4697_v3, %v652_v58  ;;  %v3366_v27 = vmul.f32 %v2949_v5, %v3145_v31 }
 0x223   :  { %v691_v49 = vadd.f32 %v3032_v56, %v679_v63  ;;  %v3371_v63 = vmul.f32 %v2949_v5, %v3147_v15  ;;  %v3375_v56 = vmul.f32 %v2963_v62, %v3147_v15 }
 0x224   :  { %v692_v59 = vadd.f32 %v688_v17, %v680_v2  ;;  %v3380_v2 = vsel %vm847_vm3, %v833_v50, %v2978_v12  ;;  %v3384_v17 = vmul.f32 %v2963_v62, %v3167_v47  ;;  %v3398_v50 = vsel %vm847_vm3, %v837_v7, %v2978_v12  ;;  %v4701_v7 = vld [vmem:[#allocation80_spill] sm:$0xff] }
 0x225   :  { %v703_v22 = vadd.f32 %v699_v42, %v691_v49  ;;  %v3388_v49 = vmul.f32 %v2984_v11, %v3167_v47  ;;  %v3393_v42 = vsel %vm847_vm3, %v835_v53, %v2978_v12  ;;  %4699 = vst [vmem:[#allocation123_spill] sm:$0xff] %v3398_v50  ;;  %v3406_v11 = vsel %vm847_vm3, %v839_v41, %v2978_v12 }
 0x226   :  { %v704_v58 = vadd.f32 %v700_v13, %v692_v59  ;;  %4698 = vst [vmem:[#allocation122_spill] sm:$0xff] %v3393_v42  ;;  %v950_v13 = vrot.slane %v3145_v31, 2  ;;  %v459_v59 = vmul.f32 %v2829_v60, %v3178_v20  ;;  %4700 = vst [vmem:[#allocation124_spill] sm:$0xff] %v3406_v11  ;;  %v3410_v53 = vmul.f32 %v2996_v18, %v3380_v2 }
 0x227   :  { %v715_v3 = vadd.f32 %v711_v1, %v703_v22  ;;  %v952_v22 = vrot.slane %v3147_v15, 2  ;;  %v3415_v57 = vmul.f32 %v4701_v7, %v3380_v2  ;;  %v3419_v60 = vmul.f32 %v4701_v7, %v3393_v42 }
 0x228   :  { %v716_v62 = vadd.f32 %v712_v8, %v704_v58  ;;  %v448_v8 = vmul.f32 %v4674_v6, %v3178_v20  ;;  %v3425_v58 = vmul.f32 %v3024_v23, %v3393_v42  ;;  %v3429_v12 = vmul.f32 %v3024_v23, %v3398_v50  ;;  %v4704_v20 = vld [vmem:[#allocation33_spill] sm:$0xff] }
 0x229   :  { %v727_v1 = vadd.f32 %v723_v52, %v715_v3  ;;  %v954_v3 = vrot.slane %v3167_v47, 2  ;;  %v4702_v18 = vrot.slane %v3131_v19, 2  ;;  %v3445_v23 = vmul.f32 %v3028_v34, %v3398_v50 }
 0x22a   :  { %v728_v41 = vadd.f32 %v724_v44, %v716_v62  ;;  %v463_v62 = vadd.f32 %v459_v59, %v3261_v21  ;;  %v440_v44 = vadd.f32 %v4704_v20, %v3253_v39  ;;  %v3459_v39 = vsel %vm962_vm4, %v950_v13, %v2999_v9 }
 0x22b   :  { %v739_v52 = vadd.f32 %v735_v28, %v727_v1  ;;  %v3437_v7 = vsel %vm962_vm4, %v4702_v18, %v2999_v9  ;;  %v3449_v28 = vmul.f32 %v3028_v34, %v3406_v11  ;;  %v3453_v1 = vmul.f32 %v3036_v26, %v3406_v11  ;;  %4705 = vst [vmem:[#allocation33_spill] sm:$0xff] %v3459_v39  ;;  %v4712_v11 = vld [vmem:[#allocation86_spill] sm:$0xff] }
 0x22c   :  { %4703 = vst [vmem:[#allocation125_spill] sm:$0xff] %v3437_v7  ;;  %v740_v42 = vadd.f32 %v3051_v29, %v728_v41  ;;  %v475_v21 = vadd.f32 %v3269_v48, %v463_v62  ;;  %v452_v59 = vadd.f32 %v448_v8, %v440_v44  ;;  %v3466_v20 = vsel %vm962_vm4, %v954_v3, %v2999_v9  ;;  %v4708_v62 = vld [vmem:[#allocation20_spill] sm:$0xff] }
 0x22d   :  { %v751_v18 = vadd.f32 %v3054_v45, %v739_v52  ;;  %4706 = vst [vmem:[#allocation126_spill] sm:$0xff] %v3466_v20  ;;  %v3471_v26 = vsel %vm962_vm4, %v952_v22, %v2999_v9  ;;  %v3475_v52 = vmul.f32 %v2755_v40, %v3437_v7  ;;  %v1063_v48 = vrot.slane %v3131_v19, 3 }
 0x22e   :  { %v752_v41 = vadd.f32 %v3054_v45, %v740_v42  ;;  %4707 = vst [vmem:[#allocation127_spill] sm:$0xff] %v3471_v26  ;;  %v487_v42 = vadd.f32 %v3281_v4, %v475_v21  ;;  %v464_v8 = vadd.f32 %v3264_v51, %v452_v59  ;;  %v3484_v44 = vmul.f32 %v4708_v62, %v3437_v7  ;;  %v4709_v21 = vld [vmem:[#allocation43_spill] sm:$0xff]  ;;  %v4710_v59 = vld [vmem:[#allocation48_spill] sm:$0xff] }
 0x22f   :  { %v763_v13 = vadd.f32 %v3057_v16, %v751_v18  ;;  %v3488_v22 = vmul.f32 %v4708_v62, %v3459_v39  ;;  %v3492_v9 = vmul.f32 %v2766_v43, %v3459_v39  ;;  %v1065_v4 = vrot.slane %v3145_v31, 3  ;;  %v4711_v39 = vld [vmem:[#allocation114_spill] sm:$0xff] }
 0x230   :  { %v764_v3 = vadd.f32 %v3057_v16, %v752_v41  ;;  %v499_v51 = vadd.f32 %v4709_v21, %v487_v42  ;;  %v476_v16 = vadd.f32 %v3278_v32, %v464_v8  ;;  %v3501_v34 = vmul.f32 %v2766_v43, %v3471_v26  ;;  %v4715_v32 = vld [vmem:[#allocation47_spill] sm:$0xff] }
 0x231   :  { %v775_v18 = vadd.f32 %v3060_v36, %v763_v13  ;;  %v1067_v62 = vrot.slane %v3147_v15, 3  ;;  %v1069_v40 = vrot.slane %v3167_v47, 3  ;;  %v3509_v36 = vsel %vm1077_vm5, %v1063_v48, %v4712_v11  ;;  %v4714_v13 = vld [vmem:[#allocation42_spill] sm:$0xff] }
 0x232   :  { %v776_v41 = vadd.f32 %v4710_v59, %v764_v3  ;;  %4713 = vst [vmem:[#allocation48_spill] sm:$0xff] %v3509_v36  ;;  %v488_v42 = vadd.f32 %v4714_v13, %v476_v16  ;;  %v511_v8 = vadd.f32 %v4715_v32, %v499_v51  ;;  %v4716_v59 = vld [vmem:[#allocation22_spill] sm:$0xff]  ;;  %v3530_v51 = vsel %vm1077_vm5, %v1065_v4, %v4712_v11  ;;  %v4719_v16 = vld [vmem:[#allocation51_spill] sm:$0xff] }
 0x233   :  { %v787_v7 = vadd.f32 %v4711_v39, %v775_v18  ;;  %v3516_v43 = vmul.f32 %v4716_v59, %v3471_v26  ;;  %v3520_v50 = vmul.f32 %v4716_v59, %v3466_v20  ;;  %v4717_v39 = vld [vmem:[#allocation23_spill] sm:$0xff]  ;;  %4718 = vst [vmem:[#allocation114_spill] sm:$0xff] %v3530_v51  ;;  %v3538_v59 = vsel %vm1077_vm5, %v1069_v40, %v4712_v11 }
 0x234   :  { %v788_v3 = vadd.f32 %v3330_v10, %v776_v41  ;;  %v3524_v18 = vmul.f32 %v4717_v39, %v3466_v20  ;;  %v500_v10 = vadd.f32 %v4709_v21, %v488_v42  ;;  %v554_v41 = vadd.f32 %v4719_v16, %v511_v8  ;;  %4720 = vst [vmem:[#allocation128_spill] sm:$0xff] %v3538_v59  ;;  %v4724_v39 = vld [vmem:[#allocation27_spill] sm:$0xff] }
 0x235   :  { %v799_v48 = vadd.f32 %v3366_v27, %v787_v7  ;;  %v3543_v27 = vsel %vm1077_vm5, %v1067_v62, %v4712_v11  ;;  %v4722_v7 = vld [vmem:[#allocation26_spill] sm:$0xff]  ;;  %v3557_v20 = vmul.f32 %v4724_v39, %v3509_v36  ;;  %v3561_v62 = vmul.f32 %v4724_v39, %v3530_v51  ;;  %v4725_v11 = vld [vmem:[#allocation28_spill] sm:$0xff] }
 0x236   :  { %v800_v13 = vadd.f32 %v3371_v63, %v788_v3  ;;  %4721 = vst [vmem:[#allocation129_spill] sm:$0xff] %v3543_v27  ;;  %v3547_v4 = vmul.f32 %v4722_v7, %v3509_v36  ;;  %v512_v8 = vadd.f32 %v4715_v32, %v500_v10  ;;  %v4723_v63 = vld [vmem:[#allocation45_spill] sm:$0xff]  ;;  %v566_v21 = vadd.f32 %v3286_v14, %v554_v41 }
 0x237   :  { %v811_v42 = vadd.f32 %v3375_v56, %v799_v48  ;;  %v551_v3 = vmul.f32 %v4723_v63, %v3216_v54  ;;  %v3565_v56 = vmul.f32 %v4725_v11, %v3530_v51  ;;  %v563_v54 = vmul.f32 %v4686_v55, %v3224_v61  ;;  %v4728_v63 = vld [vmem:[#allocation29_spill] sm:$0xff]  ;;  %v4734_v55 = vld [vmem:[#allocation56_spill] sm:$0xff] }
 0x238   :  { %v812_v40 = vadd.f32 %v3384_v17, %v800_v13  ;;  %v578_v14 = vadd.f32 %v3290_v0, %v566_v21  ;;  %v4726_v17 = vld [vmem:[#allocation90_spill] sm:$0xff]  ;;  %v3574_v41 = vmul.f32 %v4725_v11, %v3543_v27  ;;  %v3578_v39 = vmul.f32 %v4728_v63, %v3543_v27  ;;  %v4735_v27 = vld [vmem:[#allocation92_spill] sm:$0xff] }
 0x239   :  { %v823_v48 = vadd.f32 %v3388_v49, %v811_v42  ;;  %v555_v10 = vadd.f32 %v551_v3, %v512_v8  ;;  %v3582_v7 = vmul.f32 %v4728_v63, %v3538_v59  ;;  %v4731_v49 = vld [vmem:[#allocation91_spill] sm:$0xff]  ;;  %v575_v61 = vmul.f32 %v4675_v35, %v3239_v37  ;;  %v4732_v3 = vld [vmem:[#allocation106_spill] sm:$0xff]  ;;  %v3625_v36 = vld [vmem:[#allocation2 + $0x58] sm:$0xff] }
 0x23a   :  { %v824_v13 = vadd.f32 %v4726_v17, %v812_v40  ;;  %4727 = vst [vmem:[#allocation90_spill] sm:$0xff] %v3574_v41  ;;  %4729 = vst [vmem:[#allocation130_spill] sm:$0xff] %v3578_v39  ;;  %v590_v0 = vadd.f32 %v3299_v38, %v578_v14  ;;  %v3591_v40 = vmul.f32 %v4732_v3, %v3538_v59  ;;  %v4737_v37 = vld [vmem:[#allocation59_spill] sm:$0xff]  ;;  %v3601_v14 = vld [vmem:[#allocation2 + $0x38] sm:$0xff] }
 0x23b   :  { %4730 = vst [vmem:[#allocation131_spill] sm:$0xff] %v3582_v7  ;;  %v866_v42 = vadd.f32 %v4731_v49, %v823_v48  ;;  %v567_v8 = vadd.f32 %v563_v54, %v555_v10  ;;  %v666_v11 = vmul.f32 %v4734_v55, %v3295_v30  ;;  %v678_v63 = vmul.f32 %v2917_v24, %v3307_v46  ;;  %v4736_v54 = vld [vmem:[#allocation116_spill] sm:$0xff]  ;;  %v4738_v3 = vld [vmem:[#allocation61_spill] sm:$0xff]  ;;  %v4739_v30 = vld [vmem:[#allocation62_spill] sm:$0xff] }
 0x23c   :  { %v867_v21 = vadd.f32 %v4731_v49, %v824_v13  ;;  %4733 = vst [vmem:[#allocation91_spill] sm:$0xff] %v3591_v40  ;;  %v602_v51 = vadd.f32 %v4736_v54, %v590_v0  ;;  %v690_v38 = vmul.f32 %v4737_v37, %v3319_v33  ;;  %v3606_v59 = vmul.f32 %v4738_v3, %v3131_v19  ;;  %v4742_v54 = vld [vmem:[#allocation70_spill] sm:$0xff]  ;;  %v4743_v24 = vld [vmem:[#allocation63_spill] sm:$0xff]  ;;  %v4744_v3 = vld [vmem:[#allocation64_spill] sm:$0xff] }
 0x23d   :  { %v878_v48 = vadd.f32 %v4735_v27, %v866_v42  ;;  %v579_v10 = vadd.f32 %v575_v61, %v567_v8  ;;  %v3610_v55 = vmul.f32 %v4739_v30, %v3131_v19  ;;  %v3614_v46 = vmul.f32 %v4739_v30, %v3145_v31  ;;  %v3616_v42 = vld [vmem:[#allocation2 + $0x48] sm:$0xff]  ;;  %v4740_v8 = vld [vmem:[#allocation93_spill] sm:$0xff] }
 0x23e   :  { %v879_v13 = vadd.f32 %v4735_v27, %v867_v21  ;;  %v4741_v61 = vld [vmem:[#allocation115_spill] sm:$0xff]  ;;  %v614_v21 = vadd.f32 %v4742_v54, %v602_v51  ;;  %v3623_v27 = vmul.f32 %v4743_v24, %v3145_v31  ;;  %v3630_v30 = vmul.f32 %v4743_v24, %v3147_v15  ;;  %v4746_v31 = vld [vmem:[#allocation78_spill] sm:$0xff] }
 0x23f   :  { %v890_v33 = vadd.f32 %v4740_v8, %v878_v48  ;;  %v591_v0 = vadd.f32 %v4741_v61, %v579_v10  ;;  %v3634_v26 = vmul.f32 %v4744_v3, %v3147_v15  ;;  %v1210_v48 = vrot.slane %v3601_v14, 5  ;;  %v4745_v10 = vld [vmem:[#allocation69_spill] sm:$0xff]  ;;  %v3640_v37 = vld [vmem:[#allocation2 + $0x68] sm:$0xff] }
 0x240   :  { %v891_v19 = vadd.f32 %v3410_v53, %v879_v13  ;;  %v626_v8 = vadd.f32 %v4746_v31, %v614_v21  ;;  %v1212_v53 = vrot.slane %v3616_v42, 5  ;;  %v3646_v24 = vmul.f32 %v4744_v3, %v3167_v47  ;;  %v4747_v40 = vld [vmem:[#allocation30_spill] sm:$0xff]  ;;  %v4749_v21 = vld [vmem:[#allocation79_spill] sm:$0xff] }
 0x241   :  { %v902_v51 = vadd.f32 %v3415_v57, %v890_v33  ;;  %v603_v61 = vadd.f32 %v4745_v10, %v591_v0  ;;  %v1214_v15 = vrot.slane %v3625_v36, 5  ;;  %v3652_v57 = vsel %vm418_vm0, %v4747_v40, %v1210_v48  ;;  %v4751_v48 = vld [vmem:[#allocation74_spill] sm:$0xff] }
 0x242   :  { %v903_v13 = vadd.f32 %v3419_v60, %v891_v19  ;;  %4748 = vst [vmem:[#allocation106_spill] sm:$0xff] %v3652_v57  ;;  %v669_v10 = vadd.f32 %v4749_v21, %v626_v8  ;;  %v3660_v60 = vsel %vm418_vm0, %v4747_v40, %v1212_v53  ;;  %v3665_v3 = vmul.f32 %v2949_v5, %v3167_v47  ;;  %v4756_v5 = vld [vmem:[#allocation34_spill] sm:$0xff] }
 0x243   :  { %v914_v33 = vadd.f32 %v3425_v58, %v902_v51  ;;  %v615_v0 = vadd.f32 %v4742_v54, %v603_v61  ;;  %4750 = vst [vmem:[#allocation116_spill] sm:$0xff] %v3660_v60  ;;  %v3669_v7 = vmul.f32 %v4751_v48, %v3380_v2  ;;  %v1216_v58 = vrot.slane %v3640_v37, 5  ;;  %v4753_v61 = vld [vmem:[#allocation117_spill] sm:$0xff]  ;;  %v4757_v21 = vld [vmem:[#allocation94_spill] sm:$0xff] }
 0x244   :  { %v915_v19 = vadd.f32 %v3429_v12, %v903_v13  ;;  %v681_v54 = vadd.f32 %v4753_v61, %v669_v10  ;;  %v1243_v53 = vmul.f32 %v3652_v57, %v4674_v6  ;;  %v3681_v47 = vsel %vm418_vm0, %v4747_v40, %v1214_v15  ;;  %v4754_v13 = vld [vmem:[#allocation35_spill] sm:$0xff]  ;;  %v4755_v10 = vld [vmem:[#allocation118_spill] sm:$0xff] }
 0x245   :  { %4752 = vst [vmem:[#allocation115_spill] sm:$0xff] %v3669_v7  ;;  %v926_v51 = vadd.f32 %v3445_v23, %v914_v33  ;;  %v627_v8 = vadd.f32 %v4746_v31, %v615_v0  ;;  %v1250_v48 = vmul.f32 %v3652_v57, %v4754_v13  ;;  %v1251_v23 = vmul.f32 %v3660_v60, %v4754_v13  ;;  %v4759_v7 = vld [vmem:[#allocation37_spill] sm:$0xff]  ;;  %v4760_v13 = vld [vmem:[#allocation96_spill] sm:$0xff] }
 0x246   :  { %v927_v12 = vadd.f32 %v3449_v28, %v915_v19  ;;  %v693_v61 = vadd.f32 %v4755_v10, %v681_v54  ;;  %v1247_v6 = vadd.f32 %v1243_v53, %v4756_v5  ;;  %v3694_v15 = vsel %vm418_vm0, %v4747_v40, %v1216_v58  ;;  %v4758_v19 = vld [vmem:[#allocation36_spill] sm:$0xff]  ;;  %v4762_v58 = vld [vmem:[#allocation41_spill] sm:$0xff] }
 0x247   :  { %v938_v33 = vadd.f32 %v3453_v1, %v926_v51  ;;  %v670_v0 = vadd.f32 %v666_v11, %v627_v8  ;;  %v1254_v31 = vadd.f32 %v1250_v48, %v4758_v19  ;;  %v1257_v39 = vmul.f32 %v3652_v57, %v4759_v7  ;;  %v4761_v11 = vld [vmem:[#allocation119_spill] sm:$0xff]  ;;  %v4763_v48 = vld [vmem:[#allocation97_spill] sm:$0xff] }
 0x248   :  { %v939_v28 = vadd.f32 %v4757_v21, %v927_v12  ;;  %v705_v51 = vadd.f32 %v4761_v11, %v693_v61  ;;  %v1255_v54 = vadd.f32 %v1251_v23, %v1247_v6  ;;  %v1258_v8 = vmul.f32 %v3660_v60, %v4759_v7  ;;  %v4764_v19 = vld [vmem:[#allocation121_spill] sm:$0xff] }
 0x249   :  { %v981_v41 = vadd.f32 %v4760_v13, %v938_v33  ;;  %v682_v1 = vadd.f32 %v678_v63, %v670_v0  ;;  %v1259_v40 = vmul.f32 %v3681_v47, %v4759_v7  ;;  %v1261_v53 = vadd.f32 %v1257_v39, %v4762_v58  ;;  %v4765_v33 = vld [vmem:[#allocation38_spill] sm:$0xff]  ;;  %v4767_v7 = vld [vmem:[#allocation120_spill] sm:$0xff] }
 0x24a   :  { %v982_v5 = vadd.f32 %v4760_v13, %v939_v28  ;;  %v717_v57 = vadd.f32 %v4764_v19, %v705_v51  ;;  %v1265_v63 = vmul.f32 %v3660_v60, %v4765_v33  ;;  %v1262_v23 = vadd.f32 %v1258_v8, %v1254_v31  ;;  %v4766_v28 = vld [vmem:[#allocation99_spill] sm:$0xff]  ;;  %v4768_v58 = vld [vmem:[#allocation88_spill] sm:$0xff] }
 0x24b   :  { %v993_v12 = vadd.f32 %v4763_v48, %v981_v41  ;;  %v694_v10 = vadd.f32 %v690_v38, %v682_v1  ;;  %v3712_v0 = vadd.f32 %v1259_v40, %v1255_v54  ;;  %v1266_v61 = vmul.f32 %v3681_v47, %v4765_v33  ;;  %v4769_v19 = vld [vmem:[#allocation39_spill] sm:$0xff] }
 0x24c   :  { %v994_v6 = vadd.f32 %v4763_v48, %v982_v5  ;;  %v729_v41 = vadd.f32 %v4768_v58, %v717_v57  ;;  %v1269_v38 = vadd.f32 %v1265_v63, %v1261_v53  ;;  %v1273_v60 = vmul.f32 %v3681_v47, %v4769_v19  ;;  %v4770_v5 = vld [vmem:[#allocation87_spill] sm:$0xff] }
 0x24d   :  { %v1005_v11 = vadd.f32 %v4766_v28, %v993_v12  ;;  %v706_v39 = vadd.f32 %v4767_v7, %v694_v10  ;;  %v1270_v51 = vadd.f32 %v1266_v61, %v1262_v23  ;;  %v1274_v31 = vmul.f32 %v3694_v15, %v4769_v19  ;;  %v4771_v7 = vld [vmem:[#allocation75_spill] sm:$0xff]  ;;  %v4772_v10 = vld [vmem:[#allocation44_spill] sm:$0xff] }
 0x24e   :  { %v1006_v1 = vadd.f32 %v3475_v52, %v994_v6  ;;  %v741_v40 = vadd.f32 %v3051_v29, %v729_v41  ;;  %v3729_v12 = vmul.f32 %v4771_v7, %v3380_v2  ;;  %v1277_v52 = vadd.f32 %v1273_v60, %v1269_v38  ;;  %v4775_v19 = vld [vmem:[#allocation123_spill] sm:$0xff] }
 0x24f   :  { %v1017_v54 = vadd.f32 %v3484_v44, %v1005_v11  ;;  %v718_v8 = vadd.f32 %v4770_v5, %v706_v39  ;;  %v1278_v53 = vadd.f32 %v1274_v31, %v1270_v51  ;;  %v1281_v63 = vmul.f32 %v3694_v15, %v4772_v10  ;;  %v4773_v39 = vld [vmem:[#allocation122_spill] sm:$0xff]  ;;  %v4774_v51 = vld [vmem:[#allocation76_spill] sm:$0xff] }
 0x250   :  { %v1018_v57 = vadd.f32 %v3488_v22, %v1006_v1  ;;  %v753_v44 = vadd.f32 %v3054_v45, %v741_v40  ;;  %v1296_v61 = vrot.slane %v3601_v14, 6  ;;  %v3741_v2 = vmul.f32 %v4771_v7, %v4773_v39 }
 0x251   :  { %v1029_v6 = vadd.f32 %v3492_v9, %v1017_v54  ;;  %v730_v23 = vadd.f32 %v4768_v58, %v718_v8  ;;  %v1285_v22 = vadd.f32 %v1281_v63, %v1277_v52  ;;  %v1286_v60 = vadd.f32 %v1278_v53, %v4715_v32 }
 0x252   :  { %v1030_v11 = vadd.f32 %v3501_v34, %v1018_v57  ;;  %v765_v9 = vadd.f32 %v3610_v55, %v753_v44  ;;  %v1298_v1 = vrot.slane %v3616_v42, 6  ;;  %v888_v34 = vmul.f32 %v4774_v51, %v4773_v39  ;;  %v4776_v55 = vld [vmem:[#allocation40_spill] sm:$0xff] }
 0x253   :  { %v1041_v41 = vadd.f32 %v3516_v43, %v1029_v6  ;;  %v742_v38 = vadd.f32 %v3051_v29, %v730_v23  ;;  %v3753_v31 = vmul.f32 %v4774_v51, %v4775_v19  ;;  %v1300_v54 = vrot.slane %v3625_v36, 6  ;;  %v4778_v6 = vld [vmem:[#allocation102_spill] sm:$0xff] }
 0x254   :  { %v1042_v45 = vadd.f32 %v3520_v50, %v1030_v11  ;;  %v777_v40 = vadd.f32 %v3623_v27, %v765_v9  ;;  %v3762_v57 = vsel %vm533_vm1, %v4776_v55, %v1296_v61  ;;  %v4777_v50 = vld [vmem:[#allocation100_spill] sm:$0xff]  ;;  %v1302_v53 = vrot.slane %v3640_v37, 6  ;;  %v4779_v61 = vld [vmem:[#allocation54_spill] sm:$0xff] }
 0x255   :  { %v1053_v8 = vadd.f32 %v3524_v18, %v1041_v41  ;;  %v754_v43 = vadd.f32 %v3606_v59, %v742_v38  ;;  %v1323_v10 = vadd.f32 %v1285_v22, %v4719_v16  ;;  %v1324_v63 = vadd.f32 %v1286_v60, %v4719_v16  ;;  %v4780_v60 = vld [vmem:[#allocation103_spill] sm:$0xff]  ;;  %v4781_v38 = vld [vmem:[#allocation49_spill] sm:$0xff] }
 0x256   :  { %v1054_v52 = vadd.f32 %v4777_v50, %v1042_v45  ;;  %v789_v59 = vadd.f32 %v3634_v26, %v777_v40  ;;  %v3774_v27 = vsel %vm533_vm1, %v4776_v55, %v1298_v1  ;;  %v1336_v22 = vmul.f32 %v3762_v57, %v4675_v35  ;;  %v4782_v45 = vld [vmem:[#allocation58_spill] sm:$0xff] }
 0x257   :  { %v1096_v23 = vadd.f32 %v4778_v6, %v1053_v8  ;;  %v766_v18 = vadd.f32 %v3614_v46, %v754_v43  ;;  %v1331_v11 = vadd.f32 %v1323_v10, %v4779_v61  ;;  %v1332_v39 = vadd.f32 %v1324_v63, %v4779_v61 }
 0x258   :  { %v1097_v44 = vadd.f32 %v4778_v6, %v1054_v52  ;;  %v801_v26 = vadd.f32 %v3665_v3, %v789_v59  ;;  %v1343_v9 = vmul.f32 %v3762_v57, %v4781_v38  ;;  %v1344_v40 = vmul.f32 %v3774_v27, %v4781_v38  ;;  %v4783_v52 = vld [vmem:[#allocation104_spill] sm:$0xff] }
 0x259   :  { %v1108_v41 = vadd.f32 %v4780_v60, %v1096_v23  ;;  %v778_v46 = vadd.f32 %v3630_v30, %v766_v18  ;;  %v1339_v8 = vadd.f32 %v1331_v11, %v4782_v45  ;;  %v1340_v43 = vadd.f32 %v1336_v22, %v1332_v39  ;;  %v4784_v23 = vld [vmem:[#allocation109_spill] sm:$0xff]  ;;  %v4786_v39 = vld [vmem:[#allocation108_spill] sm:$0xff] }
 0x25a   :  { %v1109_v1 = vadd.f32 %v4780_v60, %v1097_v44  ;;  %v813_v61 = vadd.f32 %v4784_v23, %v801_v26  ;;  %v3796_v3 = vsel %vm533_vm1, %v4776_v55, %v1300_v54  ;;  %v3802_v18 = vsel %vm533_vm1, %v4776_v55, %v1302_v53  ;;  %v4787_v60 = vld [vmem:[#allocation52_spill] sm:$0xff]  ;;  %v4789_v53 = vld [vmem:[#allocation53_spill] sm:$0xff] }
 0x25b   :  { %v1120_v10 = vadd.f32 %v4783_v52, %v1108_v41  ;;  %v790_v63 = vadd.f32 %v3646_v24, %v778_v46  ;;  %4785 = vst [vmem:[#allocation30_spill] sm:$0xff] %v3802_v18  ;;  %v1347_v59 = vadd.f32 %v1343_v9, %v1339_v8  ;;  %v1348_v44 = vadd.f32 %v1344_v40, %v1340_v43  ;;  %v4790_v8 = vld [vmem:[#allocation90_spill] sm:$0xff] }
 0x25c   :  { %v1121_v30 = vadd.f32 %v3547_v4, %v1109_v1  ;;  %v825_v22 = vadd.f32 %v4726_v17, %v813_v61  ;;  %v1351_v41 = vmul.f32 %v3774_v27, %v4787_v60  ;;  %v4788_v4 = vld [vmem:[#allocation80_spill] sm:$0xff]  ;;  %v1352_v55 = vmul.f32 %v3796_v3, %v4787_v60 }
 0x25d   :  { %v1132_v11 = vadd.f32 %v3557_v20, %v1120_v10  ;;  %v802_v24 = vadd.f32 %v4786_v39, %v790_v63  ;;  %v900_v46 = vmul.f32 %v4788_v4, %v4775_v19  ;;  %v1359_v26 = vmul.f32 %v3796_v3, %v4789_v53  ;;  %v4791_v19 = vld [vmem:[#allocation55_spill] sm:$0xff]  ;;  %v4792_v10 = vld [vmem:[#allocation130_spill] sm:$0xff]  ;;  %v4842_v60 = vld [vmem:[#allocation112_spill] sm:$0xff] }
 0x25e   :  { %v1133_v54 = vadd.f32 %v3561_v62, %v1121_v30  ;;  %v868_v1 = vadd.f32 %v4731_v49, %v825_v22  ;;  %v1355_v45 = vadd.f32 %v1351_v41, %v1347_v59  ;;  %v1356_v40 = vadd.f32 %v1352_v55, %v1348_v44  ;;  %v4795_v41 = vld [vmem:[#allocation115_spill] sm:$0xff] }
 0x25f   :  { %v1144_v20 = vadd.f32 %v3565_v56, %v1132_v11  ;;  %v814_v9 = vadd.f32 %v4784_v23, %v802_v24  ;;  %v1360_v62 = vmul.f32 %v3802_v18, %v4789_v53  ;;  %v1367_v52 = vmul.f32 %v3802_v18, %v4791_v19  ;;  %v4793_v23 = vld [vmem:[#allocation131_spill] sm:$0xff]  ;;  %v4797_v19 = vld [vmem:[#allocation124_spill] sm:$0xff]  ;;  %v4838_v18 = vld [vmem:[#allocation113_spill] sm:$0xff] }
 0x260   :  { %v1145_v43 = vadd.f32 %v4790_v8, %v1133_v54  ;;  %v880_v56 = vadd.f32 %v3729_v12, %v868_v1  ;;  %v1363_v30 = vadd.f32 %v1359_v26, %v1355_v45  ;;  %v1382_v59 = vrot.slane %v3601_v14, 7  ;;  %v4794_v24 = vld [vmem:[#allocation91_spill] sm:$0xff]  ;;  %v4798_v12 = vld [vmem:[#allocation78_spill] sm:$0xff] }
 0x261   :  { %v1156_v63 = vadd.f32 %v4792_v10, %v1144_v20  ;;  %v826_v61 = vadd.f32 %v4726_v17, %v814_v9  ;;  %v1364_v39 = vadd.f32 %v1360_v62, %v1356_v40  ;;  %v1384_v44 = vrot.slane %v3616_v42, 7  ;;  %v4796_v8 = vld [vmem:[#allocation107_spill] sm:$0xff]  ;;  %v4800_v62 = vld [vmem:[#allocation125_spill] sm:$0xff] }
 0x262   :  { %v1157_v11 = vadd.f32 %v4793_v23, %v1145_v43  ;;  %v892_v55 = vadd.f32 %v888_v34, %v880_v56  ;;  %v1371_v53 = vadd.f32 %v1367_v52, %v1363_v30  ;;  %v901_v17 = vmul.f32 %v4788_v4, %v4797_v19  ;;  %v4799_v43 = vld [vmem:[#allocation82_spill] sm:$0xff]  ;;  %v4801_v10 = vld [vmem:[#allocation17_spill] sm:$0xff]  ;;  %v4806_v23 = vld [vmem:[#allocation79_spill] sm:$0xff] }
 0x263   :  { %v1168_v22 = vadd.f32 %v4794_v24, %v1156_v63  ;;  %v869_v54 = vadd.f32 %v4795_v41, %v826_v61  ;;  %v1372_v26 = vadd.f32 %v1364_v39, %v4798_v12  ;;  %v1386_v9 = vrot.slane %v3625_v36, 7  ;;  %v4803_v61 = vld [vmem:[#allocation50_spill] sm:$0xff]  ;;  %v4808_v41 = vld [vmem:[#allocation33_spill] sm:$0xff] }
 0x264   :  { %v1169_v20 = vadd.f32 %v4796_v8, %v1157_v11  ;;  %v904_v45 = vadd.f32 %v900_v46, %v892_v55  ;;  %v912_v40 = vmul.f32 %v4799_v43, %v4797_v19  ;;  %v980_v63 = vmul.f32 %v4801_v10, %v4800_v62  ;;  %v4807_v24 = vld [vmem:[#allocation18_spill] sm:$0xff] }
 0x265   :  { %v881_v1 = vadd.f32 %v3741_v2, %v869_v54  ;;  %v1388_v52 = vrot.slane %v3640_v37, 7  ;;  %v3848_v56 = vsel %vm648_vm2, %v4803_v61, %v1384_v44  ;;  %v3853_v2 = vsel %vm648_vm2, %v4803_v61, %v1382_v59  ;;  %v4810_v54 = vld [vmem:[#allocation59_spill] sm:$0xff] }
 0x266   :  { %v3842_v34 = vcombine.low %v1168_v22, %v1169_v20  ;;  %4804 = vst [vmem:[#allocation118_spill] sm:$0xff] %v3848_v56  ;;  %4805 = vst [vmem:[#allocation34_spill] sm:$0xff] %v3853_v2  ;;  %v916_v30 = vadd.f32 %v912_v40, %v904_v45  ;;  %v1409_v11 = vadd.f32 %v1371_v53, %v4806_v23  ;;  %v4811_v53 = vld [vmem:[#allocation111_spill] sm:$0xff]  ;;  %v4812_v20 = vld [vmem:[#allocation81_spill] sm:$0xff] }
 0x267   :  { %v893_v46 = vadd.f32 %v3753_v31, %v881_v1  ;;  %v1410_v39 = vadd.f32 %v1372_v26, %v4806_v23  ;;  %v991_v22 = vmul.f32 %v4807_v24, %v4800_v62  ;;  %v992_v44 = vmul.f32 %v4807_v24, %v4808_v41  ;;  %v4815_v62 = vld [vmem:[#allocation110_spill] sm:$0xff] }
 0x268   :  { %4802 = vst [vmem:[#allocation117_spill] sm:$0xff] %v3842_v34  ;;  %1793 = vadd.xlane.f32.xlu0 %v3842_v34  ;;  %v3866_v59 = vsel %vm648_vm2, %v4803_v61, %v1386_v9  ;;  %v1422_v31 = vmul.f32 %v3853_v2, %v4810_v54  ;;  %v928_v8 = vadd.f32 %v4811_v53, %v916_v30  ;;  %v4814_v9 = vld [vmem:[#allocation60_spill] sm:$0xff]  ;;  %v4818_v24 = vld [vmem:[#allocation66_spill] sm:$0xff] }
 0x269   :  { %4809 = vst [vmem:[#allocation94_spill] sm:$0xff] %v3866_v59  ;;  %v905_v55 = vadd.f32 %v901_v17, %v893_v46  ;;  %v1417_v19 = vadd.f32 %v1409_v11, %v4812_v20  ;;  %v1418_v26 = vadd.f32 %v1410_v39, %v4812_v20  ;;  %v1805_v1 = vmul.f32 %v3842_v34, %v3842_v34  ;;  %v4816_v11 = vld [vmem:[#allocation84_spill] sm:$0xff]  ;;  %v4817_v34 = vld [vmem:[#allocation19_spill] sm:$0xff] }
 0x26a   :  { %v3878_v45 = vsel %vm648_vm2, %v4803_v61, %v1388_v52  ;;  %v1429_v40 = vmul.f32 %v3853_v2, %v4814_v9  ;;  %v1430_v17 = vmul.f32 %v3848_v56, %v4814_v9  ;;  %v940_v30 = vadd.f32 %v4757_v21, %v928_v8  ;;  %v4819_v8 = vld [vmem:[#allocation127_spill] sm:$0xff] }
 0x26b   :  { %4813 = vst [vmem:[#allocation36_spill] sm:$0xff] %v3878_v45  ;;  %v917_v46 = vadd.f32 %v4815_v62, %v905_v55  ;;  %v1425_v39 = vadd.f32 %v1417_v19, %v4816_v11  ;;  %v1426_v20 = vadd.f32 %v1422_v31, %v1418_v26  ;;  %v1003_v10 = vmul.f32 %v4817_v34, %v4808_v41  ;;  %v4820_v31 = vld [vmem:[#allocation20_spill] sm:$0xff] }
 0x26c   :  { %1809 = vadd.xlane.f32.xlu0 %v1805_v1  ;;  %v1437_v52 = vmul.f32 %v3848_v56, %v4818_v24  ;;  %v1438_v61 = vmul.f32 %v3866_v59, %v4818_v24  ;;  %v983_v5 = vadd.f32 %v4760_v13, %v940_v30  ;;  %v1004_v19 = vmul.f32 %v4817_v34, %v4819_v8  ;;  %v4821_v1 = vld [vmem:[#allocation67_spill] sm:$0xff]  ;;  %v4822_v30 = vld [vmem:[#allocation126_spill] sm:$0xff] }
 0x26d   :  { %v929_v7 = vadd.f32 %v4811_v53, %v917_v46  ;;  %v1433_v55 = vadd.f32 %v1429_v40, %v1425_v39  ;;  %v1434_v62 = vadd.f32 %v1430_v17, %v1426_v20  ;;  %v1015_v26 = vmul.f32 %v4820_v31, %v4819_v8  ;;  %v4823_v17 = vld [vmem:[#allocation71_spill] sm:$0xff]  ;;  %v4824_v8 = vld [vmem:[#allocation61_spill] sm:$0xff] }
 0x26e   :  { %v1445_v41 = vmul.f32 %v3866_v59, %v4821_v1  ;;  %v1446_v11 = vmul.f32 %v3878_v45, %v4821_v1  ;;  %v995_v24 = vadd.f32 %v991_v22, %v983_v5  ;;  %v1016_v40 = vmul.f32 %v4820_v31, %v4822_v30  ;;  %v3908_v20 = vld [vmem:[#allocation2 + $0xa8] sm:$0xff]  ;;  %v4826_v5 = vld [vmem:[#allocation21_spill] sm:$0xff]  ;;  %v4827_v22 = vld [vmem:[#allocation48_spill] sm:$0xff] }
 0x26f   :  { %v941_v58 = vadd.f32 %v4757_v21, %v929_v7  ;;  %v1441_v46 = vadd.f32 %v1437_v52, %v1433_v55  ;;  %v1442_v53 = vadd.f32 %v1438_v61, %v1434_v62  ;;  %v1453_v39 = vmul.f32 %v3878_v45, %v4823_v17  ;;  %v4828_v62 = vld [vmem:[#allocation24_spill] sm:$0xff]  ;;  %v4829_v61 = vld [vmem:[#allocation25_spill] sm:$0xff]  ;;  %v4830_v17 = vld [vmem:[#allocation62_spill] sm:$0xff] }
 0x270   :  { %v3912_v9 = vmul.f32 %v3908_v20, %v4824_v8  ;;  %v1007_v56 = vadd.f32 %v1003_v10, %v995_v24  ;;  %v1027_v7 = vmul.f32 %v4826_v5, %v4822_v30  ;;  %v1095_v52 = vmul.f32 %v4828_v62, %v4827_v22  ;;  %v4831_v10 = vld [vmem:[#allocation114_spill] sm:$0xff] }
 0x271   :  { %v984_v59 = vadd.f32 %v980_v63, %v941_v58  ;;  %v1449_v1 = vadd.f32 %v1445_v41, %v1441_v46  ;;  %v1450_v54 = vadd.f32 %v1446_v11, %v1442_v53  ;;  %v1106_v55 = vmul.f32 %v4829_v61, %v4827_v22  ;;  %v4832_v24 = vld [vmem:[#allocation26_spill] sm:$0xff]  ;;  %v4833_v41 = vld [vmem:[#allocation129_spill] sm:$0xff]  ;;  %v4834_v46 = vld [vmem:[#allocation63_spill] sm:$0xff] }
 0x272   :  { %4825 = vst [vmem:[#allocation96_spill] sm:$0xff] %v3912_v9  ;;  %v1469_v45 = vmul.f32 %v3908_v20, %v4830_v17  ;;  %v1019_v2 = vadd.f32 %v1015_v26, %v1007_v56  ;;  %v1107_v63 = vmul.f32 %v4829_v61, %v4831_v10  ;;  %v1118_v53 = vmul.f32 %v4832_v24, %v4831_v10  ;;  %v4836_v26 = vld [vmem:[#allocation128_spill] sm:$0xff] }
 0x273   :  { %v996_v23 = vadd.f32 %v992_v44, %v984_v59  ;;  %v1457_v8 = vadd.f32 %v1453_v39, %v1449_v1  ;;  %v1458_v58 = vadd.f32 %v1450_v54, %v3051_v29  ;;  %v1119_v11 = vmul.f32 %v4832_v24, %v4833_v41  ;;  %v4835_v59 = vld [vmem:[#allocation27_spill] sm:$0xff]  ;;  %v4837_v1 = vld [vmem:[#allocation28_spill] sm:$0xff] }
 0x274   :  { %v1477_v30 = vmul.f32 %v3908_v20, %v4834_v46  ;;  %v1031_v12 = vadd.f32 %v1027_v7, %v1019_v2  ;;  %v1130_v54 = vmul.f32 %v4835_v59, %v4833_v41  ;;  %v1131_v39 = vmul.f32 %v4835_v59, %v4836_v26  ;;  %v4841_v59 = vld [vmem:[#allocation65_spill] sm:$0xff] }
 0x275   :  { %v1008_v22 = vadd.f32 %v1004_v19, %v996_v23  ;;  %v1465_v44 = vadd.f32 %v3912_v9, %v1457_v8  ;;  %v1466_v56 = vadd.f32 %v3912_v9, %v1458_v58  ;;  %v1142_v10 = vmul.f32 %v4837_v1, %v4836_v26  ;;  %v4839_v8 = vld [vmem:[#allocation86_spill] sm:$0xff]  ;;  %v4840_v58 = vld [vmem:[#allocation64_spill] sm:$0xff] }
 0x276   :  { %v1478_v17 = vmul.f32 %v3601_v14, %v4834_v46  ;;  %v1043_v23 = vadd.f32 %v4838_v18, %v1031_v12  ;;  %v1143_v7 = vmul.f32 %v4837_v1, %v4839_v8  ;;  %v1485_v41 = vmul.f32 %v3601_v14, %v4840_v58 }
 0x277   :  { %v1020_v29 = vadd.f32 %v1016_v40, %v1008_v22  ;;  %v1473_v2 = vadd.f32 %v1469_v45, %v1465_v44  ;;  %v1474_v19 = vadd.f32 %v1469_v45, %v1466_v56  ;;  %v1486_v9 = vmul.f32 %v3616_v42, %v4840_v58  ;;  %v4843_v44 = vld [vmem:[#allocation68_spill] sm:$0xff] }
 0x278   :  { %v1493_v26 = vmul.f32 %v3616_v42, %v4841_v59  ;;  %v1055_v40 = vadd.f32 %v4777_v50, %v1043_v23  ;;  %v1494_v45 = vmul.f32 %v3625_v36, %v4841_v59  ;;  %v1501_v56 = vmul.f32 %v3625_v36, %v4843_v44 }
 0x279   :  { %v1032_v16 = vadd.f32 %v4842_v60, %v1020_v29  ;;  %v1481_v22 = vadd.f32 %v1477_v30, %v1473_v2  ;;  %v1482_v12 = vadd.f32 %v1478_v17, %v1474_v19  ;;  %v1502_v46 = vmul.f32 %v3640_v37, %v4843_v44  ;;  %v4844_v29 = vld [vmem:[#allocation73_spill] sm:$0xff] }
 0x27a   :  { %v1098_v1 = vadd.f32 %v4778_v6, %v1055_v40  ;;  %v1509_v23 = vmul.f32 %v3640_v37, %v4844_v29  ;;  %v3964_v17 = vmul.f32 %v3908_v20, %v4844_v29  ;;  %v1523_v44 = vrot.slane %v3601_v14, 1  ;;  %v4845_v40 = vld [vmem:[#allocation29_spill] sm:$0xff] }
 0x27b   :  { %v1044_v58 = vadd.f32 %v4838_v18, %v1032_v16  ;;  %v1489_v24 = vadd.f32 %v1485_v41, %v1481_v22  ;;  %v1490_v32 = vadd.f32 %v1486_v9, %v1482_v12  ;;  %v1525_v16 = vrot.slane %v3616_v42, 1 }
 0x27c   :  { %v1110_v2 = vadd.f32 %v1106_v55, %v1098_v1  ;;  %v1154_v22 = vmul.f32 %v4845_v40, %v4839_v8  ;;  %v1527_v12 = vrot.slane %v3625_v36, 1 }
 0x27d   :  { %v1056_v30 = vadd.f32 %v4777_v50, %v1044_v58  ;;  %v1497_v19 = vadd.f32 %v1493_v26, %v1489_v24  ;;  %v1498_v60 = vadd.f32 %v1494_v45, %v1490_v32  ;;  %v1529_v32 = vrot.slane %v3640_v37, 1  ;;  %v4846_v24 = vld [vmem:[#allocation72_spill] sm:$0xff] }
 0x27e   :  { %v1122_v6 = vadd.f32 %v1118_v53, %v1110_v2  ;;  %v3977_v1 = vsel %vm847_vm3, %v1525_v16, %v4846_v24  ;;  %v3993_v58 = vsel %vm847_vm3, %v1527_v12, %v4846_v24  ;;  %v4847_v45 = vld [vmem:[#allocation92_spill] sm:$0xff]  ;;  %v4849_v12 = vld [vmem:[#allocation83_spill] sm:$0xff] }
 0x27f   :  { %v1099_v18 = vadd.f32 %v1095_v52, %v1056_v30  ;;  %v1505_v41 = vadd.f32 %v1501_v56, %v1497_v19  ;;  %v1506_v9 = vadd.f32 %v1502_v46, %v1498_v60  ;;  %v3982_v60 = vsel %vm847_vm3, %v1523_v44, %v4846_v24  ;;  %v3986_v46 = vld [vmem:[#allocation8 + $0x30] ss:$0 sm:$0xff] }
 0x280   :  { %v1134_v59 = vadd.f32 %v1130_v54, %v1122_v6  ;;  %v1166_v54 = vmul.f32 %v3986_v46, %v4839_v8  ;;  %v1572_v8 = vmul.f32 %v3977_v1, %v4788_v4  ;;  %v1579_v19 = vmul.f32 %v3977_v1, %v4799_v43 }
 0x281   :  { %v1111_v29 = vadd.f32 %v1107_v63, %v1099_v18  ;;  %v1513_v61 = vadd.f32 %v1509_v23, %v1505_v41  ;;  %v1514_v55 = vadd.f32 %v3964_v17, %v1506_v9  ;;  %v4848_v23 = vld [vmem:[#allocation93_spill] sm:$0xff]  ;;  %v1580_v16 = vmul.f32 %v3993_v58, %v4799_v43 }
 0x282   :  { %v1146_v53 = vadd.f32 %v1142_v10, %v1134_v59  ;;  %v4002_v59 = vsel %vm847_vm3, %v1529_v32, %v4846_v24  ;;  %v1571_v10 = vmul.f32 %v3982_v60, %v4788_v4 }
 0x283   :  { %v1123_v52 = vadd.f32 %v1119_v11, %v1111_v29  ;;  %v1551_v18 = vadd.f32 %v1513_v61, %v4731_v49  ;;  %v1552_v63 = vadd.f32 %v1514_v55, %v4731_v49  ;;  %v1564_v61 = vmul.f32 %v3982_v60, %v4774_v51 }
 0x284   :  { %v1587_v29 = vmul.f32 %v3993_v58, %v4849_v12  ;;  %v1588_v55 = vmul.f32 %v4002_v59, %v4849_v12  ;;  %v4857_v12 = vld [vmem:[#allocation35_spill] sm:$0xff] }
 0x285   :  { %v1135_v26 = vadd.f32 %v1131_v39, %v1123_v52  ;;  %v1559_v44 = vadd.f32 %v1551_v18, %v4847_v45  ;;  %v1560_v11 = vadd.f32 %v1552_v63, %v4847_v45  ;;  %v1158_v39 = vadd.f32 %v1154_v22, %v1146_v53  ;;  %v4850_v53 = vld [vmem:[#allocation85_spill] sm:$0xff] }
 0x286   :  { %v1595_v18 = vmul.f32 %v4002_v59, %v4850_v53  ;;  %v1609_v63 = vrot.slane %v3601_v14, 2 }
 0x287   :  { %v1147_v56 = vadd.f32 %v1143_v7, %v1135_v26  ;;  %v1567_v30 = vadd.f32 %v1559_v44, %v4848_v23  ;;  %v1568_v2 = vadd.f32 %v1564_v61, %v1560_v11  ;;  %v1170_v7 = vadd.f32 %v1166_v54, %v1158_v39  ;;  %v4854_v23 = vld [vmem:[#allocation32_spill] sm:$0xff] }
 0x288   :  { %v1611_v44 = vrot.slane %v3616_v42, 2  ;;  %v1613_v11 = vrot.slane %v3625_v36, 2  ;;  %v1615_v61 = vrot.slane %v3640_v37, 2 }
 0x289   :  { %v1159_v6 = vadd.f32 %v1154_v22, %v1147_v56  ;;  %v1575_v41 = vadd.f32 %v1571_v10, %v1567_v30  ;;  %v1576_v9 = vadd.f32 %v1572_v8, %v1568_v2  ;;  %v4852_v8 = vld [vmem:[#allocation31_spill] sm:$0xff]  ;;  %v4853_v56 = vld [vmem:[#allocation106_spill] sm:$0xff]  ;;  %v4855_v30 = vld [vmem:[#allocation116_spill] sm:$0xff] }
 0x28a   :  { %v1236_v39 = vmul.f32 %v4853_v56, %v4852_v8  ;;  %v1244_v2 = vmul.f32 %v4855_v30, %v4854_v23  ;;  %v4083_v23 = vrot.slane %v3908_v20, 3 }
 0x28b   :  { %v1171_v32 = vadd.f32 %v1166_v54, %v1159_v6  ;;  %v1583_v24 = vadd.f32 %v1579_v19, %v1575_v41  ;;  %v1584_v52 = vadd.f32 %v1580_v16, %v1576_v9  ;;  %v4856_v19 = vld [vmem:[#allocation77_spill] sm:$0xff] }
 0x28c   :  { %v4034_v16 = vsel %vm962_vm4, %v1609_v63, %v4856_v19  ;;  %v1337_v63 = vmul.f32 %v3774_v27, %v4675_v35 }
 0x28d   :  { %v4020_v26 = vcombine.low %v1170_v7, %v1171_v32  ;;  %v1591_v22 = vadd.f32 %v1587_v29, %v1583_v24  ;;  %v1592_v45 = vadd.f32 %v1588_v55, %v1584_v52  ;;  %v1252_v29 = vmul.f32 %v3681_v47, %v4857_v12  ;;  %v4858_v55 = vld [vmem:[#allocation46_spill] sm:$0xff] }
 0x28e   :  { %v1329_v7 = vmul.f32 %v3762_v57, %v4858_v55  ;;  %v4047_v32 = vsel %vm962_vm4, %v1615_v61, %v4856_v19  ;;  %v4052_v24 = vsel %vm962_vm4, %v1611_v44, %v4856_v19  ;;  %v4057_v52 = vsel %vm962_vm4, %v1613_v11, %v4856_v19  ;;  %v4861_v19 = vld [vmem:[#allocation23_spill] sm:$0xff] }
 0x28f   :  { %4851 = vst [vmem:[#allocation119_spill] sm:$0xff] %v4020_v26  ;;  %1795 = vadd.xlane.f32.xlu1 %v4020_v26  ;;  %v1599_v54 = vadd.f32 %v1595_v18, %v1591_v22  ;;  %v1600_v10 = vadd.f32 %v1592_v45, %v4757_v21  ;;  %v1806_v6 = vmul.f32 %v4020_v26, %v4020_v26  ;;  %4859 = vst [vmem:[#allocation41_spill] sm:$0xff] %v4047_v32  ;;  %v4862_v26 = vld [vmem:[#allocation37_spill] sm:$0xff] }
 0x290   :  { %v1650_v18 = vmul.f32 %v4034_v16, %v4817_v34  ;;  %v4067_v22 = vmul.f32 %v3796_v3, %v4781_v38  ;;  %v1657_v45 = vmul.f32 %v4034_v16, %v4820_v31  ;;  %v1658_v61 = vmul.f32 %v4052_v24, %v4820_v31 }
 0x291   :  { %v1637_v41 = vadd.f32 %v1599_v54, %v4760_v13  ;;  %v1638_v9 = vadd.f32 %v1600_v10, %v4760_v13  ;;  %v1666_v54 = vmul.f32 %v4057_v52, %v4826_v5  ;;  %v4860_v10 = vld [vmem:[#allocation22_spill] sm:$0xff] }
 0x292   :  { %v1673_v8 = vmul.f32 %v4057_v52, %v4860_v10  ;;  %v1674_v56 = vmul.f32 %v4047_v32, %v4860_v10  ;;  %v1697_v10 = vrot.slane %v3616_v42, 3 }
 0x293   :  { %1811 = vadd.xlane.f32.xlu1 %v1806_v6  ;;  %v1645_v47 = vadd.f32 %v1637_v41, %v4763_v48  ;;  %v1646_v53 = vadd.f32 %v1638_v9, %v4763_v48  ;;  %v1665_v48 = vmul.f32 %v4052_v24, %v4826_v5  ;;  %v1681_v6 = vmul.f32 %v4047_v32, %v4861_v19  ;;  %v2372_v9 = vld [vmem:[%s4336_s6] ss:$0 sm:$0xff] }
 0x294   :  { %v1267_v41 = vmul.f32 %v3694_v15, %v4765_v33  ;;  %v1240_v12 = vadd.f32 %v2372_v9, %v1236_v39  ;;  %v4097_v19 = vmul.f32 %v4083_v23, %v4828_v62  ;;  %v1699_v33 = vrot.slane %v3625_v36, 3  ;;  %v4864_v32 = vld [vmem:[#allocation25_spill] sm:$0xff] }
 0x295   :  { %v1653_v44 = vadd.f32 %v1645_v47, %v4766_v28  ;;  %v1654_v11 = vadd.f32 %v1650_v18, %v1646_v53  ;;  %v1695_v18 = vrot.slane %v3601_v14, 3  ;;  %v1260_v39 = vmul.f32 %v3694_v15, %v4862_v26 }
 0x297   :  { %v1661_v28 = vadd.f32 %v1657_v45, %v1653_v44  ;;  %v1662_v30 = vadd.f32 %v1658_v61, %v1654_v11  ;;  %v1271_v45 = vadd.f32 %v1267_v41, %v3712_v0  ;;  %v1248_v44 = vadd.f32 %v1244_v2, %v1240_v12 }
 0x298   :  { %v1727_v0 = vmul.f32 %v4083_v23, %v4864_v32  ;;  %v4109_v2 = vsel %vm1077_vm5, %v1695_v18, %v4083_v23  ;;  %v1701_v12 = vrot.slane %v3640_v37, 3 }
 0x299   :  { %v1669_v47 = vadd.f32 %v1665_v48, %v1661_v28  ;;  %v1670_v53 = vadd.f32 %v1666_v54, %v1662_v30  ;;  %v4863_v48 = vld [vmem:[#allocation43_spill] sm:$0xff]  ;;  %v1256_v28 = vadd.f32 %v1252_v29, %v1248_v44  ;;  %v4866_v29 = vld [vmem:[#allocation26_spill] sm:$0xff] }
 0x29a   :  { %v1279_v54 = vadd.f32 %v1271_v45, %v4863_v48  ;;  %v4868_v45 = vld [vmem:[#allocation51_spill] sm:$0xff] }
 0x29b   :  { %v1677_v11 = vadd.f32 %v1673_v8, %v1669_v47  ;;  %v1678_v61 = vadd.f32 %v1674_v56, %v1670_v53  ;;  %v1264_v8 = vadd.f32 %v1260_v39, %v1256_v28  ;;  %v4865_v56 = vld [vmem:[#allocation47_spill] sm:$0xff]  ;;  %v4120_v47 = vsel %vm1077_vm5, %v1697_v10, %v4083_v23  ;;  %v4867_v53 = vld [vmem:[#allocation42_spill] sm:$0xff] }
 0x29c   :  { %v1287_v41 = vadd.f32 %v1279_v54, %v4865_v56 }
 0x29d   :  { %v1685_v30 = vadd.f32 %v1681_v6, %v1677_v11  ;;  %v1686_v9 = vadd.f32 %v1678_v61, %v4777_v50  ;;  %v1735_v6 = vmul.f32 %v4083_v23, %v4866_v29  ;;  %v1272_v18 = vadd.f32 %v1264_v8, %v4867_v53  ;;  %v4869_v11 = vld [vmem:[#allocation52_spill] sm:$0xff]  ;;  %v4870_v61 = vld [vmem:[#allocation30_spill] sm:$0xff]  ;;  %v4871_v53 = vld [vmem:[#allocation27_spill] sm:$0xff] }
 0x29e   :  { %v1325_v44 = vadd.f32 %v1287_v41, %v4868_v45  ;;  %v1353_v39 = vmul.f32 %v4870_v61, %v4869_v11  ;;  %v1743_v41 = vmul.f32 %v4109_v2, %v4871_v53 }
 0x29f   :  { %v1723_v15 = vadd.f32 %v4097_v19, %v1685_v30  ;;  %v1724_v26 = vadd.f32 %v4097_v19, %v1686_v9  ;;  %v1736_v30 = vmul.f32 %v4109_v2, %v4866_v29  ;;  %v4131_v9 = vsel %vm1077_vm5, %v1699_v33, %v4083_v23  ;;  %v4872_v33 = vld [vmem:[#allocation45_spill] sm:$0xff] }
 0x2a0   :  { %v1280_v10 = vadd.f32 %v1272_v18, %v4863_v48  ;;  %v1333_v62 = vadd.f32 %v1329_v7, %v1325_v44  ;;  %v1322_v45 = vmul.f32 %v3762_v57, %v4872_v33  ;;  %v4873_v18 = vld [vmem:[#allocation28_spill] sm:$0xff] }
 0x2a1   :  { %v1731_v54 = vadd.f32 %v1727_v0, %v1723_v15  ;;  %v1732_v28 = vadd.f32 %v1727_v0, %v1724_v26  ;;  %v1744_v15 = vmul.f32 %v4120_v47, %v4871_v53  ;;  %v4141_v0 = vsel %vm1077_vm5, %v1701_v12, %v4083_v23 }
 0x2a2   :  { %v1288_v26 = vadd.f32 %v1280_v10, %v4865_v56  ;;  %v1341_v48 = vadd.f32 %v1337_v63, %v1333_v62  ;;  %v1751_v44 = vmul.f32 %v4120_v47, %v4873_v18  ;;  %v1752_v11 = vmul.f32 %v4131_v9, %v4873_v18 }
 0x2a3   :  { %v1739_v32 = vadd.f32 %v1735_v6, %v1731_v54  ;;  %v1740_v8 = vadd.f32 %v1736_v30, %v1732_v28  ;;  %v1759_v54 = vmul.f32 %v4131_v9, %v4845_v40  ;;  %v1330_v12 = vmul.f32 %v3774_v27, %v4858_v55 }
 0x2a4   :  { %v1326_v25 = vadd.f32 %v1322_v45, %v1288_v26  ;;  %v1349_v56 = vadd.f32 %v4067_v22, %v1341_v48  ;;  %v1760_v62 = vmul.f32 %v4141_v0, %v4845_v40  ;;  %v1338_v30 = vmul.f32 %v3796_v3, %v4675_v35  ;;  %v4876_v35 = vld [vmem:[#allocation57_spill] sm:$0xff]  ;;  %v4877_v3 = vld [vmem:[#allocation34_spill] sm:$0xff] }
 0x2a5   :  { %v1747_v7 = vadd.f32 %v1743_v41, %v1739_v32  ;;  %v1748_v6 = vadd.f32 %v1744_v15, %v1740_v8  ;;  %v4159_v32 = vmul.f32 %v3986_v46, %v4083_v23  ;;  %v1767_v27 = vmul.f32 %v3986_v46, %v4141_v0  ;;  %v4874_v15 = vld [vmem:[#allocation70_spill] sm:$0xff]  ;;  %v4879_v46 = vld [vmem:[#allocation79_spill] sm:$0xff] }
 0x2a6   :  { %v1334_v63 = vadd.f32 %v1330_v12, %v1326_v25  ;;  %v1357_v10 = vadd.f32 %v1353_v39, %v1349_v56  ;;  %v1346_v55 = vmul.f32 %v4870_v61, %v4781_v38  ;;  %v1415_v39 = vmul.f32 %v4877_v3, %v4876_v35  ;;  %v4880_v38 = vld [vmem:[#allocation59_spill] sm:$0xff]  ;;  %v4881_v61 = vld [vmem:[#allocation118_spill] sm:$0xff] }
 0x2a7   :  { %v1755_v28 = vadd.f32 %v1751_v44, %v1747_v7  ;;  %v1756_v57 = vadd.f32 %v1752_v11, %v1748_v6  ;;  %v4875_v7 = vld [vmem:[#allocation78_spill] sm:$0xff]  ;;  %v4878_v11 = vld [vmem:[#allocation69_spill] sm:$0xff]  ;;  %v1423_v12 = vmul.f32 %v4881_v61, %v4880_v38 }
 0x2a8   :  { %v1342_v22 = vadd.f32 %v1338_v30, %v1334_v63  ;;  %v1365_v26 = vadd.f32 %v1357_v10, %v4874_v15  ;;  %v4883_v63 = vld [vmem:[#allocation94_spill] sm:$0xff] }
 0x2a9   :  { %v1763_v8 = vadd.f32 %v1759_v54, %v1755_v28  ;;  %v1764_v41 = vadd.f32 %v1760_v62, %v1756_v57  ;;  %v4882_v62 = vld [vmem:[#allocation60_spill] sm:$0xff] }
 0x2aa   :  { %v1350_v48 = vadd.f32 %v1346_v55, %v1342_v22  ;;  %v1373_v6 = vadd.f32 %v1365_v26, %v4875_v7  ;;  %v1431_v30 = vmul.f32 %v4883_v63, %v4882_v62  ;;  %v4885_v55 = vld [vmem:[#allocation66_spill] sm:$0xff]  ;;  %v4886_v22 = vld [vmem:[#allocation36_spill] sm:$0xff] }
 0x2ab   :  { %v1771_v33 = vadd.f32 %v1767_v27, %v1763_v8  ;;  %v1772_v45 = vadd.f32 %v4159_v32, %v1764_v41  ;;  %v4884_v8 = vld [vmem:[#allocation56_spill] sm:$0xff]  ;;  %v1439_v26 = vmul.f32 %v4886_v22, %v4885_v55 }
 0x2ac   :  { %v1358_v54 = vadd.f32 %v1350_v48, %v4878_v11  ;;  %v1411_v25 = vadd.f32 %v1373_v6, %v4879_v46  ;;  %v1408_v41 = vmul.f32 %v4877_v3, %v4884_v8  ;;  %v1424_v6 = vmul.f32 %v4883_v63, %v4880_v38  ;;  %v4887_v3 = vld [vmem:[#allocation88_spill] sm:$0xff]  ;;  %v4892_v63 = vld [vmem:[#allocation63_spill] sm:$0xff] }
 0x2ad   :  { %v4170_v44 = vcombine.low %v1771_v33, %v1772_v45  ;;  %v1479_v8 = vmul.f32 %v3616_v42, %v4892_v63 }
 0x2ae   :  { %v1366_v56 = vadd.f32 %v1358_v54, %v4874_v15  ;;  %v1419_v28 = vadd.f32 %v1415_v39, %v1411_v25  ;;  %v1416_v15 = vmul.f32 %v4881_v61, %v4876_v35  ;;  %v4888_v25 = vld [vmem:[#allocation89_spill] sm:$0xff]  ;;  %v4891_v35 = vld [vmem:[#allocation62_spill] sm:$0xff] }
 0x2af   :  { %1797 = vadd.xlane.f32.xlu0 %v4170_v44  ;;  %v1807_v57 = vmul.f32 %v4170_v44, %v4170_v44  ;;  %v1471_v61 = vmul.f32 %v3601_v14, %v4891_v35 }
 0x2b0   :  { %v1374_v10 = vadd.f32 %v1366_v56, %v4875_v7  ;;  %v1427_v27 = vadd.f32 %v1423_v12, %v1419_v28  ;;  %v1432_v7 = vmul.f32 %v4886_v22, %v4882_v62  ;;  %v4889_v56 = vld [vmem:[#allocation87_spill] sm:$0xff]  ;;  %v2330_v62 = vld [vmem:[#allocation9] sm:$0xff]  }
 0x2b1   :  { %2269 = vmatprep.subr.bf16.mxu1 %v2330_v62 }
 0x2b2   :  { %v1412_v33 = vadd.f32 %v1408_v41, %v1374_v10  ;;  %v1435_v45 = vadd.f32 %v1431_v30, %v1427_v27  ;;  %v4893_v27 = vld [vmem:[#allocation61_spill] sm:$0xff]  ;;  %2270 = vmatpush3.bf16.msra.mxu1 %v2330_v62  ;;  %v1573_v62 = vmul.f32 %v3993_v58, %v4788_v4 }
 0x2b3   :  { %1813 = vadd.xlane.f32.xlu0 %v1807_v57  ;;  %v4890_v57 = vld [vmem:[#allocation96_spill] sm:$0xff]  ;;  %v1464_v55 = vmul.f32 %v3601_v14, %v4893_v27  ;;  %v1480_v14 = vmul.f32 %v3625_v36, %v4892_v63  ;;  %v4898_v63 = vld [vmem:[#allocation74_spill] sm:$0xff] }
 0x2b4   :  { %v1420_v48 = vadd.f32 %v1416_v15, %v1412_v33  ;;  %v1443_v39 = vadd.f32 %v1439_v26, %v1435_v45  ;;  %v4894_v26 = vld [vmem:[#allocation64_spill] sm:$0xff]  ;;  %v1472_v15 = vmul.f32 %v3616_v42, %v4891_v35  ;;  %v4897_v35 = vld [vmem:[#allocation75_spill] sm:$0xff] }
 0x2b5   :  { %v1487_v33 = vmul.f32 %v3625_v36, %v4894_v26 }
 0x2b6   :  { %v1428_v11 = vadd.f32 %v1424_v6, %v1420_v48  ;;  %v1451_v54 = vadd.f32 %v1443_v39, %v4887_v3  ;;  %v4895_v6 = vld [vmem:[#allocation65_spill] sm:$0xff] }
 0x2b7   :  { %v1495_v39 = vmul.f32 %v3640_v37, %v4895_v6  ;;  %v1496_v42 = vmul.f32 %v3908_v20, %v4895_v6 }
 0x2b8   :  { %v1436_v46 = vadd.f32 %v1432_v7, %v1428_v11  ;;  %v1459_v12 = vadd.f32 %v1451_v54, %v4888_v25  ;;  %v4896_v7 = vld [vmem:[#allocation68_spill] sm:$0xff] }
 0x2b9   :  { %v1503_v11 = vmul.f32 %v3908_v20, %v4896_v7  ;;  %v1550_v20 = vmul.f32 %v3982_v60, %v4898_v63  ;;  %v4906_v63 = vld [vmem:[#allocation25_spill] sm:$0xff] }
 0x2ba   :  { %v1444_v28 = vadd.f32 %v1436_v46, %v4889_v56  ;;  %v1467_v10 = vadd.f32 %v4890_v57, %v1459_v12  ;;  %v1488_v46 = vmul.f32 %v3640_v37, %v4894_v26  ;;  %v1566_v26 = vmul.f32 %v3993_v58, %v4774_v51 }
 0x2bb   :  { %v1651_v58 = vmul.f32 %v4052_v24, %v4817_v34 }
 0x2bc   :  { %v1452_v30 = vadd.f32 %v1444_v28, %v4887_v3  ;;  %v1475_v38 = vadd.f32 %v1471_v61, %v1467_v10  ;;  %v1557_v61 = vmul.f32 %v3982_v60, %v4897_v35  ;;  %v1574_v60 = vmul.f32 %v4002_v59, %v4788_v4 }
 0x2be   :  { %v1460_v41 = vadd.f32 %v1452_v30, %v4888_v25  ;;  %v1483_v22 = vadd.f32 %v1479_v8, %v1475_v38  ;;  %v1565_v38 = vmul.f32 %v3977_v1, %v4774_v51 }
 0x2c0   :  { %v1468_v45 = vadd.f32 %v1464_v55, %v1460_v41  ;;  %v1491_v48 = vadd.f32 %v1487_v33, %v1483_v22  ;;  %v1581_v55 = vmul.f32 %v4002_v59, %v4799_v43  ;;  %v4902_v59 = vld [vmem:[#allocation17_spill] sm:$0xff] }
 0x2c2   :  { %v1476_v3 = vadd.f32 %v1472_v15, %v1468_v45  ;;  %v1499_v54 = vadd.f32 %v1495_v39, %v1491_v48  ;;  %v4899_v15 = vld [vmem:[#allocation111_spill] sm:$0xff] }
 0x2c4   :  { %v1484_v25 = vadd.f32 %v1480_v14, %v1476_v3  ;;  %v1507_v12 = vadd.f32 %v1503_v11, %v1499_v54  ;;  %v1636_v14 = vmul.f32 %v4034_v16, %v4902_v59 }
 0x2c6   :  { %v1492_v56 = vadd.f32 %v1488_v46, %v1484_v25  ;;  %v1515_v28 = vadd.f32 %v3964_v17, %v1507_v12  ;;  %v1659_v46 = vmul.f32 %v4057_v52, %v4820_v31  ;;  %v4903_v12 = vld [vmem:[#allocation41_spill] sm:$0xff] }
 0x2c8   :  { %v1500_v57 = vadd.f32 %v1496_v42, %v1492_v56  ;;  %v1553_v10 = vadd.f32 %v1515_v28, %v4731_v49  ;;  %v1558_v49 = vmul.f32 %v3977_v1, %v4897_v35  ;;  %v4900_v1 = vld [vmem:[#allocation110_spill] sm:$0xff]  ;;  %v1667_v56 = vmul.f32 %v4903_v12, %v4826_v5  ;;  %v4904_v35 = vld [vmem:[#allocation113_spill] sm:$0xff] }
 0x2c9   :  { %v1729_v5 = vmul.f32 %v4109_v2, %v4906_v63 }
 0x2ca   :  { %v1508_v30 = vadd.f32 %v1503_v11, %v1500_v57  ;;  %v1561_v36 = vadd.f32 %v1557_v61, %v1553_v10  ;;  %v4901_v11 = vld [vmem:[#allocation18_spill] sm:$0xff]  ;;  %v1652_v57 = vmul.f32 %v4057_v52, %v4817_v34  ;;  %v1737_v52 = vmul.f32 %v4120_v47, %v4866_v29 }
 0x2cb   :  { %v1643_v43 = vmul.f32 %v4034_v16, %v4901_v11  ;;  %v1660_v16 = vmul.f32 %v4903_v12, %v4820_v31 }
 0x2cc   :  { %v1516_v37 = vadd.f32 %v3964_v17, %v1508_v30  ;;  %v1569_v8 = vadd.f32 %v1565_v38, %v1561_v36 }
 0x2ce   :  { %v1554_v41 = vadd.f32 %v1550_v20, %v1516_v37  ;;  %v1577_v27 = vadd.f32 %v1573_v62, %v1569_v8  ;;  %v4907_v8 = vld [vmem:[#allocation24_spill] sm:$0xff] }
 0x2cf   :  { %v1722_v62 = vmul.f32 %v4109_v2, %v4907_v8 }
 0x2d0   :  { %v1562_v22 = vadd.f32 %v1558_v49, %v1554_v41  ;;  %v1585_v17 = vadd.f32 %v1581_v55, %v1577_v27  ;;  %v1745_v41 = vmul.f32 %v4131_v9, %v4871_v53 }
 0x2d2   :  { %v1570_v33 = vadd.f32 %v1566_v26, %v1562_v22  ;;  %v1593_v45 = vadd.f32 %v1585_v17, %v4899_v15  ;;  %v1753_v22 = vmul.f32 %v4141_v0, %v4873_v18  ;;  %v1761_v26 = vmul.f32 %v4083_v23, %v4845_v40 }
 0x2d4   :  { %v1578_v48 = vadd.f32 %v1574_v60, %v1570_v33  ;;  %v1601_v6 = vadd.f32 %v1593_v45, %v4757_v21  ;;  %v1746_v33 = vmul.f32 %v4141_v0, %v4871_v53  ;;  %v2331_v53 = vld [vmem:[#allocation9 + $0x8] sm:$0xff]  }
 0x2d5   :  { %2271 = vmatprep.subr.bf16.mxu1 %v2331_v53 }
 0x2d6   :  { %v1586_v39 = vadd.f32 %v1578_v48, %v4900_v1  ;;  %v1639_v7 = vadd.f32 %v1601_v6, %v4760_v13  ;;  %v1644_v13 = vmul.f32 %v4052_v24, %v4901_v11  ;;  %v4905_v24 = vld [vmem:[#allocation112_spill] sm:$0xff]  ;;  %2272 = vmatpush3.bf16.msra.mxu1 %v2331_v53  ;;  %v2340_v53 = vld [vmem:[#allocation11 + $0x10] sm:$0xff]  }
 0x2d8   :  { %v1594_v3 = vadd.f32 %v1586_v39, %v4899_v15  ;;  %v1647_v51 = vadd.f32 %v1643_v43, %v1639_v7  ;;  %v2333_v7 = vld [vmem:[#allocation9 + $0x18] sm:$0xff]  }
 0x2da   :  { %v1602_v4 = vadd.f32 %v1594_v3, %v4757_v21  ;;  %v1655_v54 = vadd.f32 %v1651_v58, %v1647_v51  ;;  %v2335_v58 = vld [vmem:[#allocation9 + $0x28] sm:$0xff]  }
 0x2dc   :  { %v1640_v25 = vadd.f32 %v1636_v14, %v1602_v4  ;;  %v1663_v42 = vadd.f32 %v1659_v46, %v1655_v54  ;;  %v2336_v54 = vld [vmem:[#allocation9 + $0x30] sm:$0xff]  }
 0x2de   :  { %v1648_v28 = vadd.f32 %v1644_v13, %v1640_v25  ;;  %v1671_v21 = vadd.f32 %v1667_v56, %v1663_v42  ;;  %v2337_v42 = vld [vmem:[#allocation9 + $0x38] sm:$0xff]   ;;  %v2338_v56 = vld [vmem:[#allocation11] sm:$0xff]  }
 0x2df   :  { %2289 = vmatprep.subr.bf16.mxu0 %v2338_v56 }
 0x2e0   :  { %v1656_v10 = vadd.f32 %v1652_v57, %v1648_v28  ;;  %v1679_v61 = vadd.f32 %v1671_v21, %v4904_v35  ;;  %v2339_v28 = vld [vmem:[#allocation11 + $0x8] sm:$0xff]   ;;  %2290 = vmatpush3.bf16.msra.mxu0 %v2338_v56 }
 0x2e1   :  { %2291 = vmatprep.subr.bf16.mxu0 %v2339_v28  ;;  %v4908_v21 = vld [vmem:[#allocation117_spill] sm:$0xff] }
 0x2e2   :  { %v1664_v30 = vadd.f32 %v1660_v16, %v1656_v10  ;;  %v1687_v36 = vadd.f32 %v1679_v61, %v4777_v50  ;;  %v4909_v61 = vld [vmem:[#allocation119_spill] sm:$0xff] }
 0x2e4   :  { %v1672_v38 = vadd.f32 %v1664_v30, %v4905_v24  ;;  %v1725_v37 = vadd.f32 %v4097_v19, %v1687_v36  ;;  %v1730_v19 = vmul.f32 %v4120_v47, %v4906_v63  ;;  %v1754_v47 = vmul.f32 %v4083_v23, %v4873_v18  ;;  %v2332_v18 = vld [vmem:[#allocation9 + $0x10] sm:$0xff]   ;;  %2292 = vmatpush3.bf16.msra.mxu0 %v2339_v28 }
 0x2e5   :  { %2273 = vmatprep.subr.bf16.mxu1 %v2332_v18  ;;  %2293 = vmatprep.subr.bf16.mxu0 %v2340_v53 }
 0x2e6   :  { %v1680_v20 = vadd.f32 %v1672_v38, %v4904_v35  ;;  %v1733_v34 = vadd.f32 %v1729_v5, %v1725_v37  ;;  %2274 = vmatpush3.bf16.msra.mxu1 %v2332_v18  ;;  %v2198_v35 = vld [vmem:[%s4337_s7] ss:$0 sm:$0xff]  ;;  %v2345_v18 = vld [vmem:[#allocation11 + $0x38] sm:$0xff]  }
 0x2e7   :  { %2275 = vmatprep.subr.bf16.mxu1 %v2333_v7  ;;  %v2199_v37 = vld [vmem:[%s4338_s8] ss:$0 sm:$0xff] }
 0x2e8   :  { %v1688_v31 = vadd.f32 %v1680_v20, %v4777_v50  ;;  %v1741_v49 = vadd.f32 %v1737_v52, %v1733_v34  ;;  %v1738_v50 = vmul.f32 %v4131_v9, %v4866_v29  ;;  %2294 = vmatpush3.bf16.msra.mxu0 %v2340_v53 }
 0x2ea   :  { %v1726_v27 = vadd.f32 %v1722_v62, %v1688_v31  ;;  %v1749_v55 = vadd.f32 %v1745_v41, %v1741_v49  ;;  %2276 = vmatpush3.bf16.msra.mxu1 %v2333_v7  ;;  %v2200_v7 = vld [vmem:[%s4340_s10] ss:$0 sm:$0xff] }
 0x2ec   :  { %v1734_v17 = vadd.f32 %v1730_v19, %v1726_v27  ;;  %v1757_v2 = vadd.f32 %v1753_v22, %v1749_v55 }
 0x2ee   :  { %v1742_v60 = vadd.f32 %v1738_v50, %v1734_v17  ;;  %v1765_v15 = vadd.f32 %v1761_v26, %v1757_v2 }
 0x2f0   :  { %v1750_v45 = vadd.f32 %v1746_v33, %v1742_v60  ;;  %v1773_v48 = vadd.f32 %v4159_v32, %v1765_v15 }
 0x2f2   :  { %v1758_v6 = vadd.f32 %v1754_v47, %v1750_v45 }
 0x2f4   :  { %v1766_v1 = vadd.f32 %v1761_v26, %v1758_v6 }
 0x2f5   :  { %v1794_v9 = vpop.xlane.xlu0 %1793 }
 0x2f6   :  { %v1774_v40 = vadd.f32 %v4159_v32, %v1766_v1  ;;  %v1801_v0 = vmul.f32 0.03125, %v1794_v9  ;;  %v2334_v32 = vld [vmem:[#allocation9 + $0x20] sm:$0xff]  }
 0x2f7   :  { %2277 = vmatprep.subr.bf16.mxu1 %v2334_v32 }
 0x2f8   :  { %v4290_v39 = vcombine.low %v1773_v48, %v1774_v40  ;;  %v1821_v43 = vmul.f32 %v1801_v0, %v1801_v0  ;;  %2278 = vmatpush3.bf16.msra.mxu1 %v2334_v32  ;;  %v1829_v16 = vsub.f32 %v4908_v21, %v1801_v0  ;;  %v2342_v0 = vld [vmem:[#allocation11 + $0x20] sm:$0xff]  }
 0x2f9   :  { %v1810_v23 = vpop.xlane.xlu0 %1809  ;;  %2279 = vmatprep.subr.bf16.mxu1 %v2335_v58 }
 0x2fa   :  { %1799 = vadd.xlane.f32.xlu1 %v4290_v39  ;;  %v1808_v29 = vmul.f32 %v4290_v39, %v4290_v39  ;;  %v1817_v11 = vmul.f32 0.03125, %v1810_v23  ;;  %v2341_v23 = vld [vmem:[#allocation11 + $0x18] sm:$0xff]  }
 0x2fb   :  { %2295 = vmatprep.subr.bf16.mxu0 %v2341_v23 }
 0x2fc   :  { %v1825_v3 = vsub.f32 %v1817_v11, %v1821_v43  ;;  %2280 = vmatpush3.bf16.msra.mxu1 %v2335_v58  ;;  %2296 = vmatpush3.bf16.msra.mxu0 %v2341_v23 }
 0x2fd   :  { %2281 = vmatprep.subr.bf16.mxu1 %v2336_v54  ;;  %2297 = vmatprep.subr.bf16.mxu0 %v2342_v0 }
 0x2fe   :  { %1815 = vadd.xlane.f32.xlu1 %v1808_v29  ;;  %v1833_v59 = vadd.f32 1e-06, %v1825_v3 }
 0x300   :  { %2354 = vrsqrt.f32 %v1833_v59  ;;  %2282 = vmatpush3.bf16.msra.mxu1 %v2336_v54  ;;  %2298 = vmatpush3.bf16.msra.mxu0 %v2342_v0 }
 0x301   :  { %2283 = vmatprep.subr.bf16.mxu1 %v2337_v42 }
 0x304   :  { %2284 = vmatpush3.bf16.msra.mxu1 %v2337_v42 }
 0x30a   :  { %v2355_v57 = vpop.eup %2354 }
 0x30b   :  { %v1841_v10 = vmul.f32 %v2355_v57, %v1829_v16 }
 0x30d   :  { %v1851_v38 = vmul.f32 %v2198_v35, %v1841_v10 }
 0x30f   :  { %v1861_v5 = vadd.f32 %v2199_v37, %v1851_v38 }
 0x31c   :  { %v1796_v51 = vpop.xlane.xlu1 %1795 }
 0x31d   :  { %v1802_v4 = vmul.f32 0.03125, %v1796_v51 }
 0x31f   :  { %v1822_v46 = vmul.f32 %v1802_v4, %v1802_v4  ;;  %v1830_v30 = vsub.f32 %v4909_v61, %v1802_v4 }
 0x320   :  { %v1812_v14 = vpop.xlane.xlu1 %1811 }
 0x321   :  { %v1818_v13 = vmul.f32 0.03125, %v1812_v14 }
 0x323   :  { %v1826_v25 = vsub.f32 %v1818_v13, %v1822_v46 }
 0x325   :  { %v1834_v12 = vadd.f32 1e-06, %v1826_v25 }
 0x327   :  { %2356 = vrsqrt.f32 %v1834_v12 }
 0x331   :  { %v2357_v36 = vpop.eup %2356 }
 0x332   :  { %v1842_v24 = vmul.f32 %v2357_v36, %v1830_v30 }
 0x334   :  { %v1852_v63 = vmul.f32 %v2198_v35, %v1842_v24 }
 0x336   :  { %v1862_v20 = vadd.f32 %v2199_v37, %v1852_v63 }
 0x338   :  { %v1865_v34 = vpack.c.bf16 %v1862_v20, %v1861_v5  ;;  %v2209_v20 = vld [vmem:[%s4342_s12] ss:$0 sm:$0xff]  ;;  %s2523_s12 = smov [#allocation12]  }
 0x33a   :  { %2285 = vmatprep.mubr.bf16.mxu1 %v1865_v34 }
 0x33c   :  { %v1798_v52 = vpop.xlane.xlu0 %1797 }
 0x33d   :  { %v1803_v8 = vmul.f32 0.03125, %v1798_v52  ;;  %v2218_v52 = vld [vmem:[%s4343_s13] ss:$0 sm:$0xff]  ;;  %s2172_s13 = sshll.u32 %s2523_s12, 4  ;;  %s2173_s13 = int_to_ptr.vmem [resolvable:$true] %s2172_s13 }
 0x33e   :  { %s2483_s1 = scalar_lea.vmem %s2173_s13, 32  ;;  %p2488_p13 = scmp.lt.s32.totalorder %s2173_s13, %s2173_s13 }
 0x33f   :  { %v1823_v49 = vmul.f32 %v1803_v8, %v1803_v8  ;;  %v1831_v33 = vsub.f32 %v4170_v44, %v1803_v8  ;;  %v2343_v44 = vld [vmem:[#allocation11 + $0x28] sm:$0xff]   ;;  %p2484_p12 = scmp.ne.s32.totalorder %s2173_s13, %s2483_s1  ;;  %p2489_p0 = scmp.lt.s32.totalorder %s2483_s1, %s2483_s1 }
 0x340   :  { %v1814_v31 = vpop.xlane.xlu0 %1813  ;;  %2299 = vmatprep.subr.bf16.mxu0 %v2343_v44 }
 0x341   :  { %v1819_v62 = vmul.f32 0.03125, %v1814_v31  ;;  %2300 = vmatpush3.bf16.msra.mxu0 %v2343_v44  ;;  %p2490_p1 = por %p2489_p0, %p2488_p13 }
 0x343   :  { %v1827_v41 = vsub.f32 %v1819_v62, %v1823_v49  ;;  %p2491_p2 = pnand %p2490_p1, %p2484_p12 }
 0x345   :  { %v1835_v55 = vadd.f32 1e-06, %v1827_v41 }
 0x347   :  { %2358 = vrsqrt.f32 %v1835_v55 }
 0x351   :  { %v2359_v60 = vpop.eup %2358 }
 0x352   :  { %v1843_v47 = vmul.f32 %v2359_v60, %v1831_v33  ;;  %v4911_v60 = vld [vmem:[#allocation105_spill] sm:$0xff] }
 0x354   :  { %v1853_v6 = vmul.f32 %v2198_v35, %v1843_v47  ;;  %v4912_v47 = vld [vmem:[#allocation95_spill] sm:$0xff] }
 0x356   :  { %v1863_v40 = vadd.f32 %v2199_v37, %v1853_v6 }
 0x387   :  { %v1800_v19 = vpop.xlane.xlu1 %1799 }
 0x388   :  { %v1804_v27 = vmul.f32 0.03125, %v1800_v19 }
 0x38a   :  { %v1824_v26 = vmul.f32 %v1804_v27, %v1804_v27  ;;  %v1832_v15 = vsub.f32 %v4290_v39, %v1804_v27  ;;  %v2344_v39 = vld [vmem:[#allocation11 + $0x30] sm:$0xff]  }
 0x38b   :  { %v1816_v22 = vpop.xlane.xlu1 %1815  ;;  %2301 = vmatprep.subr.bf16.mxu0 %v2344_v39 }
 0x38c   :  { %v1820_v17 = vmul.f32 0.03125, %v1816_v22  ;;  %2302 = vmatpush3.bf16.msra.mxu0 %v2344_v39 }
 0x38d   :  { %2303 = vmatprep.subr.bf16.mxu0 %v2345_v18 }
 0x38e   :  { %v1828_v50 = vsub.f32 %v1820_v17, %v1824_v26 }
 0x390   :  { %v1836_v2 = vadd.f32 1e-06, %v1828_v50  ;;  %2304 = vmatpush3.bf16.msra.mxu0 %v2345_v18  ;;  %v4910_v50 = vld [vmem:[#allocation101_spill] sm:$0xff] }
 0x392   :  { %2360 = vrsqrt.f32 %v1836_v2 }
 0x39c   :  { %v2361_v45 = vpop.eup %2360 }
 0x39d   :  { %v1844_v48 = vmul.f32 %v2361_v45, %v1832_v15  ;;  %v4913_v45 = vld [vmem:[#allocation98_spill] sm:$0xff] }
 0x39f   :  { %v1854_v1 = vmul.f32 %v2198_v35, %v1844_v48 }
 0x3a1   :  { %v1864_v29 = vadd.f32 %v2199_v37, %v1854_v1 }
 0x3a3   :  { %v1866_v9 = vpack.c.bf16 %v1864_v29, %v1863_v40 }
 0x3a5   :  { %2286 = vmatmul.mubr.bf16.vlgmr.msra.gmra.mrb[0].mxu1 %v1866_v9 }
 0x478   :  { %v2287_v11 = vpop.f32.mrb[0].mxu1 }
 0x479   :  { %v1981_v43 = vadd.f32 %v2287_v11, %v2200_v7  ;;  %v1972_v32 = vpop.f32.mrb[1].mxu1 }
 0x47a   :  { %v1973_v3 = vadd.f32 %v2200_v7, %v1972_v32  ;;  %v2288_v51 = vpop.f32.mrb[2].mxu1 }
 0x47b   :  { %v1993_v58 = vmul.f32 0.70710677, %v1981_v43  ;;  %v1984_v4 = vadd.f32 %v2288_v51, %v2200_v7  ;;  %v1975_v59 = vpop.f32.mrb[3].mxu1  ;;  %v1989_v21 = vmul.f32 0.5, %v1981_v43 }
 0x47c   :  { %v1991_v14 = vmul.f32 0.70710677, %v1973_v3  ;;  %v1976_v54 = vadd.f32 %v2200_v7, %v1975_v59  ;;  %v1987_v35 = vmul.f32 0.5, %v1973_v3 }
 0x47d   :  { %2362 = verf.f32 %v1993_v58  ;;  %v1994_v46 = vmul.f32 0.70710677, %v1984_v4  ;;  %v1990_v16 = vmul.f32 0.5, %v1984_v4 }
 0x47e   :  { %2364 = verf.f32 %v1991_v14  ;;  %v1992_v13 = vmul.f32 0.70710677, %v1976_v54  ;;  %v1988_v61 = vmul.f32 0.5, %v1976_v54 }
 0x47f   :  { %2366 = verf.f32 %v1994_v46 }
 0x480   :  { %2368 = verf.f32 %v1992_v13 }
 0x487   :  { %v2363_v25 = vpop.eup %2362 }
 0x488   :  { %v2365_v42 = vpop.eup %2364  ;;  %v2001_v12 = vadd.f32 1.0, %v2363_v25 }
 0x489   :  { %v2367_v56 = vpop.eup %2366  ;;  %v1999_v28 = vadd.f32 1.0, %v2365_v42 }
 0x48a   :  { %v2369_v57 = vpop.eup %2368  ;;  %v2002_v10 = vadd.f32 1.0, %v2367_v56  ;;  %v2005_v36 = vmul.f32 %v2001_v12, %v1989_v21 }
 0x48b   :  { %v2000_v30 = vadd.f32 1.0, %v2369_v57  ;;  %v2003_v38 = vmul.f32 %v1999_v28, %v1987_v35 }
 0x48c   :  { %v2006_v24 = vmul.f32 %v2002_v10, %v1990_v16 }
 0x48d   :  { %v2004_v37 = vmul.f32 %v2000_v30, %v1988_v61 }
 0x48e   :  { %v2008_v63 = vpack.c.bf16 %v2006_v24, %v2005_v36 }
 0x48f   :  { %v2007_v5 = vpack.c.bf16 %v2004_v37, %v2003_v38 }
 0x491   :  { %2305 = vmatprep.mubr.bf16.mxu0 %v2007_v5 }
 0x492   :  { %2306 = vmatmul.mubr.bf16.vlgmr.msra.gmra.mrb[4].mxu0 %v2008_v63 }
 0x565   :  { %v2307_v34 = vpop.f32.mrb[4].mxu0 }
 0x566   :  { %v2123_v31 = vadd.f32 %v2307_v34, %v2209_v20  ;;  %v2114_v8 = vpop.f32.mrb[5].mxu0 }
 0x567   :  { %v2115_v62 = vadd.f32 %v2209_v20, %v2114_v8  ;;  %v2308_v49 = vpop.f32.mrb[6].mxu0 }
 0x568   :  { %v2138_v41 = vmul.f32 %v2218_v52, %v2123_v31  ;;  %v2126_v19 = vadd.f32 %v2308_v49, %v2209_v20  ;;  %v2117_v27 = vpop.f32.mrb[7].mxu0 }
 0x569   :  { %v2136_v55 = vmul.f32 %v2218_v52, %v2115_v62  ;;  %v2118_v22 = vadd.f32 %v2209_v20, %v2117_v27 }
 0x56a   :  { %v2139_v26 = vmul.f32 %v2218_v52, %v2126_v19  ;;  %v2142_v2 = vadd.f32 %v2138_v41, %v4910_v50 }
 0x56b   :  { %v2137_v17 = vmul.f32 %v2218_v52, %v2118_v22  ;;  %v2140_v15 = vadd.f32 %v2136_v55, %v4912_v47 }
 0x56c   :  { %v2143_v33 = vadd.f32 %v2139_v26, %v4911_v60 }
 0x56d   :  { %v2141_v48 = vadd.f32 %v2137_v17, %v4913_v45 }
 0x56e   :  { %v2151_v6 = vadd.f32 %v2143_v33, %v2142_v2 }
 0x56f   :  { %v2144_v1 = vadd.f32 %v2141_v48, %v2140_v15 }
 0x570   :  { %v2152_v40 = vrot.slane %v2151_v6, 4 }
 0x571   :  { %v2145_v29 = vrot.slane %v2144_v1, 4 }
 0x572   :  { %v2153_v9 = vadd.f32 %v2152_v40, %v2151_v6 }
 0x573   :  { %v2146_v53 = vadd.f32 %v2145_v29, %v2144_v1 }
 0x574   :  { %v2154_v23 = vrot.slane %v2153_v9, 2 }
 0x575   :  { %v2147_v0 = vrot.slane %v2146_v53, 2 }
 0x576   :  { %v2155_v44 = vadd.f32 %v2154_v23, %v2153_v9 }
 0x577   :  { %v2148_v39 = vadd.f32 %v2147_v0, %v2146_v53 }
 0x578   :  { %v2156_v18 = vrot.slane %v2155_v44, 1 }
 0x579   :  { %v2149_v7 = vrot.slane %v2148_v39, 1 }
 0x57a   :  { %v2157_v11 = vadd.f32 %v2156_v18, %v2155_v44 }
 0x57b   :  { %v2150_v43 = vadd.f32 %v2149_v7, %v2148_v39 }
 0x57c   :  { %v2159_v32 = vmul.f32 0.0625, %v2157_v11 }
 0x57d   :  { %v2158_v3 = vmul.f32 0.0625, %v2150_v43 }
 0x57f   :  { %v2163_v51 = vsel %vm2162_vm6, %v2159_v32, %v2158_v3 }
 0x580   :  { %2165 = vst [vmem:[#allocation12] sm:$0x3] %v2163_v51 }
 0x581   :  { %2494 = shalt.err (!%p2491_p2)
}
 0x582   :  { %s2495_s27 = scalar_lea.hbm %s4344_s14, 32 }
 0x583   :  { %p2496_p3 = scmp.ne.s32.totalorder %s4344_s14, %s2495_s27  ;;  %p2499_p4 = scmp.lt.u32.totalorder %s2495_s27, %s4344_s14 }
 0x585   :  { %p2501_p5 = pnand %p2499_p4, %p2496_p3 }
 0x587   :  { %2504 = shalt.err (!%p2501_p5)
}
 0x588   :  { %2175 = dma.vmem_to_hbm [thread:$0]  %s2173_s13, 32, %s4344_s14, [#allocation5]  }
 0x589   :  { %2511 = dma.done.wait [#allocation5], 32  }
 0x58a   :  { %2512 = vsyncadd [#allocation5], 4294967264 }
 0x58b   :  { %2179 = vsyncpa [#allocation4], 1 }
 0x58c   :  { %2180 = vsyncpa [#allocation7], 1 }
 0x58d   :  { %2181 = vsyncpa [#allocation10], 1 }
 0x58e   :  { %2182 = vsyncpa [#allocation5], 1 }

</bundles_post_ra>
